<compile_context>
chip_gen: v5e
topology: v5e:2x2
jax: 0.10.0
libtpu: 0.0.40
codegen_flags: <defaults>
</compile_context>

<pallas_src>
import jax
import jax.numpy as jnp
import numpy as np
from jax.experimental import pallas as pl
from jax.experimental.pallas import tpu as pltpu


def _round_up(n, m):
    return ((n + m - 1) // m) * m


# ----------------------------------------------------------------------------- kernel
def leaky_residual_kernel(
    # inputs -----------------------------------------------------------------
    x_ref,                     # (TB, E)        time-major concatenated embeddings, 2D
    w_lin_ref, b_lin_ref,      # (E, Hp), (1, Hp)           embedding_linear (H padded to Hp)
    w_ih_ref, w_hh_ref,        # (L, Hp, 3*Hp)              GRU weights, gate strides [r|z|n]@Hp
    b_gx_ref,                  # (L, 1, 3*Hp)               b_ih with b_hh[r,z] pre-folded
    b_hn_ref,                  # (L, 1, Hp)                 b_hh[n] (gated by r, kept separate)
    h0_ref,                    # (L, B, Hp)                 initial GRU hidden states (padded)
    w_lin2_ref, b_lin2_ref,    # (Hp, Hp), (1, Hp)          .linear
    w_out_ref, b_out_ref,      # (Hp, Vpad), (1, Vpad)      .output (lane-padded to 128)
    # outputs ----------------------------------------------------------------
    out_ref,                   # (TB, Vpad)                 lane/sublane-dense logits
    hN_ref,                    # (L, B, Hp)                 aliased with h0 input
    # scratch ----------------------------------------------------------------
    stream_ref,                # (TB, Hp) VMEM              residual stream, resident
):
    TB, Hp = stream_ref.shape
    L, B, _ = h0_ref.shape
    T = TB // B

    def leaky(v):
        return jnp.where(v > 0, v, 0.01 * v)           # nn.LeakyReLU default slope

    # --- stage 0: embedding linear, one (TB, E) @ (E, Hp) matmul ----------------
    stream_ref[...] = leaky(
        jnp.dot(x_ref[...], w_lin_ref[...], preferred_element_type=jnp.float32)
        + b_lin_ref[...])

    # --- stage 1: L residual GRU layers ----------------------------------------
    for l in range(L):                                  # L is small & static
        # weights / biases read once per layer, before the time loop
        w_ih = w_ih_ref[l]                              # (Hp, 3Hp)
        w_hh = w_hh_ref[l]                              # (Hp, 3Hp)
        b_gx = b_gx_ref[l]                              # (1, 3Hp)
        b_hn = jnp.broadcast_to(b_hn_ref[l], (B, Hp))   # hoisted out of the t loop

        # input-side gates for ALL timesteps at once: (TB, Hp) @ (Hp, 3Hp), kept 2D
        gx_all = (jnp.dot(stream_ref[...], w_ih, preferred_element_type=jnp.float32)
                  + b_gx)                               # (TB, 3Hp)

        h = h0_ref[l]                                   # (B, Hp)

        # Only the recurrent h @ W_hh stays in the sequential time loop.
        # TODO(synk): weight-stationary MXU (matmul_push_rhs once, acc_lhs/pop per step).
        for t in range(T):
            row = t * B                                 # static under Python unroll
            gx = gx_all[row:row + B, :]                 # static 2D row slice, no reshape
            gh = jnp.dot(h, w_hh, preferred_element_type=jnp.float32)   # (B, 3Hp)
            # gate slices are all 128-lane aligned (Hp multiple of 128)
            rz = jax.nn.sigmoid(gx[:, :2 * Hp] + gh[:, :2 * Hp])
            r = rz[:, :Hp]
            z = rz[:, Hp:]
            n = jnp.tanh(gx[:, 2 * Hp:] + r * (gh[:, 2 * Hp:] + b_hn))
            h = (1.0 - z) * n + z * h
            # residual: accumulate rnn_out directly into the resident stream rows
            stream_ref[row:row + B, :] = stream_ref[row:row + B, :] + h

        # final hidden of this layer (aliased buffer; index l never re-read afterwards)
        hN_ref[l] = h

    # --- stage 2: final linear + leaky + lane-dense output projection ----------
    z2 = leaky(
        jnp.dot(stream_ref[...], w_lin2_ref[...], preferred_element_type=jnp.float32)
        + b_lin2_ref[...])                                              # (TB, Hp)
    out_ref[...] = (jnp.dot(z2, w_out_ref[...], preferred_element_type=jnp.float32)
                    + b_out_ref[...])                                   # (TB, Vpad)


# ----------------------------------------------------------------------------- wrapper
def leaky_residual_forward(params, src, prev_out, rnn_states):
    """src, prev_out: (B, T) int32; rnn_states: (L, B, H) f32 (PyTorch layout)."""
    # glue: embedding gathers + concat (dim=2) + time-major 2D flatten (fuses in XLA)
    src_e = jnp.take(params['src_emb'], src, axis=0)       # (B, T, src_embed)
    trg_e = jnp.take(params['trg_emb'], prev_out, axis=0)  # (B, T, trg_embed)
    x = jnp.concatenate([src_e, trg_e], axis=-1).astype(jnp.float32)    # (B, T, E)
    B, T, E = x.shape
    x_tm = jnp.transpose(x, (1, 0, 2)).reshape(T * B, E)   # (TB, E) time-major rows

    H = params['w_lin'].shape[1]
    L = params['w_ih'].shape[0]
    Vout = params['w_out'].shape[1]                        # trg_vocab + 2
    Hp = _round_up(H, 128)                                 # 128-lane gate / hidden stride
    Vpad = _round_up(Vout, 128)                            # lane-dense output slab

    f32 = jnp.float32

    # ---- pad hidden dim + gate chunks to Hp-lane strides (all padding is zero) ----
    w_lin_p = jnp.zeros((E, Hp), f32).at[:, :H].set(params['w_lin'])
    b_lin_p = jnp.zeros((1, Hp), f32).at[:, :H].set(params['b_lin'])

    def pad_gate_w(w):                                     # (L, H, 3H) -> (L, Hp, 3Hp)
        out = jnp.zeros((L, Hp, 3 * Hp), f32)
        for g in range(3):                                 # gate order [r, z, n]
            out = out.at[:, :H, g * Hp:g * Hp + H].set(w[:, :, g * H:(g + 1) * H])
        return out

    def pad_gate_b(b):                                     # (L, 1, 3H) -> (L, 1, 3Hp)
        out = jnp.zeros((L, 1, 3 * Hp), f32)
        for g in range(3):
            out = out.at[:, :, g * Hp:g * Hp + H].set(b[:, :, g * H:(g + 1) * H])
        return out

    w_ih_p = pad_gate_w(params['w_ih'])
    w_hh_p = pad_gate_w(params['w_hh'])
    b_ih_p = pad_gate_b(params['b_ih'])
    b_hh_p = pad_gate_b(params['b_hh'])
    # fold b_ih + (r,z chunks of b_hh) into one batched input-side bias; keep b_hh[n] apart
    b_gx_p = b_ih_p.at[:, :, :2 * Hp].add(b_hh_p[:, :, :2 * Hp])        # (L, 1, 3Hp)
    b_hn_p = b_hh_p[:, :, 2 * Hp:]                                      # (L, 1, Hp)

    h0_p = jnp.zeros((L, B, Hp), f32).at[:, :, :H].set(rnn_states)

    w_lin2_p = jnp.zeros((Hp, Hp), f32).at[:H, :H].set(params['w_lin2'])
    b_lin2_p = jnp.zeros((1, Hp), f32).at[:, :H].set(params['b_lin2'])
    w_out_p = jnp.zeros((Hp, Vpad), f32).at[:H, :Vout].set(params['w_out'])
    b_out_p = jnp.zeros((1, Vpad), f32).at[:, :Vout].set(params['b_out'])

    args = (
        x_tm,
        w_lin_p, b_lin_p,
        w_ih_p, w_hh_p, b_gx_p, b_hn_p,
        h0_p,                                              # index 7 (aliased to output 1)
        w_lin2_p, b_lin2_p, w_out_p, b_out_p,
    )

    out_shapes = (
        jax.ShapeDtypeStruct((T * B, Vpad), f32),          # lane/sublane-dense padded logits
        jax.ShapeDtypeStruct((L, B, Hp), f32),             # new GRU states (padded)
    )

    vmem = pl.BlockSpec(memory_space=pltpu.MemorySpace.VMEM)
    out_2d, h_new_p = pl.pallas_call(
        leaky_residual_kernel,
        out_shape=out_shapes,
        in_specs=[vmem] * len(args),
        out_specs=(vmem, vmem),
        scratch_shapes=[pltpu.VMEM((T * B, Hp), jnp.float32)],   # resident residual stream
        input_output_aliases={7: 1},                             # h0_p -> new states
    )(*args)

    # wrapper-side plumbing back to (B, T, Vout) / (L, B, H); padded lanes are exact zeros
    # NOTE: consumers must use the sliced logits, never the padded [Vout:Vpad] columns.
    outputs = jnp.transpose(out_2d.reshape(T, B, Vpad)[:, :, :Vout], (1, 0, 2))
    new_states = h_new_p[:, :, :H]
    return outputs, new_states


# ----------------------------------------------------------------------------- pure-JAX reference
def reference_forward(params, src, prev_out, rnn_states):
    hp = jax.lax.Precision.HIGHEST

    def leaky(v):
        return jnp.where(v > 0, v, 0.01 * v)

    src_e = jnp.take(params['src_emb'], src, axis=0)
    trg_e = jnp.take(params['trg_emb'], prev_out, axis=0)
    x = jnp.concatenate([src_e, trg_e], axis=-1)
    stream = leaky(jnp.dot(x, params['w_lin'], precision=hp) + params['b_lin'])  # (B,T,H)

    B, T, H = stream.shape
    L = params['w_ih'].shape[0]
    new_states = []
    for l in range(L):
        w_ih, w_hh = params['w_ih'][l], params['w_hh'][l]
        b_ih, b_hh = params['b_ih'][l], params['b_hh'][l]
        h = rnn_states[l]
        ys = []
        for t in range(T):
            gx = jnp.dot(stream[:, t], w_ih, precision=hp) + b_ih
            gh = jnp.dot(h, w_hh, precision=hp) + b_hh
            r = jax.nn.sigmoid(gx[:, :H] + gh[:, :H])
            z = jax.nn.sigmoid(gx[:, H:2 * H] + gh[:, H:2 * H])
            n = jnp.tanh(gx[:, 2 * H:] + r * gh[:, 2 * H:])
            h = (1.0 - z) * n + z * h
            ys.append(h)
        new_states.append(h)
        stream = jnp.stack(ys, axis=1) + stream                 # residual

    z2 = leaky(jnp.dot(stream, params['w_lin2'], precision=hp) + params['b_lin2'])
    out = jnp.dot(z2, params['w_out'], precision=hp) + params['b_out']
    return out, jnp.stack(new_states, axis=0)


# ----------------------------------------------------------------------------- params
def init_params(key, src_vocab, trg_vocab, H, src_embed=32, trg_embed=32, num_layers=2):
    E = src_embed + trg_embed
    keys = iter(jax.random.split(key, 16))

    def w(shape, scale=0.1):
        return (scale * jax.random.normal(next(keys), shape)).astype(jnp.float32)

    return {
        'src_emb': w((src_vocab, src_embed)),
        'trg_emb': w((trg_vocab, trg_embed)),
        'w_lin': w((E, H)), 'b_lin': w((1, H)),
        # GRU weights, gate packing [r, z, n] along the 3H axis (PyTorch order)
        'w_ih': w((num_layers, H, 3 * H)), 'w_hh': w((num_layers, H, 3 * H)),
        'b_ih': w((num_layers, 1, 3 * H)), 'b_hh': w((num_layers, 1, 3 * H)),
        'w_lin2': w((H, H)), 'b_lin2': w((1, H)),
        'w_out': w((H, trg_vocab + 2)), 'b_out': w((1, trg_vocab + 2)),
    }


# ----------------------------------------------------------------------------- main
if __name__ == "__main__":
    SRC_VOCAB, TRG_VOCAB, H = 20, 16, 32
    B, T, L = 2, 8, 2

    key = jax.random.PRNGKey(0)
    kp, ks, kt, kh = jax.random.split(key, 4)
    params = init_params(kp, SRC_VOCAB, TRG_VOCAB, H, num_layers=L)

    src = jax.random.randint(ks, (B, T), 0, SRC_VOCAB, dtype=jnp.int32)
    prev = jax.random.randint(kt, (B, T), 0, TRG_VOCAB, dtype=jnp.int32)
    # PyTorch init_state is zeros; use a small random state to exercise the state path.
    rnn_states = (0.1 * jax.random.normal(kh, (L, B, H))).astype(jnp.float32)

    out, new_state = leaky_residual_forward(params, src, prev, rnn_states)
    out = jax.block_until_ready(out)

    assert out.shape == (B, T, TRG_VOCAB + 2)
    assert new_state.shape == (L, B, H)

    ref_out, ref_state = reference_forward(params, src, prev, rnn_states)
    np.testing.assert_allclose(np.asarray(out), np.asarray(ref_out),
                               rtol=2e-3, atol=2e-3)
    np.testing.assert_allclose(np.asarray(new_state), np.asarray(ref_state),
                               rtol=2e-3, atol=2e-3)

    print("KERNEL_OK")
</pallas_src>

<mosaic_0001>
module attributes {stable_mosaic.version = 11 : i64} {
  func.func @leaky_residual_kernel(%arg0: memref<16x64xf32, #tpu.memory_space<vmem>>, %arg1: memref<64x128xf32, #tpu.memory_space<vmem>>, %arg2: memref<1x128xf32, #tpu.memory_space<vmem>>, %arg3: memref<2x128x384xf32, #tpu.memory_space<vmem>>, %arg4: memref<2x128x384xf32, #tpu.memory_space<vmem>>, %arg5: memref<2x1x384xf32, #tpu.memory_space<vmem>>, %arg6: memref<2x1x128xf32, #tpu.memory_space<vmem>>, %arg7: memref<2x2x128xf32, #tpu.memory_space<vmem>>, %arg8: memref<128x128xf32, #tpu.memory_space<vmem>>, %arg9: memref<1x128xf32, #tpu.memory_space<vmem>>, %arg10: memref<128x128xf32, #tpu.memory_space<vmem>>, %arg11: memref<1x128xf32, #tpu.memory_space<vmem>>, %arg12: memref<16x128xf32, #tpu.memory_space<vmem>>, %arg13: memref<2x2x128xf32, #tpu.memory_space<vmem>>, %arg14: memref<16x128xf32, #tpu.memory_space<vmem>>) attributes {dimension_semantics = [], scalar_prefetch = 0 : i64, scratch_operands = 1 : i64, tpu.core_type = #tpu.core_type<tc>} {
    %c0 = arith.constant 0 : index
    %c0_0 = arith.constant 0 : index
    %0 = vector.load %arg0[%c0, %c0_0] : memref<16x64xf32, #tpu.memory_space<vmem>>, vector<16x64xf32>
    %c0_1 = arith.constant 0 : index
    %c0_2 = arith.constant 0 : index
    %1 = vector.load %arg1[%c0_1, %c0_2] : memref<64x128xf32, #tpu.memory_space<vmem>>, vector<64x128xf32>
    %cst = arith.constant dense<0.000000e+00> : vector<16x128xf32>
    %2 = tpu.matmul %0, %1, %cst {dimension_numbers = #tpu.dot_dimension_numbers<[1], [0], [0], [1], [0, 0, 1, 1], [], []>} : vector<16x64xf32>, vector<64x128xf32>, vector<16x128xf32> -> vector<16x128xf32>
    %c0_3 = arith.constant 0 : index
    %c0_4 = arith.constant 0 : index
    %3 = vector.load %arg2[%c0_3, %c0_4] : memref<1x128xf32, #tpu.memory_space<vmem>>, vector<1x128xf32>
    %4 = vector.broadcast %3 : vector<1x128xf32> to vector<16x128xf32>
    %5 = arith.addf %2, %4 : vector<16x128xf32>
    %cst_5 = arith.constant 0.000000e+00 : f32
    %6 = vector.broadcast %cst_5 : f32 to vector<16x128xf32>
    %7 = arith.cmpf ogt, %5, %6 : vector<16x128xf32>
    %cst_6 = arith.constant 0.00999999977 : f32
    %8 = vector.broadcast %cst_6 : f32 to vector<16x128xf32>
    %9 = arith.mulf %8, %5 : vector<16x128xf32>
    %10 = arith.select %7, %5, %9 : vector<16x128xi1>, vector<16x128xf32>
    %c0_7 = arith.constant 0 : index
    %c0_8 = arith.constant 0 : index
    %11 = vector.load %arg14[%c0_7, %c0_8] : memref<16x128xf32, #tpu.memory_space<vmem>>, vector<16x128xf32>
    tpu.vector_store %arg14[%c0_7, %c0_8], %10 {strides = array<i32>} : memref<16x128xf32, #tpu.memory_space<vmem>>, vector<16x128xf32>,
    %c0_9 = arith.constant 0 : index
    %c0_10 = arith.constant 0 : index
    %c0_11 = arith.constant 0 : index
    %12 = vector.load %arg3[%c0_9, %c0_10, %c0_11] : memref<2x128x384xf32, #tpu.memory_space<vmem>>, vector<1x128x384xf32>
    %13 = vector.shape_cast %12 : vector<1x128x384xf32> to vector<128x384xf32>
    %c0_12 = arith.constant 0 : index
    %c0_13 = arith.constant 0 : index
    %c0_14 = arith.constant 0 : index
    %14 = vector.load %arg4[%c0_12, %c0_13, %c0_14] : memref<2x128x384xf32, #tpu.memory_space<vmem>>, vector<1x128x384xf32>
    %15 = vector.shape_cast %14 : vector<1x128x384xf32> to vector<128x384xf32>
    %c0_15 = arith.constant 0 : index
    %c0_16 = arith.constant 0 : index
    %c0_17 = arith.constant 0 : index
    %16 = vector.load %arg5[%c0_15, %c0_16, %c0_17] : memref<2x1x384xf32, #tpu.memory_space<vmem>>, vector<1x1x384xf32>
    %17 = vector.shape_cast %16 : vector<1x1x384xf32> to vector<1x384xf32>
    %c0_18 = arith.constant 0 : index
    %c0_19 = arith.constant 0 : index
    %c0_20 = arith.constant 0 : index
    %18 = vector.load %arg6[%c0_18, %c0_19, %c0_20] : memref<2x1x128xf32, #tpu.memory_space<vmem>>, vector<1x1x128xf32>
    %19 = vector.shape_cast %18 : vector<1x1x128xf32> to vector<1x128xf32>
    %20 = vector.shape_cast %19 : vector<1x128xf32> to vector<1x128xf32>
    %21 = vector.broadcast %20 : vector<1x128xf32> to vector<2x128xf32>
    %c0_21 = arith.constant 0 : index
    %c0_22 = arith.constant 0 : index
    %22 = vector.load %arg14[%c0_21, %c0_22] : memref<16x128xf32, #tpu.memory_space<vmem>>, vector<16x128xf32>
    %cst_23 = arith.constant dense<0.000000e+00> : vector<16x384xf32>
    %23 = tpu.matmul %22, %13, %cst_23 {dimension_numbers = #tpu.dot_dimension_numbers<[1], [0], [0], [1], [0, 0, 1, 1], [], []>} : vector<16x128xf32>, vector<128x384xf32>, vector<16x384xf32> -> vector<16x384xf32>
    %24 = vector.broadcast %17 : vector<1x384xf32> to vector<16x384xf32>
    %25 = arith.addf %23, %24 : vector<16x384xf32>
    %c0_24 = arith.constant 0 : index
    %c0_25 = arith.constant 0 : index
    %c0_26 = arith.constant 0 : index
    %26 = vector.load %arg7[%c0_24, %c0_25, %c0_26] : memref<2x2x128xf32, #tpu.memory_space<vmem>>, vector<1x2x128xf32>
    %27 = vector.shape_cast %26 : vector<1x2x128xf32> to vector<2x128xf32>
    %28 = vector.extract_strided_slice %25 {offsets = [0, 0], sizes = [2, 384], strides = [1, 1]} : vector<16x384xf32> to vector<2x384xf32>
    %cst_27 = arith.constant dense<0.000000e+00> : vector<2x384xf32>
    %29 = tpu.matmul %27, %15, %cst_27 {dimension_numbers = #tpu.dot_dimension_numbers<[1], [0], [0], [1], [0, 0, 1, 1], [], []>} : vector<2x128xf32>, vector<128x384xf32>, vector<2x384xf32> -> vector<2x384xf32>
    %30 = vector.extract_strided_slice %28 {offsets = [0, 0], sizes = [2, 256], strides = [1, 1]} : vector<2x384xf32> to vector<2x256xf32>
    %31 = vector.extract_strided_slice %29 {offsets = [0, 0], sizes = [2, 256], strides = [1, 1]} : vector<2x384xf32> to vector<2x256xf32>
    %32 = arith.addf %30, %31 : vector<2x256xf32>
    %33 = arith.negf %32 : vector<2x256xf32>
    %34 = math.exp %33 : vector<2x256xf32>
    %cst_28 = arith.constant 1.000000e+00 : f32
    %35 = vector.broadcast %cst_28 : f32 to vector<2x256xf32>
    %36 = arith.addf %35, %34 : vector<2x256xf32>
    %37 = arith.divf %35, %36 : vector<2x256xf32>
    %38 = vector.extract_strided_slice %37 {offsets = [0, 0], sizes = [2, 128], strides = [1, 1]} : vector<2x256xf32> to vector<2x128xf32>
    %39 = vector.extract_strided_slice %37 {offsets = [0, 128], sizes = [2, 128], strides = [1, 1]} : vector<2x256xf32> to vector<2x128xf32>
    %40 = vector.extract_strided_slice %28 {offsets = [0, 256], sizes = [2, 128], strides = [1, 1]} : vector<2x384xf32> to vector<2x128xf32>
    %41 = vector.extract_strided_slice %29 {offsets = [0, 256], sizes = [2, 128], strides = [1, 1]} : vector<2x384xf32> to vector<2x128xf32>
    %42 = arith.addf %41, %21 : vector<2x128xf32>
    %43 = arith.mulf %38, %42 : vector<2x128xf32>
    %44 = arith.addf %40, %43 : vector<2x128xf32>
    %45 = math.tanh %44 : vector<2x128xf32>
    %cst_29 = arith.constant 1.000000e+00 : f32
    %46 = vector.broadcast %cst_29 : f32 to vector<2x128xf32>
    %47 = arith.subf %46, %39 : vector<2x128xf32>
    %48 = arith.mulf %47, %45 : vector<2x128xf32>
    %49 = arith.mulf %39, %27 : vector<2x128xf32>
    %50 = arith.addf %48, %49 : vector<2x128xf32>
    %c0_30 = arith.constant 0 : index
    %c0_31 = arith.constant 0 : index
    %51 = vector.load %arg14[%c0_30, %c0_31] : memref<16x128xf32, #tpu.memory_space<vmem>>, vector<2x128xf32>
    %52 = arith.addf %51, %50 : vector<2x128xf32>
    %c0_32 = arith.constant 0 : index
    %c0_33 = arith.constant 0 : index
    %53 = vector.load %arg14[%c0_32, %c0_33] : memref<16x128xf32, #tpu.memory_space<vmem>>, vector<2x128xf32>
    tpu.vector_store %arg14[%c0_32, %c0_33], %52 {strides = array<i32>} : memref<16x128xf32, #tpu.memory_space<vmem>>, vector<2x128xf32>,
    %54 = vector.extract_strided_slice %25 {offsets = [2, 0], sizes = [2, 384], strides = [1, 1]} : vector<16x384xf32> to vector<2x384xf32>
    %cst_34 = arith.constant dense<0.000000e+00> : vector<2x384xf32>
    %55 = tpu.matmul %50, %15, %cst_34 {dimension_numbers = #tpu.dot_dimension_numbers<[1], [0], [0], [1], [0, 0, 1, 1], [], []>} : vector<2x128xf32>, vector<128x384xf32>, vector<2x384xf32> -> vector<2x384xf32>
    %56 = vector.extract_strided_slice %54 {offsets = [0, 0], sizes = [2, 256], strides = [1, 1]} : vector<2x384xf32> to vector<2x256xf32>
    %57 = vector.extract_strided_slice %55 {offsets = [0, 0], sizes = [2, 256], strides = [1, 1]} : vector<2x384xf32> to vector<2x256xf32>
    %58 = arith.addf %56, %57 : vector<2x256xf32>
    %59 = arith.negf %58 : vector<2x256xf32>
    %60 = math.exp %59 : vector<2x256xf32>
    %cst_35 = arith.constant 1.000000e+00 : f32
    %61 = vector.broadcast %cst_35 : f32 to vector<2x256xf32>
    %62 = arith.addf %61, %60 : vector<2x256xf32>
    %63 = arith.divf %61, %62 : vector<2x256xf32>
    %64 = vector.extract_strided_slice %63 {offsets = [0, 0], sizes = [2, 128], strides = [1, 1]} : vector<2x256xf32> to vector<2x128xf32>
    %65 = vector.extract_strided_slice %63 {offsets = [0, 128], sizes = [2, 128], strides = [1, 1]} : vector<2x256xf32> to vector<2x128xf32>
    %66 = vector.extract_strided_slice %54 {offsets = [0, 256], sizes = [2, 128], strides = [1, 1]} : vector<2x384xf32> to vector<2x128xf32>
    %67 = vector.extract_strided_slice %55 {offsets = [0, 256], sizes = [2, 128], strides = [1, 1]} : vector<2x384xf32> to vector<2x128xf32>
    %68 = arith.addf %67, %21 : vector<2x128xf32>
    %69 = arith.mulf %64, %68 : vector<2x128xf32>
    %70 = arith.addf %66, %69 : vector<2x128xf32>
    %71 = math.tanh %70 : vector<2x128xf32>
    %cst_36 = arith.constant 1.000000e+00 : f32
    %72 = vector.broadcast %cst_36 : f32 to vector<2x128xf32>
    %73 = arith.subf %72, %65 : vector<2x128xf32>
    %74 = arith.mulf %73, %71 : vector<2x128xf32>
    %75 = arith.mulf %65, %50 : vector<2x128xf32>
    %76 = arith.addf %74, %75 : vector<2x128xf32>
    %c2 = arith.constant 2 : index
    %c0_37 = arith.constant 0 : index
    %77 = vector.load %arg14[%c2, %c0_37] : memref<16x128xf32, #tpu.memory_space<vmem>>, vector<2x128xf32>
    %78 = arith.addf %77, %76 : vector<2x128xf32>
    %c2_38 = arith.constant 2 : index
    %c0_39 = arith.constant 0 : index
    %79 = vector.load %arg14[%c2_38, %c0_39] : memref<16x128xf32, #tpu.memory_space<vmem>>, vector<2x128xf32>
    tpu.vector_store %arg14[%c2_38, %c0_39], %78 {strides = array<i32>} : memref<16x128xf32, #tpu.memory_space<vmem>>, vector<2x128xf32>,
    %80 = vector.extract_strided_slice %25 {offsets = [4, 0], sizes = [2, 384], strides = [1, 1]} : vector<16x384xf32> to vector<2x384xf32>
    %cst_40 = arith.constant dense<0.000000e+00> : vector<2x384xf32>
    %81 = tpu.matmul %76, %15, %cst_40 {dimension_numbers = #tpu.dot_dimension_numbers<[1], [0], [0], [1], [0, 0, 1, 1], [], []>} : vector<2x128xf32>, vector<128x384xf32>, vector<2x384xf32> -> vector<2x384xf32>
    %82 = vector.extract_strided_slice %80 {offsets = [0, 0], sizes = [2, 256], strides = [1, 1]} : vector<2x384xf32> to vector<2x256xf32>
    %83 = vector.extract_strided_slice %81 {offsets = [0, 0], sizes = [2, 256], strides = [1, 1]} : vector<2x384xf32> to vector<2x256xf32>
    %84 = arith.addf %82, %83 : vector<2x256xf32>
    %85 = arith.negf %84 : vector<2x256xf32>
    %86 = math.exp %85 : vector<2x256xf32>
    %cst_41 = arith.constant 1.000000e+00 : f32
    %87 = vector.broadcast %cst_41 : f32 to vector<2x256xf32>
    %88 = arith.addf %87, %86 : vector<2x256xf32>
    %89 = arith.divf %87, %88 : vector<2x256xf32>
    %90 = vector.extract_strided_slice %89 {offsets = [0, 0], sizes = [2, 128], strides = [1, 1]} : vector<2x256xf32> to vector<2x128xf32>
    %91 = vector.extract_strided_slice %89 {offsets = [0, 128], sizes = [2, 128], strides = [1, 1]} : vector<2x256xf32> to vector<2x128xf32>
    %92 = vector.extract_strided_slice %80 {offsets = [0, 256], sizes = [2, 128], strides = [1, 1]} : vector<2x384xf32> to vector<2x128xf32>
    %93 = vector.extract_strided_slice %81 {offsets = [0, 256], sizes = [2, 128], strides = [1, 1]} : vector<2x384xf32> to vector<2x128xf32>
    %94 = arith.addf %93, %21 : vector<2x128xf32>
    %95 = arith.mulf %90, %94 : vector<2x128xf32>
    %96 = arith.addf %92, %95 : vector<2x128xf32>
    %97 = math.tanh %96 : vector<2x128xf32>
    %cst_42 = arith.constant 1.000000e+00 : f32
    %98 = vector.broadcast %cst_42 : f32 to vector<2x128xf32>
    %99 = arith.subf %98, %91 : vector<2x128xf32>
    %100 = arith.mulf %99, %97 : vector<2x128xf32>
    %101 = arith.mulf %91, %76 : vector<2x128xf32>
    %102 = arith.addf %100, %101 : vector<2x128xf32>
    %c4 = arith.constant 4 : index
    %c0_43 = arith.constant 0 : index
    %103 = vector.load %arg14[%c4, %c0_43] : memref<16x128xf32, #tpu.memory_space<vmem>>, vector<2x128xf32>
    %104 = arith.addf %103, %102 : vector<2x128xf32>
    %c4_44 = arith.constant 4 : index
    %c0_45 = arith.constant 0 : index
    %105 = vector.load %arg14[%c4_44, %c0_45] : memref<16x128xf32, #tpu.memory_space<vmem>>, vector<2x128xf32>
    tpu.vector_store %arg14[%c4_44, %c0_45], %104 {strides = array<i32>} : memref<16x128xf32, #tpu.memory_space<vmem>>, vector<2x128xf32>,
    %106 = vector.extract_strided_slice %25 {offsets = [6, 0], sizes = [2, 384], strides = [1, 1]} : vector<16x384xf32> to vector<2x384xf32>
    %cst_46 = arith.constant dense<0.000000e+00> : vector<2x384xf32>
    %107 = tpu.matmul %102, %15, %cst_46 {dimension_numbers = #tpu.dot_dimension_numbers<[1], [0], [0], [1], [0, 0, 1, 1], [], []>} : vector<2x128xf32>, vector<128x384xf32>, vector<2x384xf32> -> vector<2x384xf32>
    %108 = vector.extract_strided_slice %106 {offsets = [0, 0], sizes = [2, 256], strides = [1, 1]} : vector<2x384xf32> to vector<2x256xf32>
    %109 = vector.extract_strided_slice %107 {offsets = [0, 0], sizes = [2, 256], strides = [1, 1]} : vector<2x384xf32> to vector<2x256xf32>
    %110 = arith.addf %108, %109 : vector<2x256xf32>
    %111 = arith.negf %110 : vector<2x256xf32>
    %112 = math.exp %111 : vector<2x256xf32>
    %cst_47 = arith.constant 1.000000e+00 : f32
    %113 = vector.broadcast %cst_47 : f32 to vector<2x256xf32>
    %114 = arith.addf %113, %112 : vector<2x256xf32>
    %115 = arith.divf %113, %114 : vector<2x256xf32>
    %116 = vector.extract_strided_slice %115 {offsets = [0, 0], sizes = [2, 128], strides = [1, 1]} : vector<2x256xf32> to vector<2x128xf32>
    %117 = vector.extract_strided_slice %115 {offsets = [0, 128], sizes = [2, 128], strides = [1, 1]} : vector<2x256xf32> to vector<2x128xf32>
    %118 = vector.extract_strided_slice %106 {offsets = [0, 256], sizes = [2, 128], strides = [1, 1]} : vector<2x384xf32> to vector<2x128xf32>
    %119 = vector.extract_strided_slice %107 {offsets = [0, 256], sizes = [2, 128], strides = [1, 1]} : vector<2x384xf32> to vector<2x128xf32>
    %120 = arith.addf %119, %21 : vector<2x128xf32>
    %121 = arith.mulf %116, %120 : vector<2x128xf32>
    %122 = arith.addf %118, %121 : vector<2x128xf32>
    %123 = math.tanh %122 : vector<2x128xf32>
    %cst_48 = arith.constant 1.000000e+00 : f32
    %124 = vector.broadcast %cst_48 : f32 to vector<2x128xf32>
    %125 = arith.subf %124, %117 : vector<2x128xf32>
    %126 = arith.mulf %125, %123 : vector<2x128xf32>
    %127 = arith.mulf %117, %102 : vector<2x128xf32>
    %128 = arith.addf %126, %127 : vector<2x128xf32>
    %c6 = arith.constant 6 : index
    %c0_49 = arith.constant 0 : index
    %129 = vector.load %arg14[%c6, %c0_49] : memref<16x128xf32, #tpu.memory_space<vmem>>, vector<2x128xf32>
    %130 = arith.addf %129, %128 : vector<2x128xf32>
    %c6_50 = arith.constant 6 : index
    %c0_51 = arith.constant 0 : index
    %131 = vector.load %arg14[%c6_50, %c0_51] : memref<16x128xf32, #tpu.memory_space<vmem>>, vector<2x128xf32>
    tpu.vector_store %arg14[%c6_50, %c0_51], %130 {strides = array<i32>} : memref<16x128xf32, #tpu.memory_space<vmem>>, vector<2x128xf32>,
    %132 = vector.extract_strided_slice %25 {offsets = [8, 0], sizes = [2, 384], strides = [1, 1]} : vector<16x384xf32> to vector<2x384xf32>
    %cst_52 = arith.constant dense<0.000000e+00> : vector<2x384xf32>
    %133 = tpu.matmul %128, %15, %cst_52 {dimension_numbers = #tpu.dot_dimension_numbers<[1], [0], [0], [1], [0, 0, 1, 1], [], []>} : vector<2x128xf32>, vector<128x384xf32>, vector<2x384xf32> -> vector<2x384xf32>
    %134 = vector.extract_strided_slice %132 {offsets = [0, 0], sizes = [2, 256], strides = [1, 1]} : vector<2x384xf32> to vector<2x256xf32>
    %135 = vector.extract_strided_slice %133 {offsets = [0, 0], sizes = [2, 256], strides = [1, 1]} : vector<2x384xf32> to vector<2x256xf32>
    %136 = arith.addf %134, %135 : vector<2x256xf32>
    %137 = arith.negf %136 : vector<2x256xf32>
    %138 = math.exp %137 : vector<2x256xf32>
    %cst_53 = arith.constant 1.000000e+00 : f32
    %139 = vector.broadcast %cst_53 : f32 to vector<2x256xf32>
    %140 = arith.addf %139, %138 : vector<2x256xf32>
    %141 = arith.divf %139, %140 : vector<2x256xf32>
    %142 = vector.extract_strided_slice %141 {offsets = [0, 0], sizes = [2, 128], strides = [1, 1]} : vector<2x256xf32> to vector<2x128xf32>
    %143 = vector.extract_strided_slice %141 {offsets = [0, 128], sizes = [2, 128], strides = [1, 1]} : vector<2x256xf32> to vector<2x128xf32>
    %144 = vector.extract_strided_slice %132 {offsets = [0, 256], sizes = [2, 128], strides = [1, 1]} : vector<2x384xf32> to vector<2x128xf32>
    %145 = vector.extract_strided_slice %133 {offsets = [0, 256], sizes = [2, 128], strides = [1, 1]} : vector<2x384xf32> to vector<2x128xf32>
    %146 = arith.addf %145, %21 : vector<2x128xf32>
    %147 = arith.mulf %142, %146 : vector<2x128xf32>
    %148 = arith.addf %144, %147 : vector<2x128xf32>
    %149 = math.tanh %148 : vector<2x128xf32>
    %cst_54 = arith.constant 1.000000e+00 : f32
    %150 = vector.broadcast %cst_54 : f32 to vector<2x128xf32>
    %151 = arith.subf %150, %143 : vector<2x128xf32>
    %152 = arith.mulf %151, %149 : vector<2x128xf32>
    %153 = arith.mulf %143, %128 : vector<2x128xf32>
    %154 = arith.addf %152, %153 : vector<2x128xf32>
    %c8 = arith.constant 8 : index
    %c0_55 = arith.constant 0 : index
    %155 = vector.load %arg14[%c8, %c0_55] : memref<16x128xf32, #tpu.memory_space<vmem>>, vector<2x128xf32>
    %156 = arith.addf %155, %154 : vector<2x128xf32>
    %c8_56 = arith.constant 8 : index
    %c0_57 = arith.constant 0 : index
    %157 = vector.load %arg14[%c8_56, %c0_57] : memref<16x128xf32, #tpu.memory_space<vmem>>, vector<2x128xf32>
    tpu.vector_store %arg14[%c8_56, %c0_57], %156 {strides = array<i32>} : memref<16x128xf32, #tpu.memory_space<vmem>>, vector<2x128xf32>,
    %158 = vector.extract_strided_slice %25 {offsets = [10, 0], sizes = [2, 384], strides = [1, 1]} : vector<16x384xf32> to vector<2x384xf32>
    %cst_58 = arith.constant dense<0.000000e+00> : vector<2x384xf32>
    %159 = tpu.matmul %154, %15, %cst_58 {dimension_numbers = #tpu.dot_dimension_numbers<[1], [0], [0], [1], [0, 0, 1, 1], [], []>} : vector<2x128xf32>, vector<128x384xf32>, vector<2x384xf32> -> vector<2x384xf32>
    %160 = vector.extract_strided_slice %158 {offsets = [0, 0], sizes = [2, 256], strides = [1, 1]} : vector<2x384xf32> to vector<2x256xf32>
    %161 = vector.extract_strided_slice %159 {offsets = [0, 0], sizes = [2, 256], strides = [1, 1]} : vector<2x384xf32> to vector<2x256xf32>
    %162 = arith.addf %160, %161 : vector<2x256xf32>
    %163 = arith.negf %162 : vector<2x256xf32>
    %164 = math.exp %163 : vector<2x256xf32>
    %cst_59 = arith.constant 1.000000e+00 : f32
    %165 = vector.broadcast %cst_59 : f32 to vector<2x256xf32>
    %166 = arith.addf %165, %164 : vector<2x256xf32>
    %167 = arith.divf %165, %166 : vector<2x256xf32>
    %168 = vector.extract_strided_slice %167 {offsets = [0, 0], sizes = [2, 128], strides = [1, 1]} : vector<2x256xf32> to vector<2x128xf32>
    %169 = vector.extract_strided_slice %167 {offsets = [0, 128], sizes = [2, 128], strides = [1, 1]} : vector<2x256xf32> to vector<2x128xf32>
    %170 = vector.extract_strided_slice %158 {offsets = [0, 256], sizes = [2, 128], strides = [1, 1]} : vector<2x384xf32> to vector<2x128xf32>
    %171 = vector.extract_strided_slice %159 {offsets = [0, 256], sizes = [2, 128], strides = [1, 1]} : vector<2x384xf32> to vector<2x128xf32>
    %172 = arith.addf %171, %21 : vector<2x128xf32>
    %173 = arith.mulf %168, %172 : vector<2x128xf32>
    %174 = arith.addf %170, %173 : vector<2x128xf32>
    %175 = math.tanh %174 : vector<2x128xf32>
    %cst_60 = arith.constant 1.000000e+00 : f32
    %176 = vector.broadcast %cst_60 : f32 to vector<2x128xf32>
    %177 = arith.subf %176, %169 : vector<2x128xf32>
    %178 = arith.mulf %177, %175 : vector<2x128xf32>
    %179 = arith.mulf %169, %154 : vector<2x128xf32>
    %180 = arith.addf %178, %179 : vector<2x128xf32>
    %c10 = arith.constant 10 : index
    %c0_61 = arith.constant 0 : index
    %181 = vector.load %arg14[%c10, %c0_61] : memref<16x128xf32, #tpu.memory_space<vmem>>, vector<2x128xf32>
    %182 = arith.addf %181, %180 : vector<2x128xf32>
    %c10_62 = arith.constant 10 : index
    %c0_63 = arith.constant 0 : index
    %183 = vector.load %arg14[%c10_62, %c0_63] : memref<16x128xf32, #tpu.memory_space<vmem>>, vector<2x128xf32>
    tpu.vector_store %arg14[%c10_62, %c0_63], %182 {strides = array<i32>} : memref<16x128xf32, #tpu.memory_space<vmem>>, vector<2x128xf32>,
    %184 = vector.extract_strided_slice %25 {offsets = [12, 0], sizes = [2, 384], strides = [1, 1]} : vector<16x384xf32> to vector<2x384xf32>
    %cst_64 = arith.constant dense<0.000000e+00> : vector<2x384xf32>
    %185 = tpu.matmul %180, %15, %cst_64 {dimension_numbers = #tpu.dot_dimension_numbers<[1], [0], [0], [1], [0, 0, 1, 1], [], []>} : vector<2x128xf32>, vector<128x384xf32>, vector<2x384xf32> -> vector<2x384xf32>
    %186 = vector.extract_strided_slice %184 {offsets = [0, 0], sizes = [2, 256], strides = [1, 1]} : vector<2x384xf32> to vector<2x256xf32>
    %187 = vector.extract_strided_slice %185 {offsets = [0, 0], sizes = [2, 256], strides = [1, 1]} : vector<2x384xf32> to vector<2x256xf32>
    %188 = arith.addf %186, %187 : vector<2x256xf32>
    %189 = arith.negf %188 : vector<2x256xf32>
    %190 = math.exp %189 : vector<2x256xf32>
    %cst_65 = arith.constant 1.000000e+00 : f32
    %191 = vector.broadcast %cst_65 : f32 to vector<2x256xf32>
    %192 = arith.addf %191, %190 : vector<2x256xf32>
    %193 = arith.divf %191, %192 : vector<2x256xf32>
    %194 = vector.extract_strided_slice %193 {offsets = [0, 0], sizes = [2, 128], strides = [1, 1]} : vector<2x256xf32> to vector<2x128xf32>
    %195 = vector.extract_strided_slice %193 {offsets = [0, 128], sizes = [2, 128], strides = [1, 1]} : vector<2x256xf32> to vector<2x128xf32>
    %196 = vector.extract_strided_slice %184 {offsets = [0, 256], sizes = [2, 128], strides = [1, 1]} : vector<2x384xf32> to vector<2x128xf32>
    %197 = vector.extract_strided_slice %185 {offsets = [0, 256], sizes = [2, 128], strides = [1, 1]} : vector<2x384xf32> to vector<2x128xf32>
    %198 = arith.addf %197, %21 : vector<2x128xf32>
    %199 = arith.mulf %194, %198 : vector<2x128xf32>
    %200 = arith.addf %196, %199 : vector<2x128xf32>
    %201 = math.tanh %200 : vector<2x128xf32>
    %cst_66 = arith.constant 1.000000e+00 : f32
    %202 = vector.broadcast %cst_66 : f32 to vector<2x128xf32>
    %203 = arith.subf %202, %195 : vector<2x128xf32>
    %204 = arith.mulf %203, %201 : vector<2x128xf32>
    %205 = arith.mulf %195, %180 : vector<2x128xf32>
    %206 = arith.addf %204, %205 : vector<2x128xf32>
    %c12 = arith.constant 12 : index
    %c0_67 = arith.constant 0 : index
    %207 = vector.load %arg14[%c12, %c0_67] : memref<16x128xf32, #tpu.memory_space<vmem>>, vector<2x128xf32>
    %208 = arith.addf %207, %206 : vector<2x128xf32>
    %c12_68 = arith.constant 12 : index
    %c0_69 = arith.constant 0 : index
    %209 = vector.load %arg14[%c12_68, %c0_69] : memref<16x128xf32, #tpu.memory_space<vmem>>, vector<2x128xf32>
    tpu.vector_store %arg14[%c12_68, %c0_69], %208 {strides = array<i32>} : memref<16x128xf32, #tpu.memory_space<vmem>>, vector<2x128xf32>,
    %210 = vector.extract_strided_slice %25 {offsets = [14, 0], sizes = [2, 384], strides = [1, 1]} : vector<16x384xf32> to vector<2x384xf32>
    %cst_70 = arith.constant dense<0.000000e+00> : vector<2x384xf32>
    %211 = tpu.matmul %206, %15, %cst_70 {dimension_numbers = #tpu.dot_dimension_numbers<[1], [0], [0], [1], [0, 0, 1, 1], [], []>} : vector<2x128xf32>, vector<128x384xf32>, vector<2x384xf32> -> vector<2x384xf32>
    %212 = vector.extract_strided_slice %210 {offsets = [0, 0], sizes = [2, 256], strides = [1, 1]} : vector<2x384xf32> to vector<2x256xf32>
    %213 = vector.extract_strided_slice %211 {offsets = [0, 0], sizes = [2, 256], strides = [1, 1]} : vector<2x384xf32> to vector<2x256xf32>
    %214 = arith.addf %212, %213 : vector<2x256xf32>
    %215 = arith.negf %214 : vector<2x256xf32>
    %216 = math.exp %215 : vector<2x256xf32>
    %cst_71 = arith.constant 1.000000e+00 : f32
    %217 = vector.broadcast %cst_71 : f32 to vector<2x256xf32>
    %218 = arith.addf %217, %216 : vector<2x256xf32>
    %219 = arith.divf %217, %218 : vector<2x256xf32>
    %220 = vector.extract_strided_slice %219 {offsets = [0, 0], sizes = [2, 128], strides = [1, 1]} : vector<2x256xf32> to vector<2x128xf32>
    %221 = vector.extract_strided_slice %219 {offsets = [0, 128], sizes = [2, 128], strides = [1, 1]} : vector<2x256xf32> to vector<2x128xf32>
    %222 = vector.extract_strided_slice %210 {offsets = [0, 256], sizes = [2, 128], strides = [1, 1]} : vector<2x384xf32> to vector<2x128xf32>
    %223 = vector.extract_strided_slice %211 {offsets = [0, 256], sizes = [2, 128], strides = [1, 1]} : vector<2x384xf32> to vector<2x128xf32>
    %224 = arith.addf %223, %21 : vector<2x128xf32>
    %225 = arith.mulf %220, %224 : vector<2x128xf32>
    %226 = arith.addf %222, %225 : vector<2x128xf32>
    %227 = math.tanh %226 : vector<2x128xf32>
    %cst_72 = arith.constant 1.000000e+00 : f32
    %228 = vector.broadcast %cst_72 : f32 to vector<2x128xf32>
    %229 = arith.subf %228, %221 : vector<2x128xf32>
    %230 = arith.mulf %229, %227 : vector<2x128xf32>
    %231 = arith.mulf %221, %206 : vector<2x128xf32>
    %232 = arith.addf %230, %231 : vector<2x128xf32>
    %c14 = arith.constant 14 : index
    %c0_73 = arith.constant 0 : index
    %233 = vector.load %arg14[%c14, %c0_73] : memref<16x128xf32, #tpu.memory_space<vmem>>, vector<2x128xf32>
    %234 = arith.addf %233, %232 : vector<2x128xf32>
    %c14_74 = arith.constant 14 : index
    %c0_75 = arith.constant 0 : index
    %235 = vector.load %arg14[%c14_74, %c0_75] : memref<16x128xf32, #tpu.memory_space<vmem>>, vector<2x128xf32>
    tpu.vector_store %arg14[%c14_74, %c0_75], %234 {strides = array<i32>} : memref<16x128xf32, #tpu.memory_space<vmem>>, vector<2x128xf32>,
    %c0_76 = arith.constant 0 : index
    %c0_77 = arith.constant 0 : index
    %c0_78 = arith.constant 0 : index
    %236 = vector.load %arg13[%c0_76, %c0_77, %c0_78] : memref<2x2x128xf32, #tpu.memory_space<vmem>>, vector<1x2x128xf32>
    %237 = vector.shape_cast %236 : vector<1x2x128xf32> to vector<2x128xf32>
    %238 = vector.shape_cast %232 : vector<2x128xf32> to vector<1x2x128xf32>
    tpu.vector_store %arg13[%c0_76, %c0_77, %c0_78], %238 {strides = array<i32>} : memref<2x2x128xf32, #tpu.memory_space<vmem>>, vector<1x2x128xf32>,
    %c1 = arith.constant 1 : index
    %c0_79 = arith.constant 0 : index
    %c0_80 = arith.constant 0 : index
    %239 = vector.load %arg3[%c1, %c0_79, %c0_80] : memref<2x128x384xf32, #tpu.memory_space<vmem>>, vector<1x128x384xf32>
    %240 = vector.shape_cast %239 : vector<1x128x384xf32> to vector<128x384xf32>
    %c1_81 = arith.constant 1 : index
    %c0_82 = arith.constant 0 : index
    %c0_83 = arith.constant 0 : index
    %241 = vector.load %arg4[%c1_81, %c0_82, %c0_83] : memref<2x128x384xf32, #tpu.memory_space<vmem>>, vector<1x128x384xf32>
    %242 = vector.shape_cast %241 : vector<1x128x384xf32> to vector<128x384xf32>
    %c1_84 = arith.constant 1 : index
    %c0_85 = arith.constant 0 : index
    %c0_86 = arith.constant 0 : index
    %243 = vector.load %arg5[%c1_84, %c0_85, %c0_86] : memref<2x1x384xf32, #tpu.memory_space<vmem>>, vector<1x1x384xf32>
    %244 = vector.shape_cast %243 : vector<1x1x384xf32> to vector<1x384xf32>
    %c1_87 = arith.constant 1 : index
    %c0_88 = arith.constant 0 : index
    %c0_89 = arith.constant 0 : index
    %245 = vector.load %arg6[%c1_87, %c0_88, %c0_89] : memref<2x1x128xf32, #tpu.memory_space<vmem>>, vector<1x1x128xf32>
    %246 = vector.shape_cast %245 : vector<1x1x128xf32> to vector<1x128xf32>
    %247 = vector.shape_cast %246 : vector<1x128xf32> to vector<1x128xf32>
    %248 = vector.broadcast %247 : vector<1x128xf32> to vector<2x128xf32>
    %c0_90 = arith.constant 0 : index
    %c0_91 = arith.constant 0 : index
    %249 = vector.load %arg14[%c0_90, %c0_91] : memref<16x128xf32, #tpu.memory_space<vmem>>, vector<16x128xf32>
    %cst_92 = arith.constant dense<0.000000e+00> : vector<16x384xf32>
    %250 = tpu.matmul %249, %240, %cst_92 {dimension_numbers = #tpu.dot_dimension_numbers<[1], [0], [0], [1], [0, 0, 1, 1], [], []>} : vector<16x128xf32>, vector<128x384xf32>, vector<16x384xf32> -> vector<16x384xf32>
    %251 = vector.broadcast %244 : vector<1x384xf32> to vector<16x384xf32>
    %252 = arith.addf %250, %251 : vector<16x384xf32>
    %c1_93 = arith.constant 1 : index
    %c0_94 = arith.constant 0 : index
    %c0_95 = arith.constant 0 : index
    %253 = vector.load %arg7[%c1_93, %c0_94, %c0_95] : memref<2x2x128xf32, #tpu.memory_space<vmem>>, vector<1x2x128xf32>
    %254 = vector.shape_cast %253 : vector<1x2x128xf32> to vector<2x128xf32>
    %255 = vector.extract_strided_slice %252 {offsets = [0, 0], sizes = [2, 384], strides = [1, 1]} : vector<16x384xf32> to vector<2x384xf32>
    %cst_96 = arith.constant dense<0.000000e+00> : vector<2x384xf32>
    %256 = tpu.matmul %254, %242, %cst_96 {dimension_numbers = #tpu.dot_dimension_numbers<[1], [0], [0], [1], [0, 0, 1, 1], [], []>} : vector<2x128xf32>, vector<128x384xf32>, vector<2x384xf32> -> vector<2x384xf32>
    %257 = vector.extract_strided_slice %255 {offsets = [0, 0], sizes = [2, 256], strides = [1, 1]} : vector<2x384xf32> to vector<2x256xf32>
    %258 = vector.extract_strided_slice %256 {offsets = [0, 0], sizes = [2, 256], strides = [1, 1]} : vector<2x384xf32> to vector<2x256xf32>
    %259 = arith.addf %257, %258 : vector<2x256xf32>
    %260 = arith.negf %259 : vector<2x256xf32>
    %261 = math.exp %260 : vector<2x256xf32>
    %cst_97 = arith.constant 1.000000e+00 : f32
    %262 = vector.broadcast %cst_97 : f32 to vector<2x256xf32>
    %263 = arith.addf %262, %261 : vector<2x256xf32>
    %264 = arith.divf %262, %263 : vector<2x256xf32>
    %265 = vector.extract_strided_slice %264 {offsets = [0, 0], sizes = [2, 128], strides = [1, 1]} : vector<2x256xf32> to vector<2x128xf32>
    %266 = vector.extract_strided_slice %264 {offsets = [0, 128], sizes = [2, 128], strides = [1, 1]} : vector<2x256xf32> to vector<2x128xf32>
    %267 = vector.extract_strided_slice %255 {offsets = [0, 256], sizes = [2, 128], strides = [1, 1]} : vector<2x384xf32> to vector<2x128xf32>
    %268 = vector.extract_strided_slice %256 {offsets = [0, 256], sizes = [2, 128], strides = [1, 1]} : vector<2x384xf32> to vector<2x128xf32>
    %269 = arith.addf %268, %248 : vector<2x128xf32>
    %270 = arith.mulf %265, %269 : vector<2x128xf32>
    %271 = arith.addf %267, %270 : vector<2x128xf32>
    %272 = math.tanh %271 : vector<2x128xf32>
    %cst_98 = arith.constant 1.000000e+00 : f32
    %273 = vector.broadcast %cst_98 : f32 to vector<2x128xf32>
    %274 = arith.subf %273, %266 : vector<2x128xf32>
    %275 = arith.mulf %274, %272 : vector<2x128xf32>
    %276 = arith.mulf %266, %254 : vector<2x128xf32>
    %277 = arith.addf %275, %276 : vector<2x128xf32>
    %c0_99 = arith.constant 0 : index
    %c0_100 = arith.constant 0 : index
    %278 = vector.load %arg14[%c0_99, %c0_100] : memref<16x128xf32, #tpu.memory_space<vmem>>, vector<2x128xf32>
    %279 = arith.addf %278, %277 : vector<2x128xf32>
    %c0_101 = arith.constant 0 : index
    %c0_102 = arith.constant 0 : index
    %280 = vector.load %arg14[%c0_101, %c0_102] : memref<16x128xf32, #tpu.memory_space<vmem>>, vector<2x128xf32>
    tpu.vector_store %arg14[%c0_101, %c0_102], %279 {strides = array<i32>} : memref<16x128xf32, #tpu.memory_space<vmem>>, vector<2x128xf32>,
    %281 = vector.extract_strided_slice %252 {offsets = [2, 0], sizes = [2, 384], strides = [1, 1]} : vector<16x384xf32> to vector<2x384xf32>
    %cst_103 = arith.constant dense<0.000000e+00> : vector<2x384xf32>
    %282 = tpu.matmul %277, %242, %cst_103 {dimension_numbers = #tpu.dot_dimension_numbers<[1], [0], [0], [1], [0, 0, 1, 1], [], []>} : vector<2x128xf32>, vector<128x384xf32>, vector<2x384xf32> -> vector<2x384xf32>
    %283 = vector.extract_strided_slice %281 {offsets = [0, 0], sizes = [2, 256], strides = [1, 1]} : vector<2x384xf32> to vector<2x256xf32>
    %284 = vector.extract_strided_slice %282 {offsets = [0, 0], sizes = [2, 256], strides = [1, 1]} : vector<2x384xf32> to vector<2x256xf32>
    %285 = arith.addf %283, %284 : vector<2x256xf32>
    %286 = arith.negf %285 : vector<2x256xf32>
    %287 = math.exp %286 : vector<2x256xf32>
    %cst_104 = arith.constant 1.000000e+00 : f32
    %288 = vector.broadcast %cst_104 : f32 to vector<2x256xf32>
    %289 = arith.addf %288, %287 : vector<2x256xf32>
    %290 = arith.divf %288, %289 : vector<2x256xf32>
    %291 = vector.extract_strided_slice %290 {offsets = [0, 0], sizes = [2, 128], strides = [1, 1]} : vector<2x256xf32> to vector<2x128xf32>
    %292 = vector.extract_strided_slice %290 {offsets = [0, 128], sizes = [2, 128], strides = [1, 1]} : vector<2x256xf32> to vector<2x128xf32>
    %293 = vector.extract_strided_slice %281 {offsets = [0, 256], sizes = [2, 128], strides = [1, 1]} : vector<2x384xf32> to vector<2x128xf32>
    %294 = vector.extract_strided_slice %282 {offsets = [0, 256], sizes = [2, 128], strides = [1, 1]} : vector<2x384xf32> to vector<2x128xf32>
    %295 = arith.addf %294, %248 : vector<2x128xf32>
    %296 = arith.mulf %291, %295 : vector<2x128xf32>
    %297 = arith.addf %293, %296 : vector<2x128xf32>
    %298 = math.tanh %297 : vector<2x128xf32>
    %cst_105 = arith.constant 1.000000e+00 : f32
    %299 = vector.broadcast %cst_105 : f32 to vector<2x128xf32>
    %300 = arith.subf %299, %292 : vector<2x128xf32>
    %301 = arith.mulf %300, %298 : vector<2x128xf32>
    %302 = arith.mulf %292, %277 : vector<2x128xf32>
    %303 = arith.addf %301, %302 : vector<2x128xf32>
    %c2_106 = arith.constant 2 : index
    %c0_107 = arith.constant 0 : index
    %304 = vector.load %arg14[%c2_106, %c0_107] : memref<16x128xf32, #tpu.memory_space<vmem>>, vector<2x128xf32>
    %305 = arith.addf %304, %303 : vector<2x128xf32>
    %c2_108 = arith.constant 2 : index
    %c0_109 = arith.constant 0 : index
    %306 = vector.load %arg14[%c2_108, %c0_109] : memref<16x128xf32, #tpu.memory_space<vmem>>, vector<2x128xf32>
    tpu.vector_store %arg14[%c2_108, %c0_109], %305 {strides = array<i32>} : memref<16x128xf32, #tpu.memory_space<vmem>>, vector<2x128xf32>,
    %307 = vector.extract_strided_slice %252 {offsets = [4, 0], sizes = [2, 384], strides = [1, 1]} : vector<16x384xf32> to vector<2x384xf32>
    %cst_110 = arith.constant dense<0.000000e+00> : vector<2x384xf32>
    %308 = tpu.matmul %303, %242, %cst_110 {dimension_numbers = #tpu.dot_dimension_numbers<[1], [0], [0], [1], [0, 0, 1, 1], [], []>} : vector<2x128xf32>, vector<128x384xf32>, vector<2x384xf32> -> vector<2x384xf32>
    %309 = vector.extract_strided_slice %307 {offsets = [0, 0], sizes = [2, 256], strides = [1, 1]} : vector<2x384xf32> to vector<2x256xf32>
    %310 = vector.extract_strided_slice %308 {offsets = [0, 0], sizes = [2, 256], strides = [1, 1]} : vector<2x384xf32> to vector<2x256xf32>
    %311 = arith.addf %309, %310 : vector<2x256xf32>
    %312 = arith.negf %311 : vector<2x256xf32>
    %313 = math.exp %312 : vector<2x256xf32>
    %cst_111 = arith.constant 1.000000e+00 : f32
    %314 = vector.broadcast %cst_111 : f32 to vector<2x256xf32>
    %315 = arith.addf %314, %313 : vector<2x256xf32>
    %316 = arith.divf %314, %315 : vector<2x256xf32>
    %317 = vector.extract_strided_slice %316 {offsets = [0, 0], sizes = [2, 128], strides = [1, 1]} : vector<2x256xf32> to vector<2x128xf32>
    %318 = vector.extract_strided_slice %316 {offsets = [0, 128], sizes = [2, 128], strides = [1, 1]} : vector<2x256xf32> to vector<2x128xf32>
    %319 = vector.extract_strided_slice %307 {offsets = [0, 256], sizes = [2, 128], strides = [1, 1]} : vector<2x384xf32> to vector<2x128xf32>
    %320 = vector.extract_strided_slice %308 {offsets = [0, 256], sizes = [2, 128], strides = [1, 1]} : vector<2x384xf32> to vector<2x128xf32>
    %321 = arith.addf %320, %248 : vector<2x128xf32>
    %322 = arith.mulf %317, %321 : vector<2x128xf32>
    %323 = arith.addf %319, %322 : vector<2x128xf32>
    %324 = math.tanh %323 : vector<2x128xf32>
    %cst_112 = arith.constant 1.000000e+00 : f32
    %325 = vector.broadcast %cst_112 : f32 to vector<2x128xf32>
    %326 = arith.subf %325, %318 : vector<2x128xf32>
    %327 = arith.mulf %326, %324 : vector<2x128xf32>
    %328 = arith.mulf %318, %303 : vector<2x128xf32>
    %329 = arith.addf %327, %328 : vector<2x128xf32>
    %c4_113 = arith.constant 4 : index
    %c0_114 = arith.constant 0 : index
    %330 = vector.load %arg14[%c4_113, %c0_114] : memref<16x128xf32, #tpu.memory_space<vmem>>, vector<2x128xf32>
    %331 = arith.addf %330, %329 : vector<2x128xf32>
    %c4_115 = arith.constant 4 : index
    %c0_116 = arith.constant 0 : index
    %332 = vector.load %arg14[%c4_115, %c0_116] : memref<16x128xf32, #tpu.memory_space<vmem>>, vector<2x128xf32>
    tpu.vector_store %arg14[%c4_115, %c0_116], %331 {strides = array<i32>} : memref<16x128xf32, #tpu.memory_space<vmem>>, vector<2x128xf32>,
    %333 = vector.extract_strided_slice %252 {offsets = [6, 0], sizes = [2, 384], strides = [1, 1]} : vector<16x384xf32> to vector<2x384xf32>
    %cst_117 = arith.constant dense<0.000000e+00> : vector<2x384xf32>
    %334 = tpu.matmul %329, %242, %cst_117 {dimension_numbers = #tpu.dot_dimension_numbers<[1], [0], [0], [1], [0, 0, 1, 1], [], []>} : vector<2x128xf32>, vector<128x384xf32>, vector<2x384xf32> -> vector<2x384xf32>
    %335 = vector.extract_strided_slice %333 {offsets = [0, 0], sizes = [2, 256], strides = [1, 1]} : vector<2x384xf32> to vector<2x256xf32>
    %336 = vector.extract_strided_slice %334 {offsets = [0, 0], sizes = [2, 256], strides = [1, 1]} : vector<2x384xf32> to vector<2x256xf32>
    %337 = arith.addf %335, %336 : vector<2x256xf32>
    %338 = arith.negf %337 : vector<2x256xf32>
    %339 = math.exp %338 : vector<2x256xf32>
    %cst_118 = arith.constant 1.000000e+00 : f32
    %340 = vector.broadcast %cst_118 : f32 to vector<2x256xf32>
    %341 = arith.addf %340, %339 : vector<2x256xf32>
    %342 = arith.divf %340, %341 : vector<2x256xf32>
    %343 = vector.extract_strided_slice %342 {offsets = [0, 0], sizes = [2, 128], strides = [1, 1]} : vector<2x256xf32> to vector<2x128xf32>
    %344 = vector.extract_strided_slice %342 {offsets = [0, 128], sizes = [2, 128], strides = [1, 1]} : vector<2x256xf32> to vector<2x128xf32>
    %345 = vector.extract_strided_slice %333 {offsets = [0, 256], sizes = [2, 128], strides = [1, 1]} : vector<2x384xf32> to vector<2x128xf32>
    %346 = vector.extract_strided_slice %334 {offsets = [0, 256], sizes = [2, 128], strides = [1, 1]} : vector<2x384xf32> to vector<2x128xf32>
    %347 = arith.addf %346, %248 : vector<2x128xf32>
    %348 = arith.mulf %343, %347 : vector<2x128xf32>
    %349 = arith.addf %345, %348 : vector<2x128xf32>
    %350 = math.tanh %349 : vector<2x128xf32>
    %cst_119 = arith.constant 1.000000e+00 : f32
    %351 = vector.broadcast %cst_119 : f32 to vector<2x128xf32>
    %352 = arith.subf %351, %344 : vector<2x128xf32>
    %353 = arith.mulf %352, %350 : vector<2x128xf32>
    %354 = arith.mulf %344, %329 : vector<2x128xf32>
    %355 = arith.addf %353, %354 : vector<2x128xf32>
    %c6_120 = arith.constant 6 : index
    %c0_121 = arith.constant 0 : index
    %356 = vector.load %arg14[%c6_120, %c0_121] : memref<16x128xf32, #tpu.memory_space<vmem>>, vector<2x128xf32>
    %357 = arith.addf %356, %355 : vector<2x128xf32>
    %c6_122 = arith.constant 6 : index
    %c0_123 = arith.constant 0 : index
    %358 = vector.load %arg14[%c6_122, %c0_123] : memref<16x128xf32, #tpu.memory_space<vmem>>, vector<2x128xf32>
    tpu.vector_store %arg14[%c6_122, %c0_123], %357 {strides = array<i32>} : memref<16x128xf32, #tpu.memory_space<vmem>>, vector<2x128xf32>,
    %359 = vector.extract_strided_slice %252 {offsets = [8, 0], sizes = [2, 384], strides = [1, 1]} : vector<16x384xf32> to vector<2x384xf32>
    %cst_124 = arith.constant dense<0.000000e+00> : vector<2x384xf32>
    %360 = tpu.matmul %355, %242, %cst_124 {dimension_numbers = #tpu.dot_dimension_numbers<[1], [0], [0], [1], [0, 0, 1, 1], [], []>} : vector<2x128xf32>, vector<128x384xf32>, vector<2x384xf32> -> vector<2x384xf32>
    %361 = vector.extract_strided_slice %359 {offsets = [0, 0], sizes = [2, 256], strides = [1, 1]} : vector<2x384xf32> to vector<2x256xf32>
    %362 = vector.extract_strided_slice %360 {offsets = [0, 0], sizes = [2, 256], strides = [1, 1]} : vector<2x384xf32> to vector<2x256xf32>
    %363 = arith.addf %361, %362 : vector<2x256xf32>
    %364 = arith.negf %363 : vector<2x256xf32>
    %365 = math.exp %364 : vector<2x256xf32>
    %cst_125 = arith.constant 1.000000e+00 : f32
    %366 = vector.broadcast %cst_125 : f32 to vector<2x256xf32>
    %367 = arith.addf %366, %365 : vector<2x256xf32>
    %368 = arith.divf %366, %367 : vector<2x256xf32>
    %369 = vector.extract_strided_slice %368 {offsets = [0, 0], sizes = [2, 128], strides = [1, 1]} : vector<2x256xf32> to vector<2x128xf32>
    %370 = vector.extract_strided_slice %368 {offsets = [0, 128], sizes = [2, 128], strides = [1, 1]} : vector<2x256xf32> to vector<2x128xf32>
    %371 = vector.extract_strided_slice %359 {offsets = [0, 256], sizes = [2, 128], strides = [1, 1]} : vector<2x384xf32> to vector<2x128xf32>
    %372 = vector.extract_strided_slice %360 {offsets = [0, 256], sizes = [2, 128], strides = [1, 1]} : vector<2x384xf32> to vector<2x128xf32>
    %373 = arith.addf %372, %248 : vector<2x128xf32>
    %374 = arith.mulf %369, %373 : vector<2x128xf32>
    %375 = arith.addf %371, %374 : vector<2x128xf32>
    %376 = math.tanh %375 : vector<2x128xf32>
    %cst_126 = arith.constant 1.000000e+00 : f32
    %377 = vector.broadcast %cst_126 : f32 to vector<2x128xf32>
    %378 = arith.subf %377, %370 : vector<2x128xf32>
    %379 = arith.mulf %378, %376 : vector<2x128xf32>
    %380 = arith.mulf %370, %355 : vector<2x128xf32>
    %381 = arith.addf %379, %380 : vector<2x128xf32>
    %c8_127 = arith.constant 8 : index
    %c0_128 = arith.constant 0 : index
    %382 = vector.load %arg14[%c8_127, %c0_128] : memref<16x128xf32, #tpu.memory_space<vmem>>, vector<2x128xf32>
    %383 = arith.addf %382, %381 : vector<2x128xf32>
    %c8_129 = arith.constant 8 : index
    %c0_130 = arith.constant 0 : index
    %384 = vector.load %arg14[%c8_129, %c0_130] : memref<16x128xf32, #tpu.memory_space<vmem>>, vector<2x128xf32>
    tpu.vector_store %arg14[%c8_129, %c0_130], %383 {strides = array<i32>} : memref<16x128xf32, #tpu.memory_space<vmem>>, vector<2x128xf32>,
    %385 = vector.extract_strided_slice %252 {offsets = [10, 0], sizes = [2, 384], strides = [1, 1]} : vector<16x384xf32> to vector<2x384xf32>
    %cst_131 = arith.constant dense<0.000000e+00> : vector<2x384xf32>
    %386 = tpu.matmul %381, %242, %cst_131 {dimension_numbers = #tpu.dot_dimension_numbers<[1], [0], [0], [1], [0, 0, 1, 1], [], []>} : vector<2x128xf32>, vector<128x384xf32>, vector<2x384xf32> -> vector<2x384xf32>
    %387 = vector.extract_strided_slice %385 {offsets = [0, 0], sizes = [2, 256], strides = [1, 1]} : vector<2x384xf32> to vector<2x256xf32>
    %388 = vector.extract_strided_slice %386 {offsets = [0, 0], sizes = [2, 256], strides = [1, 1]} : vector<2x384xf32> to vector<2x256xf32>
    %389 = arith.addf %387, %388 : vector<2x256xf32>
    %390 = arith.negf %389 : vector<2x256xf32>
    %391 = math.exp %390 : vector<2x256xf32>
    %cst_132 = arith.constant 1.000000e+00 : f32
    %392 = vector.broadcast %cst_132 : f32 to vector<2x256xf32>
    %393 = arith.addf %392, %391 : vector<2x256xf32>
    %394 = arith.divf %392, %393 : vector<2x256xf32>
    %395 = vector.extract_strided_slice %394 {offsets = [0, 0], sizes = [2, 128], strides = [1, 1]} : vector<2x256xf32> to vector<2x128xf32>
    %396 = vector.extract_strided_slice %394 {offsets = [0, 128], sizes = [2, 128], strides = [1, 1]} : vector<2x256xf32> to vector<2x128xf32>
    %397 = vector.extract_strided_slice %385 {offsets = [0, 256], sizes = [2, 128], strides = [1, 1]} : vector<2x384xf32> to vector<2x128xf32>
    %398 = vector.extract_strided_slice %386 {offsets = [0, 256], sizes = [2, 128], strides = [1, 1]} : vector<2x384xf32> to vector<2x128xf32>
    %399 = arith.addf %398, %248 : vector<2x128xf32>
    %400 = arith.mulf %395, %399 : vector<2x128xf32>
    %401 = arith.addf %397, %400 : vector<2x128xf32>
    %402 = math.tanh %401 : vector<2x128xf32>
    %cst_133 = arith.constant 1.000000e+00 : f32
    %403 = vector.broadcast %cst_133 : f32 to vector<2x128xf32>
    %404 = arith.subf %403, %396 : vector<2x128xf32>
    %405 = arith.mulf %404, %402 : vector<2x128xf32>
    %406 = arith.mulf %396, %381 : vector<2x128xf32>
    %407 = arith.addf %405, %406 : vector<2x128xf32>
    %c10_134 = arith.constant 10 : index
    %c0_135 = arith.constant 0 : index
    %408 = vector.load %arg14[%c10_134, %c0_135] : memref<16x128xf32, #tpu.memory_space<vmem>>, vector<2x128xf32>
    %409 = arith.addf %408, %407 : vector<2x128xf32>
    %c10_136 = arith.constant 10 : index
    %c0_137 = arith.constant 0 : index
    %410 = vector.load %arg14[%c10_136, %c0_137] : memref<16x128xf32, #tpu.memory_space<vmem>>, vector<2x128xf32>
    tpu.vector_store %arg14[%c10_136, %c0_137], %409 {strides = array<i32>} : memref<16x128xf32, #tpu.memory_space<vmem>>, vector<2x128xf32>,
    %411 = vector.extract_strided_slice %252 {offsets = [12, 0], sizes = [2, 384], strides = [1, 1]} : vector<16x384xf32> to vector<2x384xf32>
    %cst_138 = arith.constant dense<0.000000e+00> : vector<2x384xf32>
    %412 = tpu.matmul %407, %242, %cst_138 {dimension_numbers = #tpu.dot_dimension_numbers<[1], [0], [0], [1], [0, 0, 1, 1], [], []>} : vector<2x128xf32>, vector<128x384xf32>, vector<2x384xf32> -> vector<2x384xf32>
    %413 = vector.extract_strided_slice %411 {offsets = [0, 0], sizes = [2, 256], strides = [1, 1]} : vector<2x384xf32> to vector<2x256xf32>
    %414 = vector.extract_strided_slice %412 {offsets = [0, 0], sizes = [2, 256], strides = [1, 1]} : vector<2x384xf32> to vector<2x256xf32>
    %415 = arith.addf %413, %414 : vector<2x256xf32>
    %416 = arith.negf %415 : vector<2x256xf32>
    %417 = math.exp %416 : vector<2x256xf32>
    %cst_139 = arith.constant 1.000000e+00 : f32
    %418 = vector.broadcast %cst_139 : f32 to vector<2x256xf32>
    %419 = arith.addf %418, %417 : vector<2x256xf32>
    %420 = arith.divf %418, %419 : vector<2x256xf32>
    %421 = vector.extract_strided_slice %420 {offsets = [0, 0], sizes = [2, 128], strides = [1, 1]} : vector<2x256xf32> to vector<2x128xf32>
    %422 = vector.extract_strided_slice %420 {offsets = [0, 128], sizes = [2, 128], strides = [1, 1]} : vector<2x256xf32> to vector<2x128xf32>
    %423 = vector.extract_strided_slice %411 {offsets = [0, 256], sizes = [2, 128], strides = [1, 1]} : vector<2x384xf32> to vector<2x128xf32>
    %424 = vector.extract_strided_slice %412 {offsets = [0, 256], sizes = [2, 128], strides = [1, 1]} : vector<2x384xf32> to vector<2x128xf32>
    %425 = arith.addf %424, %248 : vector<2x128xf32>
    %426 = arith.mulf %421, %425 : vector<2x128xf32>
    %427 = arith.addf %423, %426 : vector<2x128xf32>
    %428 = math.tanh %427 : vector<2x128xf32>
    %cst_140 = arith.constant 1.000000e+00 : f32
    %429 = vector.broadcast %cst_140 : f32 to vector<2x128xf32>
    %430 = arith.subf %429, %422 : vector<2x128xf32>
    %431 = arith.mulf %430, %428 : vector<2x128xf32>
    %432 = arith.mulf %422, %407 : vector<2x128xf32>
    %433 = arith.addf %431, %432 : vector<2x128xf32>
    %c12_141 = arith.constant 12 : index
    %c0_142 = arith.constant 0 : index
    %434 = vector.load %arg14[%c12_141, %c0_142] : memref<16x128xf32, #tpu.memory_space<vmem>>, vector<2x128xf32>
    %435 = arith.addf %434, %433 : vector<2x128xf32>
    %c12_143 = arith.constant 12 : index
    %c0_144 = arith.constant 0 : index
    %436 = vector.load %arg14[%c12_143, %c0_144] : memref<16x128xf32, #tpu.memory_space<vmem>>, vector<2x128xf32>
    tpu.vector_store %arg14[%c12_143, %c0_144], %435 {strides = array<i32>} : memref<16x128xf32, #tpu.memory_space<vmem>>, vector<2x128xf32>,
    %437 = vector.extract_strided_slice %252 {offsets = [14, 0], sizes = [2, 384], strides = [1, 1]} : vector<16x384xf32> to vector<2x384xf32>
    %cst_145 = arith.constant dense<0.000000e+00> : vector<2x384xf32>
    %438 = tpu.matmul %433, %242, %cst_145 {dimension_numbers = #tpu.dot_dimension_numbers<[1], [0], [0], [1], [0, 0, 1, 1], [], []>} : vector<2x128xf32>, vector<128x384xf32>, vector<2x384xf32> -> vector<2x384xf32>
    %439 = vector.extract_strided_slice %437 {offsets = [0, 0], sizes = [2, 256], strides = [1, 1]} : vector<2x384xf32> to vector<2x256xf32>
    %440 = vector.extract_strided_slice %438 {offsets = [0, 0], sizes = [2, 256], strides = [1, 1]} : vector<2x384xf32> to vector<2x256xf32>
    %441 = arith.addf %439, %440 : vector<2x256xf32>
    %442 = arith.negf %441 : vector<2x256xf32>
    %443 = math.exp %442 : vector<2x256xf32>
    %cst_146 = arith.constant 1.000000e+00 : f32
    %444 = vector.broadcast %cst_146 : f32 to vector<2x256xf32>
    %445 = arith.addf %444, %443 : vector<2x256xf32>
    %446 = arith.divf %444, %445 : vector<2x256xf32>
    %447 = vector.extract_strided_slice %446 {offsets = [0, 0], sizes = [2, 128], strides = [1, 1]} : vector<2x256xf32> to vector<2x128xf32>
    %448 = vector.extract_strided_slice %446 {offsets = [0, 128], sizes = [2, 128], strides = [1, 1]} : vector<2x256xf32> to vector<2x128xf32>
    %449 = vector.extract_strided_slice %437 {offsets = [0, 256], sizes = [2, 128], strides = [1, 1]} : vector<2x384xf32> to vector<2x128xf32>
    %450 = vector.extract_strided_slice %438 {offsets = [0, 256], sizes = [2, 128], strides = [1, 1]} : vector<2x384xf32> to vector<2x128xf32>
    %451 = arith.addf %450, %248 : vector<2x128xf32>
    %452 = arith.mulf %447, %451 : vector<2x128xf32>
    %453 = arith.addf %449, %452 : vector<2x128xf32>
    %454 = math.tanh %453 : vector<2x128xf32>
    %cst_147 = arith.constant 1.000000e+00 : f32
    %455 = vector.broadcast %cst_147 : f32 to vector<2x128xf32>
    %456 = arith.subf %455, %448 : vector<2x128xf32>
    %457 = arith.mulf %456, %454 : vector<2x128xf32>
    %458 = arith.mulf %448, %433 : vector<2x128xf32>
    %459 = arith.addf %457, %458 : vector<2x128xf32>
    %c14_148 = arith.constant 14 : index
    %c0_149 = arith.constant 0 : index
    %460 = vector.load %arg14[%c14_148, %c0_149] : memref<16x128xf32, #tpu.memory_space<vmem>>, vector<2x128xf32>
    %461 = arith.addf %460, %459 : vector<2x128xf32>
    %c14_150 = arith.constant 14 : index
    %c0_151 = arith.constant 0 : index
    %462 = vector.load %arg14[%c14_150, %c0_151] : memref<16x128xf32, #tpu.memory_space<vmem>>, vector<2x128xf32>
    tpu.vector_store %arg14[%c14_150, %c0_151], %461 {strides = array<i32>} : memref<16x128xf32, #tpu.memory_space<vmem>>, vector<2x128xf32>,
    %c1_152 = arith.constant 1 : index
    %c0_153 = arith.constant 0 : index
    %c0_154 = arith.constant 0 : index
    %463 = vector.load %arg13[%c1_152, %c0_153, %c0_154] : memref<2x2x128xf32, #tpu.memory_space<vmem>>, vector<1x2x128xf32>
    %464 = vector.shape_cast %463 : vector<1x2x128xf32> to vector<2x128xf32>
    %465 = vector.shape_cast %459 : vector<2x128xf32> to vector<1x2x128xf32>
    tpu.vector_store %arg13[%c1_152, %c0_153, %c0_154], %465 {strides = array<i32>} : memref<2x2x128xf32, #tpu.memory_space<vmem>>, vector<1x2x128xf32>,
    %c0_155 = arith.constant 0 : index
    %c0_156 = arith.constant 0 : index
    %466 = vector.load %arg14[%c0_155, %c0_156] : memref<16x128xf32, #tpu.memory_space<vmem>>, vector<16x128xf32>
    %c0_157 = arith.constant 0 : index
    %c0_158 = arith.constant 0 : index
    %467 = vector.load %arg8[%c0_157, %c0_158] : memref<128x128xf32, #tpu.memory_space<vmem>>, vector<128x128xf32>
    %cst_159 = arith.constant dense<0.000000e+00> : vector<16x128xf32>
    %468 = tpu.matmul %466, %467, %cst_159 {dimension_numbers = #tpu.dot_dimension_numbers<[1], [0], [0], [1], [0, 0, 1, 1], [], []>} : vector<16x128xf32>, vector<128x128xf32>, vector<16x128xf32> -> vector<16x128xf32>
    %c0_160 = arith.constant 0 : index
    %c0_161 = arith.constant 0 : index
    %469 = vector.load %arg9[%c0_160, %c0_161] : memref<1x128xf32, #tpu.memory_space<vmem>>, vector<1x128xf32>
    %470 = vector.broadcast %469 : vector<1x128xf32> to vector<16x128xf32>
    %471 = arith.addf %468, %470 : vector<16x128xf32>
    %cst_162 = arith.constant 0.000000e+00 : f32
    %472 = vector.broadcast %cst_162 : f32 to vector<16x128xf32>
    %473 = arith.cmpf ogt, %471, %472 : vector<16x128xf32>
    %cst_163 = arith.constant 0.00999999977 : f32
    %474 = vector.broadcast %cst_163 : f32 to vector<16x128xf32>
    %475 = arith.mulf %474, %471 : vector<16x128xf32>
    %476 = arith.select %473, %471, %475 : vector<16x128xi1>, vector<16x128xf32>
    %c0_164 = arith.constant 0 : index
    %c0_165 = arith.constant 0 : index
    %477 = vector.load %arg10[%c0_164, %c0_165] : memref<128x128xf32, #tpu.memory_space<vmem>>, vector<128x128xf32>
    %cst_166 = arith.constant dense<0.000000e+00> : vector<16x128xf32>
    %478 = tpu.matmul %476, %477, %cst_166 {dimension_numbers = #tpu.dot_dimension_numbers<[1], [0], [0], [1], [0, 0, 1, 1], [], []>} : vector<16x128xf32>, vector<128x128xf32>, vector<16x128xf32> -> vector<16x128xf32>
    %c0_167 = arith.constant 0 : index
    %c0_168 = arith.constant 0 : index
    %479 = vector.load %arg11[%c0_167, %c0_168] : memref<1x128xf32, #tpu.memory_space<vmem>>, vector<1x128xf32>
    %480 = vector.broadcast %479 : vector<1x128xf32> to vector<16x128xf32>
    %481 = arith.addf %478, %480 : vector<16x128xf32>
    %c0_169 = arith.constant 0 : index
    %c0_170 = arith.constant 0 : index
    %482 = vector.load %arg12[%c0_169, %c0_170] : memref<16x128xf32, #tpu.memory_space<vmem>>, vector<16x128xf32>
    tpu.vector_store %arg12[%c0_169, %c0_170], %481 {strides = array<i32>} : memref<16x128xf32, #tpu.memory_space<vmem>>, vector<16x128xf32>,
    return
  }
}

</mosaic_0001>

<bundles_post_ra>
// kernel: tpu_custom_call.1
= control target key start
LH: loop header
LB: loop body
LE: loop exit
PB: predicated region body
PF: predicated region fallthrough
CT: control target
= control target key end

     0   :  { %19 = vsyncpa [#allocation4], 0  ;;  %s4850_s0 = inlined_call_operand.vmem [shape: f32[16,64], index: 0, kind: input, shape index: {}]   ;;  %s4851_s1 = inlined_call_operand.hbm [shape: f32[64,128], index: 1, kind: input, shape index: {}]   ;;  %s4852_s2 = inlined_call_operand.hbm [shape: f32[1,128], index: 2, kind: input, shape index: {}]   ;;  %s4853_s3 = inlined_call_operand.hbm [shape: f32[2,128,384], index: 3, kind: input, shape index: {}]   ;;  %s4854_s4 = inlined_call_operand.hbm [shape: f32[2,128,384], index: 4, kind: input, shape index: {}]   ;;  %s4855_s5 = inlined_call_operand.hbm [shape: f32[2,1,384], index: 5, kind: input, shape index: {}]   ;;  %s4856_s6 = inlined_call_operand.vmem [shape: f32[2,1,128], index: 6, kind: input, shape index: {}]   ;;  %s4857_s7 = inlined_call_operand.hbm [shape: f32[2,2,128], index: 7, kind: input, shape index: {}, may-alias: {7,13}]   ;;  %s4858_s8 = inlined_call_operand.hbm [shape: f32[128,128], index: 8, kind: input, shape index: {}]   ;;  %s4859_s9 = inlined_call_operand.hbm [shape: f32[1,128], index: 9, kind: input, shape index: {}]   ;;  %s4860_s10 = inlined_call_operand.hbm [shape: f32[128,128], index: 10, kind: input, shape index: {}]   ;;  %s4861_s11 = inlined_call_operand.hbm [shape: f32[1,128], index: 11, kind: input, shape index: {}]   ;;  %s4862_s12 = inlined_call_operand.hbm [shape: f32[16,128], index: 12, kind: output, shape index: {0}]   ;;  %s4863_s13 = inlined_call_operand.hbm [shape: f32[2,2,128], index: 13, kind: output, shape index: {1}, may-alias: {7,13}]  }
   0x1   :  { %20 = vsyncpa [#allocation7], 0 }
   0x2   :  { %21 = vsyncpa [#allocation10], 0 }
   0x3   :  { %22 = vsyncpa [#allocation13], 0 }
   0x4   :  { %23 = vsyncpa [#allocation16], 0 }
   0x5   :  { %24 = vsyncpa [#allocation19], 0 }
   0x6   :  { %25 = vsyncpa [#allocation5], 0  ;;  %s47_s27 = sshll.u32 %s4852_s2, 4  ;;  %s48_s27 = int_to_ptr.hbm [resolvable:$true] %s47_s27 }
   0x7   :  { %26 = vsyncpa [#allocation22], 0  ;;  %s3323_s28 = smov [#allocation6]   ;;  %s70_s15 = sshll.u32 %s4854_s4, 4  ;;  %s71_s15 = int_to_ptr.hbm [resolvable:$true] %s70_s15 }
   0x8   :  { %s49_s29 = sshll.u32 %s3323_s28, 4  ;;  %s3324_s16 = smov [#allocation9]   ;;  %s50_s29 = int_to_ptr.vmem [resolvable:$true] %s49_s29 }
   0x9   :  { %52 = dma.hbm_to_vmem [thread:$0]  %s48_s27, 16, %s50_s29, [#allocation7]  }
   0xa   :  { %s72_s17 = sshll.u32 %s3324_s16, 4  ;;  %s98_s20 = sshll.u32 %s4857_s7, 4  ;;  %s73_s17 = int_to_ptr.vmem [resolvable:$true] %s72_s17  ;;  %s99_s20 = int_to_ptr.hbm [resolvable:$true] %s98_s20 }
   0xb   :  { %s3325_s2 = smov 384   ;;  %s3326_s21 = smov 24  }
   0xc   :  { %78 = dma.hbm_to_vmem [thread:$0]  %s71_s15, 12288, %s73_s17, [#allocation10], %s3325_s2, %s3325_s2, %s3326_s21  }
   0xd   :  { %s3327_s22 = smov [#allocation12]   ;;  %s125_s25 = sshll.u32 %s4859_s9, 4  ;;  %s126_s25 = int_to_ptr.hbm [resolvable:$true] %s125_s25 }
   0xe   :  { %s100_s23 = sshll.u32 %s3327_s22, 4  ;;  %s3328_s26 = smov 32   ;;  %s101_s23 = int_to_ptr.vmem [resolvable:$true] %s100_s23 }
   0xf   :  { %s3329_s27 = smov 2   ;;  %s3330_s7 = smov [#allocation15]  }
  0x10   :  { %106 = dma.hbm_to_vmem [thread:$0]  %s99_s20, 64, %s101_s23, [#allocation13], %s3328_s26, %s3328_s26, %s3329_s27  }
  0x11   :  { %s127_s28 = sshll.u32 %s3330_s7, 4  ;;  %s33_s14 = sshll.u32 %s4851_s1, 4  ;;  %s128_s28 = int_to_ptr.vmem [resolvable:$true] %s127_s28  ;;  %s34_s14 = int_to_ptr.hbm [resolvable:$true] %s33_s14 }
  0x12   :  { %130 = dma.hbm_to_vmem [thread:$0]  %s126_s25, 16, %s128_s28, [#allocation16]  }
  0x13   :  { %s3331_s15 = smov [#allocation3]   ;;  %s57_s18 = sshll.u32 %s4853_s3, 4  ;;  %s58_s18 = int_to_ptr.hbm [resolvable:$true] %s57_s18 }
  0x14   :  { %s35_s16 = sshll.u32 %s3331_s15, 4  ;;  %s3332_s19 = smov 128   ;;  %s36_s16 = int_to_ptr.vmem [resolvable:$true] %s35_s16 }
  0x15   :  { %s3333_s22 = smov 8   ;;  %s3334_s20 = smov [#allocation8]  }
  0x16   :  { %41 = dma.hbm_to_vmem [thread:$0]  %s34_s14, 1024, %s36_s16, [#allocation4], %s3332_s19, %s3332_s19, %s3333_s22  }
  0x17   :  { %s59_s23 = sshll.u32 %s3334_s20, 4  ;;  %s83_s4 = sshll.u32 %s4855_s5, 4  ;;  %s60_s23 = int_to_ptr.vmem [resolvable:$true] %s59_s23  ;;  %s84_s4 = int_to_ptr.hbm [resolvable:$true] %s83_s4 }
  0x18   :  { %65 = dma.hbm_to_vmem [thread:$0]  %s58_s18, 12288, %s60_s23, [#allocation7], %s3325_s2, %s3325_s2, %s3326_s21  }
  0x19   :  { %s3335_s3 = smov [#allocation11]   ;;  %s111_s29 = sshll.u32 %s4858_s8, 4  ;;  %s112_s29 = int_to_ptr.hbm [resolvable:$true] %s111_s29 }
  0x1a   :  { %s85_s25 = sshll.u32 %s3335_s3, 4  ;;  %s3336_s30 = smov 48   ;;  %s86_s25 = int_to_ptr.vmem [resolvable:$true] %s85_s25 }
  0x1b   :  { %s3337_s14 = smov 3   ;;  %s3338_s15 = smov [#allocation14]  }
  0x1c   :  { %91 = dma.hbm_to_vmem [thread:$0]  %s84_s4, 96, %s86_s25, [#allocation10], %s3336_s30, %s3336_s30, %s3337_s14  }
  0x1d   :  { %s113_s16 = sshll.u32 %s3338_s15, 4  ;;  %s135_s17 = sshll.u32 %s4860_s10, 4  ;;  %s114_s16 = int_to_ptr.vmem [resolvable:$true] %s113_s16  ;;  %s136_s17 = int_to_ptr.hbm [resolvable:$true] %s135_s17 }
  0x1e   :  { %119 = dma.hbm_to_vmem [thread:$0]  %s112_s29, 2048, %s114_s16, [#allocation13], %s3332_s19, %s3332_s19, %s3333_s22  }
  0x1f   :  { %s149_s8 = sshll.u32 %s4861_s11, 4  ;;  %s3339_s18 = smov [#allocation17]   ;;  %s150_s8 = int_to_ptr.hbm [resolvable:$true] %s149_s8 }
  0x20   :  { %s137_s20 = sshll.u32 %s3339_s18, 4  ;;  %s3340_s23 = smov [#allocation18]   ;;  %s138_s20 = int_to_ptr.vmem [resolvable:$true] %s137_s20 }
  0x21   :  { %143 = dma.hbm_to_vmem [thread:$0]  %s136_s17, 2048, %s138_s20, [#allocation16], %s3332_s19, %s3332_s19, %s3333_s22  }
  0x22   :  { %s151_s10 = sshll.u32 %s3340_s23, 4  ;;  %s152_s10 = int_to_ptr.vmem [resolvable:$true] %s151_s10 }
  0x23   :  { %154 = dma.hbm_to_vmem [thread:$0]  %s150_s8, 16, %s152_s10, [#allocation19]  }
  0x24   :  { %3307 = dma.done.wait [#allocation4], 1024  }
  0x25   :  { %3308 = vsyncadd [#allocation4], 4294966272 }
  0x26   :  { %3309 = dma.done.wait [#allocation7], 12304  }
  0x27   :  { %3310 = vsyncadd [#allocation7], 4294954992 }
  0x28   :  { %3311 = dma.done.wait [#allocation10], 12384  }
  0x29   :  { %3312 = vsyncadd [#allocation10], 4294954912 }
  0x2a   :  { %3313 = dma.done.wait [#allocation13], 2112  }
  0x2b   :  { %3314 = vsyncadd [#allocation13], 4294965184 }
  0x2c   :  { %3315 = dma.done.wait [#allocation16], 2064  }
  0x2d   :  { %3316 = vsyncadd [#allocation16], 4294965232 }
  0x2e   :  { %3317 = dma.done.wait [#allocation19], 16  }
  0x2f   :  { %3318 = vsyncadd [#allocation19], 4294967280  ;;  %v204_v0 = vld [vmem:[#allocation3 + $0x38] sm:$0xff]  ;;  %v203_v1 = vld [vmem:[#allocation3 + $0x30] sm:$0xff]  ;;  %vm209_vm0 = vcmask 523264   ;;  %s2678_s9 = sshll.u32 %s4863_s13, 4  ;;  %s2679_s9 = int_to_ptr.hbm [resolvable:$true] %s2678_s9 }
  0x30   :  { %224 = vmatpush.msra.mxu1 %v204_v0  ;;  %v202_v2 = vld [vmem:[#allocation3 + $0x28] sm:$0xff]  ;;  %v201_v3 = vld [vmem:[#allocation3 + $0x20] sm:$0xff]  ;;  %v293_v4 = vld [vmem:[#allocation8 + $0x170] sm:$0xff]  ;;  %s3342_s17 = smov [#allocation20]   ;;  %s2665_s18 = sshll.u32 %s4862_s12, 4  ;;  %s2666_s18 = int_to_ptr.hbm [resolvable:$true] %s2665_s18 }
  0x31   :  { %v290_v5 = vld [vmem:[#allocation8 + $0x158] sm:$0xff]  ;;  %380 = vmatpush.msra.mxu2 %v293_v4  ;;  %v287_v7 = vld [vmem:[#allocation8 + $0x140] sm:$0xff]  ;;  %v199_v9 = vld [vmem:[#allocation3 + $0x10] sm:$0xff]  ;;  %s2663_s2 = sshll.u32 %s3342_s17, 4  ;;  %s2664_s2 = int_to_ptr.vmem [resolvable:$true] %s2663_s2 }
  0x32   :  { %225 = vmatpush.msra.mxu1 %v203_v1  ;;  %v200_v6 = vld [vmem:[#allocation3 + $0x18] sm:$0xff]  ;;  %v291_v10 = vld [vmem:[#allocation8 + $0x160] sm:$0xff]  ;;  %v3461_v11 = vld [vmem:[#allocation9 + $0x168] sm:$0xff] }
  0x33   :  { %v294_v8 = vld [vmem:[#allocation8 + $0x178] sm:$0xff]  ;;  %381 = vmatpush.msra.mxu2 %v290_v5  ;;  %v284_v12 = vld [vmem:[#allocation8 + $0x128] sm:$0xff]  ;;  %427 = vmatpush.msra.mxu0 %v3461_v11  ;;  %v3464_v15 = vld [vmem:[#allocation9 + $0x150] sm:$0xff] }
  0x34   :  { %226 = vmatpush.msra.mxu1 %v202_v2  ;;  %403 = vmatpush.msra.mxu3 %v294_v8  ;;  %v288_v13 = vld [vmem:[#allocation8 + $0x148] sm:$0xff]  ;;  %v281_v16 = vld [vmem:[#allocation8 + $0x110] sm:$0xff]  ;;  %v3467_v18 = vld [vmem:[#allocation9 + $0x138] sm:$0xff] }
  0x35   :  { %v198_v14 = vld [vmem:[#allocation3 + $0x8] sm:$0xff]  ;;  %382 = vmatpush.msra.mxu2 %v287_v7  ;;  %428 = vmatpush.msra.mxu0 %v3464_v15  ;;  %v285_v17 = vld [vmem:[#allocation8 + $0x130] sm:$0xff]  ;;  %v197_v19 = vld [vmem:[#allocation3] sm:$0xff] }
  0x36   :  { %227 = vmatpush.msra.mxu1 %v201_v3  ;;  %404 = vmatpush.msra.mxu3 %v291_v10  ;;  %v3469_v20 = vld [vmem:[#allocation9 + $0x120] sm:$0xff]  ;;  %v195_v21 = vld [vmem:[%s4850_s0] sm:$0xff]  ;;  %v278_v22 = vld [vmem:[#allocation8 + $0xf8] sm:$0xff] }
  0x37   :  { %383 = vmatpush.msra.mxu2 %v284_v12  ;;  %429 = vmatpush.msra.mxu0 %v3467_v18  ;;  %v292_v23 = vld [vmem:[#allocation8 + $0x168] sm:$0xff]  ;;  %v282_v24 = vld [vmem:[#allocation8 + $0x118] sm:$0xff]  ;;  %v275_v25 = vld [vmem:[#allocation8 + $0xe0] sm:$0xff] }
  0x38   :  { %228 = vmatpush.msra.mxu1 %v200_v6  ;;  %405 = vmatpush.msra.mxu3 %v288_v13  ;;  %v3476_v26 = vld [vmem:[#allocation9 + $0x108] sm:$0xff]  ;;  %v289_v27 = vld [vmem:[#allocation8 + $0x150] sm:$0xff]  ;;  %v279_v28 = vld [vmem:[#allocation8 + $0x100] sm:$0xff] }
  0x39   :  { %384 = vmatpush.msra.mxu2 %v281_v16  ;;  %430 = vmatpush.msra.mxu0 %v3469_v20  ;;  %v286_v29 = vld [vmem:[#allocation8 + $0x138] sm:$0xff]  ;;  %v272_v30 = vld [vmem:[#allocation8 + $0xc8] sm:$0xff]  ;;  %v3479_v31 = vld [vmem:[#allocation9 + $0xf0] sm:$0xff] }
  0x3a   :  { %229 = vmatpush.msra.mxu1 %v199_v9  ;;  %406 = vmatpush.msra.mxu3 %v285_v17  ;;  %v283_v32 = vld [vmem:[#allocation8 + $0x120] sm:$0xff]  ;;  %v269_v33 = vld [vmem:[#allocation8 + $0xb0] sm:$0xff]  ;;  %v276_v34 = vld [vmem:[#allocation8 + $0xe8] sm:$0xff] }
  0x3b   :  { %385 = vmatpush.msra.mxu2 %v278_v22  ;;  %431 = vmatpush.msra.mxu0 %v3476_v26  ;;  %v3482_v35 = vld [vmem:[#allocation9 + $0xd8] sm:$0xff]  ;;  %v273_v36 = vld [vmem:[#allocation8 + $0xd0] sm:$0xff]  ;;  %v280_v39 = vld [vmem:[#allocation8 + $0x108] sm:$0xff] }
  0x3c   :  { %230 = vmatpush.msra.mxu1 %v198_v14  ;;  %407 = vmatpush.msra.mxu3 %v282_v24  ;;  %v196_v37 = vld [vmem:[%s4850_s0 + $0x8] sm:$0xff]  ;;  %v263_v41 = vld [vmem:[#allocation8 + $0x80] sm:$0xff]  ;;  %v260_v44 = vld [vmem:[#allocation8 + $0x68] sm:$0xff] }
  0x3d   :  { %386 = vmatpush.msra.mxu2 %v275_v25  ;;  %432 = vmatpush.msra.mxu0 %v3479_v31  ;;  %v266_v38 = vld [vmem:[#allocation8 + $0x98] sm:$0xff]  ;;  %v3489_v42 = vld [vmem:[#allocation9 + $0xc0] sm:$0xff]  ;;  %v277_v43 = vld [vmem:[#allocation8 + $0xf0] sm:$0xff] }
  0x3e   :  { %231 = vmatpush.msra.mxu1 %v197_v19  ;;  %408 = vmatpush.msra.mxu3 %v279_v28  ;;  %v270_v40 = vld [vmem:[#allocation8 + $0xb8] sm:$0xff]  ;;  %v271_v46 = vld [vmem:[#allocation8 + $0xc0] sm:$0xff]  ;;  %v268_v47 = vld [vmem:[#allocation8 + $0xa8] sm:$0xff] }
  0x3f   :  { %2701 = vmatmul.msk.f32.vlgmr.msra.gmra.mxu1 %vm209_vm0, %v195_v21  ;;  %387 = vmatpush.msra.mxu2 %v272_v30  ;;  %v274_v45 = vld [vmem:[#allocation8 + $0xd8] sm:$0xff]  ;;  %v265_v48 = vld [vmem:[#allocation8 + $0x90] sm:$0xff]  ;;  %v259_v50 = vld [vmem:[#allocation8 + $0x60] sm:$0xff] }
  0x40   :  { %357 = vmatpush.msrb.mxu1 %v292_v23  ;;  %409 = vmatpush.msra.mxu3 %v276_v34  ;;  %v262_v49 = vld [vmem:[#allocation8 + $0x78] sm:$0xff]  ;;  %v256_v51 = vld [vmem:[#allocation8 + $0x48] sm:$0xff]  ;;  %v253_v52 = vld [vmem:[#allocation8 + $0x30] sm:$0xff] }
  0x41   :  { %388 = vmatpush.msra.mxu2 %v269_v33  ;;  %433 = vmatpush.msra.mxu0 %v3482_v35  ;;  %v250_v53 = vld [vmem:[#allocation8 + $0x18] sm:$0xff]  ;;  %v247_v54 = vld [vmem:[#allocation8] sm:$0xff]  ;;  %v3493_v55 = vld [vmem:[#allocation9 + $0x170] sm:$0xff] }
  0x42   :  { %358 = vmatpush.msrb.mxu1 %v289_v27  ;;  %410 = vmatpush.msra.mxu3 %v273_v36  ;;  %v257_v56 = vld [vmem:[#allocation8 + $0x50] sm:$0xff]  ;;  %v267_v57 = vld [vmem:[#allocation8 + $0xa0] sm:$0xff]  ;;  %v3496_v58 = vld [vmem:[#allocation9 + $0xa8] sm:$0xff] }
  0x43   :  { %389 = vmatpush.msra.mxu2 %v266_v38  ;;  %434 = vmatpush.msra.mxu0 %v3489_v42  ;;  %v3498_v59 = vld [vmem:[#allocation9 + $0x158] sm:$0xff]  ;;  %v264_v61 = vld [vmem:[#allocation8 + $0x88] sm:$0xff]  ;;  %v3502_v62 = vld [vmem:[#allocation9 + $0x90] sm:$0xff] }
  0x44   :  { %359 = vmatpush.msrb.mxu1 %v286_v29  ;;  %411 = vmatpush.msra.mxu3 %v270_v40  ;;  %v254_v60 = vld [vmem:[#allocation8 + $0x38] sm:$0xff]  ;;  %v3504_v63 = vld [vmem:[#allocation9 + $0x140] sm:$0xff]  ;;  %v261_v1 = vld [vmem:[#allocation8 + $0x70] sm:$0xff] }
  0x45   :  { %390 = vmatpush.msra.mxu2 %v263_v41  ;;  %435 = vmatpush.msra.mxu0 %v3496_v58  ;;  %v251_v0 = vld [vmem:[#allocation8 + $0x20] sm:$0xff]  ;;  %v3508_v2 = vld [vmem:[#allocation9 + $0x78] sm:$0xff]  ;;  %v3510_v3 = vld [vmem:[#allocation9 + $0x128] sm:$0xff] }
  0x46   :  { %360 = vmatpush.msrb.mxu1 %v283_v32  ;;  %412 = vmatpush.msra.mxu3 %v267_v57  ;;  %v248_v4 = vld [vmem:[#allocation8 + $0x8] sm:$0xff]  ;;  %v258_v5 = vld [vmem:[#allocation8 + $0x58] sm:$0xff]  ;;  %v3514_v6 = vld [vmem:[#allocation9 + $0x60] sm:$0xff] }
  0x47   :  { %2702 = vmatmul.msk.f32.gmra.mxu1 %vm209_vm0, %v196_v37  ;;  %391 = vmatpush.msra.mxu2 %v260_v44  ;;  %v3516_v7 = vld [vmem:[#allocation9 + $0x110] sm:$0xff]  ;;  %v3519_v8 = vld [vmem:[#allocation9 + $0x178] sm:$0xff]  ;;  %v255_v9 = vld [vmem:[#allocation8 + $0x40] sm:$0xff] }
  0x48   :  { %361 = vmatpush.msrb.mxu1 %v280_v39  ;;  %413 = vmatpush.msra.mxu3 %v264_v61  ;;  %v3523_v10 = vld [vmem:[#allocation9 + $0x48] sm:$0xff]  ;;  %v3525_v12 = vld [vmem:[#allocation9 + $0xf8] sm:$0xff]  ;;  %v3528_v13 = vld [vmem:[#allocation9 + $0x160] sm:$0xff] }
  0x49   :  { %392 = vmatpush.msra.mxu2 %v257_v56  ;;  %436 = vmatpush.msra.mxu0 %v3502_v62  ;;  %v252_v14 = vld [vmem:[#allocation8 + $0x28] sm:$0xff]  ;;  %v3532_v16 = vld [vmem:[#allocation9 + $0x30] sm:$0xff]  ;;  %v3534_v17 = vld [vmem:[#allocation9 + $0xe0] sm:$0xff] }
  0x4a   :  { %362 = vmatpush.msrb.mxu1 %v277_v43  ;;  %414 = vmatpush.msra.mxu3 %v261_v1  ;;  %v3537_v19 = vld [vmem:[#allocation9 + $0x148] sm:$0xff]  ;;  %v249_v21 = vld [vmem:[#allocation8 + $0x10] sm:$0xff]  ;;  %v3541_v22 = vld [vmem:[#allocation9 + $0x18] sm:$0xff] }
  0x4b   :  { %393 = vmatpush.msra.mxu2 %v254_v60  ;;  %437 = vmatpush.msra.mxu0 %v3508_v2  ;;  %4903 = vst [vmem:[#allocation31_spill] sm:$0xff] %v3541_v22  ;;  %v3543_v23 = vld [vmem:[#allocation9 + $0xc8] sm:$0xff]  ;;  %v3546_v24 = vld [vmem:[#allocation9 + $0x130] sm:$0xff]  ;;  %v3550_v25 = vld [vmem:[#allocation9] sm:$0xff] }
  0x4c   :  { %363 = vmatpush.msrb.mxu1 %v274_v45  ;;  %415 = vmatpush.msra.mxu3 %v258_v5  ;;  %4904 = vst [vmem:[#allocation32_spill] sm:$0xff] %v3550_v25  ;;  %v3552_v27 = vld [vmem:[#allocation9 + $0xb0] sm:$0xff]  ;;  %v3554_v28 = vld [vmem:[#allocation9 + $0x118] sm:$0xff]  ;;  %v3559_v29 = vld [vmem:[#allocation12] sm:$0x3] }
  0x4d   :  { %394 = vmatpush.msra.mxu2 %v251_v0  ;;  %438 = vmatpush.msra.mxu0 %v3514_v6  ;;  %v3563_v30 = vld [vmem:[#allocation9 + $0x98] sm:$0xff]  ;;  %v3565_v32 = vld [vmem:[#allocation9 + $0x100] sm:$0xff]  ;;  %v3572_v34 = vld [vmem:[#allocation9 + $0xe8] sm:$0xff] }
  0x4e   :  { %364 = vmatpush.msrb.mxu1 %v271_v46  ;;  %416 = vmatpush.msra.mxu3 %v255_v9  ;;  %v3570_v33 = vld [vmem:[#allocation9 + $0x80] sm:$0xff]  ;;  %v3578_v36 = vld [vmem:[#allocation9 + $0x68] sm:$0xff]  ;;  %v3580_v37 = vld [vmem:[#allocation9 + $0xd0] sm:$0xff] }
  0x4f   :  { %395 = vmatpush.msra.mxu2 %v248_v4  ;;  %439 = vmatpush.msra.mxu0 %v3523_v10  ;;  %v3586_v38 = vld [vmem:[#allocation9 + $0x50] sm:$0xff]  ;;  %v3588_v39 = vld [vmem:[#allocation9 + $0xb8] sm:$0xff]  ;;  %v3594_v41 = vld [vmem:[#allocation9 + $0xa0] sm:$0xff] }
  0x50   :  { %365 = vmatpush.msrb.mxu1 %v268_v47  ;;  %417 = vmatpush.msra.mxu3 %v252_v14  ;;  %v3590_v40 = vld [vmem:[#allocation9 + $0x38] sm:$0xff]  ;;  %v3598_v43 = vld [vmem:[#allocation9 + $0x20] sm:$0xff]  ;;  %v3602_v44 = vld [vmem:[#allocation9 + $0x88] sm:$0xff] }
  0x51   :  { %467 = vmatpush.msrb.mxu2 %v3519_v8  ;;  %440 = vmatpush.msra.mxu0 %v3532_v16  ;;  %4905 = vst [vmem:[#allocation33_spill] sm:$0xff] %v3598_v43  ;;  %v3606_v45 = vld [vmem:[#allocation9 + $0x8] sm:$0xff]  ;;  %v3610_v46 = vld [vmem:[#allocation9 + $0x70] sm:$0xff]  ;;  %v3616_v47 = vld [vmem:[#allocation9 + $0x58] sm:$0xff] }
  0x52   :  { %366 = vmatpush.msrb.mxu1 %v265_v48  ;;  %418 = vmatpush.msra.mxu3 %v249_v21  ;;  %4906 = vst [vmem:[#allocation34_spill] sm:$0xff] %v3606_v45  ;;  %v3621_v48 = vld [vmem:[#allocation9 + $0x40] sm:$0xff] }
  0x53   :  { %468 = vmatpush.msrb.mxu2 %v3528_v13  ;;  %441 = vmatpush.msra.mxu0 %v3541_v22  ;;  %v3746_v1 = vld [vmem:[#allocation11] sm:$0x7] }
  0x54   :  { %367 = vmatpush.msrb.mxu1 %v262_v49  ;;  %538 = vmatpush.msrb.mxu3 %v3461_v11  ;;  %v3626_v49 = vld [vmem:[#allocation9 + $0x28] sm:$0xff]  ;;  %4909 = vst [vmem:[#allocation37_spill] sm:$0xff] %v3746_v1  ;;  %v351_v4 = vperm.slane %v3746_v1, 0 }
  0x55   :  { %469 = vmatpush.msrb.mxu2 %v3537_v19  ;;  %442 = vmatpush.msra.mxu0 %v3550_v25  ;;  %4907 = vst [vmem:[#allocation35_spill] sm:$0xff] %v3626_v49 }
  0x56   :  { %368 = vmatpush.msrb.mxu1 %v259_v50  ;;  %443 = vmatmul.f32.vlgmr.msra.gmra.mxu0 %v3559_v29  ;;  %v3631_v50 = vld [vmem:[#allocation9 + $0x10] sm:$0xff] }
  0x57   :  { %470 = vmatpush.msrb.mxu2 %v3546_v24  ;;  %558 = vmatpush.msrb.mxu0 %v3493_v55  ;;  %4908 = vst [vmem:[#allocation36_spill] sm:$0xff] %v3631_v50 }
  0x58   :  { %369 = vmatpush.msrb.mxu1 %v256_v51  ;;  %539 = vmatpush.msrb.mxu3 %v3464_v15  ;;  %v2756_v51 = vld [vmem:[#allocation6] ss:$0 sm:$0xff] }
  0x59   :  { %471 = vmatpush.msrb.mxu2 %v3554_v28  ;;  %559 = vmatpush.msrb.mxu0 %v3498_v59 }
  0x5a   :  { %370 = vmatpush.msrb.mxu1 %v253_v52  ;;  %540 = vmatpush.msrb.mxu3 %v3467_v18 }
  0x5b   :  { %472 = vmatpush.msrb.mxu2 %v3565_v32  ;;  %560 = vmatpush.msrb.mxu0 %v3504_v63 }
  0x5c   :  { %371 = vmatpush.msrb.mxu1 %v250_v53  ;;  %541 = vmatpush.msrb.mxu3 %v3469_v20 }
  0x5d   :  { %473 = vmatpush.msrb.mxu2 %v3572_v34  ;;  %561 = vmatpush.msrb.mxu0 %v3510_v3 }
  0x5e   :  { %372 = vmatpush.msrb.mxu1 %v247_v54  ;;  %542 = vmatpush.msrb.mxu3 %v3476_v26 }
  0x5f   :  { %474 = vmatpush.msrb.mxu2 %v3580_v37  ;;  %562 = vmatpush.msrb.mxu0 %v3516_v7 }
  0x60   :  { %447 = vmatpush.msra.mxu1 %v3493_v55  ;;  %543 = vmatpush.msrb.mxu3 %v3479_v31 }
  0x61   :  { %475 = vmatpush.msrb.mxu2 %v3588_v39  ;;  %563 = vmatpush.msrb.mxu0 %v3525_v12 }
  0x62   :  { %448 = vmatpush.msra.mxu1 %v3498_v59  ;;  %544 = vmatpush.msrb.mxu3 %v3482_v35 }
  0x63   :  { %476 = vmatpush.msrb.mxu2 %v3594_v41  ;;  %564 = vmatpush.msrb.mxu0 %v3534_v17 }
  0x64   :  { %449 = vmatpush.msra.mxu1 %v3504_v63  ;;  %545 = vmatpush.msrb.mxu3 %v3489_v42 }
  0x65   :  { %477 = vmatpush.msrb.mxu2 %v3602_v44  ;;  %565 = vmatpush.msrb.mxu0 %v3543_v23 }
  0x66   :  { %450 = vmatpush.msra.mxu1 %v3510_v3  ;;  %546 = vmatpush.msrb.mxu3 %v3496_v58 }
  0x67   :  { %478 = vmatpush.msrb.mxu2 %v3610_v46  ;;  %566 = vmatpush.msrb.mxu0 %v3552_v27 }
  0x68   :  { %451 = vmatpush.msra.mxu1 %v3516_v7  ;;  %547 = vmatpush.msrb.mxu3 %v3502_v62 }
  0x69   :  { %479 = vmatpush.msrb.mxu2 %v3616_v47  ;;  %567 = vmatpush.msrb.mxu0 %v3563_v30 }
  0x6a   :  { %452 = vmatpush.msra.mxu1 %v3525_v12  ;;  %548 = vmatpush.msrb.mxu3 %v3508_v2 }
  0x6b   :  { %480 = vmatpush.msrb.mxu2 %v3621_v48  ;;  %568 = vmatpush.msrb.mxu0 %v3570_v33 }
  0x6c   :  { %453 = vmatpush.msra.mxu1 %v3534_v17  ;;  %549 = vmatpush.msrb.mxu3 %v3514_v6 }
  0x6d   :  { %481 = vmatpush.msrb.mxu2 %v3626_v49  ;;  %569 = vmatpush.msrb.mxu0 %v3578_v36 }
  0x6e   :  { %454 = vmatpush.msra.mxu1 %v3543_v23  ;;  %550 = vmatpush.msrb.mxu3 %v3523_v10 }
  0x6f   :  { %482 = vmatpush.msrb.mxu2 %v3631_v50  ;;  %570 = vmatpush.msrb.mxu0 %v3586_v38 }
  0x70   :  { %455 = vmatpush.msra.mxu1 %v3552_v27  ;;  %551 = vmatpush.msrb.mxu3 %v3532_v16 }
  0x71   :  { %571 = vmatpush.msrb.mxu0 %v3590_v40 }
  0x72   :  { %456 = vmatpush.msra.mxu1 %v3563_v30  ;;  %552 = vmatpush.msrb.mxu3 %v3541_v22 }
  0x73   :  { %572 = vmatpush.msrb.mxu0 %v3598_v43 }
  0x74   :  { %457 = vmatpush.msra.mxu1 %v3570_v33  ;;  %553 = vmatpush.msrb.mxu3 %v3550_v25 }
  0x75   :  { %573 = vmatpush.msrb.mxu0 %v3606_v45 }
  0x76   :  { %458 = vmatpush.msra.mxu1 %v3578_v36 }
  0x77   :  { %704 = vmatpush.msra.mxu0 %v3519_v8 }
  0x78   :  { %459 = vmatpush.msra.mxu1 %v3586_v38 }
  0x79   :  { %705 = vmatpush.msra.mxu0 %v3528_v13 }
  0x7a   :  { %460 = vmatpush.msra.mxu1 %v3590_v40 }
  0x7b   :  { %706 = vmatpush.msra.mxu0 %v3537_v19 }
  0x7c   :  { %461 = vmatpush.msra.mxu1 %v3598_v43 }
  0x7d   :  { %707 = vmatpush.msra.mxu0 %v3546_v24 }
  0x7e   :  { %462 = vmatpush.msra.mxu1 %v3606_v45 }
  0x7f   :  { %708 = vmatpush.msra.mxu0 %v3554_v28 }
  0x81   :  { %709 = vmatpush.msra.mxu0 %v3565_v32 }
  0x83   :  { %710 = vmatpush.msra.mxu0 %v3572_v34 }
  0x85   :  { %711 = vmatpush.msra.mxu0 %v3580_v37 }
  0x87   :  { %712 = vmatpush.msra.mxu0 %v3588_v39 }
  0x89   :  { %713 = vmatpush.msra.mxu0 %v3594_v41 }
  0x8b   :  { %714 = vmatpush.msra.mxu0 %v3602_v44 }
  0x8d   :  { %715 = vmatpush.msra.mxu0 %v3610_v46 }
  0x8f   :  { %716 = vmatpush.msra.mxu0 %v3616_v47 }
  0x91   :  { %717 = vmatpush.msra.mxu0 %v3621_v48 }
  0x93   :  { %718 = vmatpush.msra.mxu0 %v3626_v49 }
  0x95   :  { %719 = vmatpush.msra.mxu0 %v3631_v50 }
  0xbc   :  { %v233_v52 = vpop.f32.mrf.mxu1 }
  0xbd   :  { %v234_v53 = vadd.f32 %v2756_v51, %v233_v52 }
  0xbf   :  { %vm239_vm1 = vcmp.gt.f32.partialorder %v234_v53, 0.0  ;;  %v241_v54 = vmul.f32 0.01, %v234_v53 }
  0xc1   :  { %v243_v56 = vsel %vm239_vm1, %v234_v53, %v241_v54 }
  0xc2   :  { %245 = vst [vmem:[#allocation2] sm:$0xff] %v243_v56  ;;  %373 = vmatmul.f32.vlgmr.msrb.gmra.mxu1 %v243_v56  ;;  %396 = vmatmul.f32.vlgmr.msra.gmra.mxu2 %v243_v56 }
  0xc3   :  { %419 = vmatmul.f32.vlgmr.msra.gmra.mxu3 %v243_v56  ;;  %578 = vmatpush.msrb.mxu1 %v3519_v8  ;;  %v352_v56 = vperm.slane %v3746_v1, 1 }
  0xc4   :  { %v236_v57 = vpop.f32.mrf.mxu1  ;;  %664 = vmatpush.msra.mxu2 %v3461_v11  ;;  %684 = vmatpush.msra.mxu3 %v3493_v55 }
  0xc5   :  { %v237_v60 = vadd.f32 %v2756_v51, %v236_v57  ;;  %579 = vmatpush.msrb.mxu1 %v3528_v13 }
  0xc6   :  { %665 = vmatpush.msra.mxu2 %v3464_v15  ;;  %685 = vmatpush.msra.mxu3 %v3498_v59 }
  0xc7   :  { %vm240_vm2 = vcmp.gt.f32.partialorder %v237_v60, 0.0  ;;  %v242_v61 = vmul.f32 0.01, %v237_v60  ;;  %580 = vmatpush.msrb.mxu1 %v3537_v19 }
  0xc8   :  { %666 = vmatpush.msra.mxu2 %v3467_v18  ;;  %686 = vmatpush.msra.mxu3 %v3504_v63 }
  0xc9   :  { %v244_v0 = vsel %vm240_vm2, %v237_v60, %v242_v61  ;;  %581 = vmatpush.msrb.mxu1 %v3546_v24 }
  0xca   :  { %246 = vst [vmem:[#allocation2 + $0x8] sm:$0xff] %v244_v0  ;;  %376 = vmatmul.f32.gmra.mxu1 %v244_v0  ;;  %399 = vmatmul.f32.gmra.mxu2 %v244_v0 }
  0xcb   :  { %422 = vmatmul.f32.gmra.mxu3 %v244_v0  ;;  %582 = vmatpush.msrb.mxu1 %v3554_v28 }
  0xcc   :  { %667 = vmatpush.msra.mxu2 %v3469_v20  ;;  %687 = vmatpush.msra.mxu3 %v3510_v3 }
  0xcd   :  { %583 = vmatpush.msrb.mxu1 %v3565_v32 }
  0xce   :  { %668 = vmatpush.msra.mxu2 %v3476_v26  ;;  %688 = vmatpush.msra.mxu3 %v3516_v7 }
  0xcf   :  { %584 = vmatpush.msrb.mxu1 %v3572_v34 }
  0xd0   :  { %669 = vmatpush.msra.mxu2 %v3479_v31  ;;  %689 = vmatpush.msra.mxu3 %v3525_v12 }
  0xd1   :  { %585 = vmatpush.msrb.mxu1 %v3580_v37 }
  0xd2   :  { %463 = vmatmul.f32.vlgmr.msra.gmra.mxu1 %v3559_v29  ;;  %483 = vmatmul.f32.vlgmr.msrb.gmra.mxu2 %v3559_v29 }
  0xd3   :  { %586 = vmatpush.msrb.mxu1 %v3588_v39  ;;  %670 = vmatpush.msra.mxu2 %v3482_v35  ;;  %v444_v9 = vpop.f32.mrf.mxu0 }
  0xd4   :  { %690 = vmatpush.msra.mxu3 %v3534_v17 }
  0xd5   :  { %587 = vmatpush.msrb.mxu1 %v3594_v41  ;;  %671 = vmatpush.msra.mxu2 %v3489_v42 }
  0xd6   :  { %691 = vmatpush.msra.mxu3 %v3543_v23 }
  0xd7   :  { %588 = vmatpush.msrb.mxu1 %v3602_v44  ;;  %672 = vmatpush.msra.mxu2 %v3496_v58 }
  0xd8   :  { %692 = vmatpush.msra.mxu3 %v3552_v27 }
  0xd9   :  { %589 = vmatpush.msrb.mxu1 %v3610_v46  ;;  %673 = vmatpush.msra.mxu2 %v3502_v62 }
  0xda   :  { %693 = vmatpush.msra.mxu3 %v3563_v30 }
  0xdb   :  { %590 = vmatpush.msrb.mxu1 %v3616_v47  ;;  %674 = vmatpush.msra.mxu2 %v3508_v2 }
  0xdc   :  { %694 = vmatpush.msra.mxu3 %v3570_v33 }
  0xdd   :  { %591 = vmatpush.msrb.mxu1 %v3621_v48  ;;  %675 = vmatpush.msra.mxu2 %v3514_v6 }
  0xde   :  { %695 = vmatpush.msra.mxu3 %v3578_v36 }
  0xdf   :  { %592 = vmatpush.msrb.mxu1 %v3626_v49  ;;  %676 = vmatpush.msra.mxu2 %v3523_v10 }
  0xe0   :  { %696 = vmatpush.msra.mxu3 %v3586_v38 }
  0xe1   :  { %593 = vmatpush.msrb.mxu1 %v3631_v50  ;;  %677 = vmatpush.msra.mxu2 %v3532_v16 }
  0xe2   :  { %697 = vmatpush.msra.mxu3 %v3590_v40 }
  0xe3   :  { %789 = vmatpush.msra.mxu1 %v3461_v11  ;;  %678 = vmatpush.msra.mxu2 %v3541_v22 }
  0xe4   :  { %698 = vmatpush.msra.mxu3 %v3598_v43 }
  0xe5   :  { %790 = vmatpush.msra.mxu1 %v3464_v15  ;;  %679 = vmatpush.msra.mxu2 %v3550_v25 }
  0xe6   :  { %699 = vmatpush.msra.mxu3 %v3606_v45 }
  0xe7   :  { %791 = vmatpush.msra.mxu1 %v3467_v18  ;;  %809 = vmatpush.msrb.mxu2 %v3493_v55 }
  0xe9   :  { %792 = vmatpush.msra.mxu1 %v3469_v20  ;;  %810 = vmatpush.msrb.mxu2 %v3498_v59 }
  0xeb   :  { %793 = vmatpush.msra.mxu1 %v3476_v26  ;;  %811 = vmatpush.msrb.mxu2 %v3504_v63 }
  0xed   :  { %794 = vmatpush.msra.mxu1 %v3479_v31  ;;  %812 = vmatpush.msrb.mxu2 %v3510_v3 }
  0xef   :  { %795 = vmatpush.msra.mxu1 %v3482_v35  ;;  %813 = vmatpush.msrb.mxu2 %v3516_v7 }
  0xf1   :  { %796 = vmatpush.msra.mxu1 %v3489_v42  ;;  %814 = vmatpush.msrb.mxu2 %v3525_v12 }
  0xf3   :  { %797 = vmatpush.msra.mxu1 %v3496_v58  ;;  %815 = vmatpush.msrb.mxu2 %v3534_v17 }
  0xf5   :  { %798 = vmatpush.msra.mxu1 %v3502_v62  ;;  %816 = vmatpush.msrb.mxu2 %v3543_v23 }
  0xf7   :  { %799 = vmatpush.msra.mxu1 %v3508_v2  ;;  %817 = vmatpush.msrb.mxu2 %v3552_v27 }
  0xf9   :  { %800 = vmatpush.msra.mxu1 %v3514_v6  ;;  %818 = vmatpush.msrb.mxu2 %v3563_v30 }
  0xfb   :  { %801 = vmatpush.msra.mxu1 %v3523_v10  ;;  %819 = vmatpush.msrb.mxu2 %v3570_v33 }
  0xfd   :  { %802 = vmatpush.msra.mxu1 %v3532_v16  ;;  %820 = vmatpush.msrb.mxu2 %v3578_v36 }
  0xff   :  { %803 = vmatpush.msra.mxu1 %v3541_v22  ;;  %821 = vmatpush.msrb.mxu2 %v3586_v38 }
 0x101   :  { %804 = vmatpush.msra.mxu1 %v3550_v25  ;;  %822 = vmatpush.msrb.mxu2 %v3590_v40 }
 0x103   :  { %823 = vmatpush.msrb.mxu2 %v3598_v43 }
 0x105   :  { %824 = vmatpush.msrb.mxu2 %v3606_v45 }
 0x13f   :  { %v374_v5 = vpop.f32.mrf.mxu1 }
 0x140   :  { %v3749_v14 = vadd.f32 %v374_v5, %v351_v4 }
 0x142   :  { %4910 = vst [vmem:[#allocation38_spill] sm:$0xff] %v3749_v14  ;;  %v487_v21 = vadd.f32 %v444_v9, %v3749_v14 }
 0x144   :  { %v2703_v51 = vmul.f32 -1.442695, %v487_v21 }
 0x145   :  { %v397_v52 = vpop.f32.mrf.mxu2 }
 0x146   :  { %2761 = vpow2.f32 %v2703_v51  ;;  %v3755_v0 = vadd.f32 %v397_v52, %v352_v56  ;;  %v420_v50 = vpop.f32.mrf.mxu3 }
 0x147   :  { %v377_v53 = vpop.f32.mrf.mxu1 }
 0x148   :  { %v3752_v54 = vadd.f32 %v377_v53, %v351_v4  ;;  %4912 = vst [vmem:[#allocation40_spill] sm:$0xff] %v3755_v0  ;;  %v3763_v4 = vld [vmem:[%s4856_s6] ss:$0 sm:$0xff] }
 0x149   :  { %4914 = vst [vmem:[#allocation42_spill] sm:$0xff] %v3763_v4 }
 0x14a   :  { %4911 = vst [vmem:[#allocation39_spill] sm:$0xff] %v3752_v54 }
 0x14c   :  { %v2762_v57 = vpop.eup %2761 }
 0x14d   :  { %v495_v60 = vadd.f32 1.0, %v2762_v57  ;;  %v400_v61 = vpop.f32.mrf.mxu2 }
 0x14e   :  { %v3757_v45 = vadd.f32 %v400_v61, %v352_v56 }
 0x14f   :  { %2763 = vrcp.f32 %v495_v60  ;;  %v464_v5 = vpop.f32.mrf.mxu1  ;;  %v508_v53 = vand.u32 2147483648, %v495_v60  ;;  %v506_v56 = vand.u32 2147483647, %v495_v60  ;;  %vm502_vm4 = vweird.f32 %v495_v60 }
 0x150   :  { %4913 = vst [vmem:[#allocation41_spill] sm:$0xff] %v3757_v45  ;;  %v488_v25 = vadd.f32 %v464_v5, %v3755_v0 }
 0x151   :  { %vm507_vm6 = vcmp.eq.f32.partialorder %v506_v56, 8.507059e+37 }
 0x152   :  { %v2704_v9 = vmul.f32 -1.442695, %v488_v25  ;;  %v509_v25 = vor.u32 1.1754944e-38, %v508_v53 }
 0x154   :  { %2765 = vpow2.f32 %v2704_v9 }
 0x155   :  { %v2764_v21 = vpop.eup %2763  ;;  %v484_v52 = vpop.f32.mrf.mxu2 }
 0x156   :  { %v498_v51 = vmul.f32 %v2764_v21, %v495_v60  ;;  %vm503_vm3 = vweird.f32 %v2764_v21  ;;  %v527_v5 = vadd.f32 %v3763_v4, %v484_v52 }
 0x157   :  { %vm504_vm5 = vmor %vm502_vm4, %vm503_vm3 }
 0x158   :  { %v499_v14 = vsub.f32 1.0, %v498_v51  ;;  %v4882_v51 = vperm.slane %v3746_v1, 2 }
 0x15a   :  { %v2766_v57 = vpop.eup %2765  ;;  %v500_v54 = vmul.f32 %v2764_v21, %v499_v14  ;;  %v3769_v14 = vadd.f32 %v420_v50, %v4882_v51 }
 0x15b   :  { %v496_v61 = vadd.f32 1.0, %v2766_v57 }
 0x15c   :  { %v501_v45 = vadd.f32 %v2764_v21, %v500_v54 }
 0x15d   :  { %2767 = vrcp.f32 %v496_v61  ;;  %v523_v49 = vand.u32 2147483648, %v496_v61  ;;  %v521_v52 = vand.u32 2147483647, %v496_v61  ;;  %vm517_vm8 = vweird.f32 %v496_v61 }
 0x15e   :  { %v505_v9 = vsel %vm504_vm5, %v2764_v21, %v501_v45 }
 0x15f   :  { %v510_v0 = vsel %vm507_vm6, %v509_v25, %v505_v9  ;;  %v524_v21 = vor.u32 1.1754944e-38, %v523_v49  ;;  %vm522_vm10 = vcmp.eq.f32.partialorder %v521_v52, 8.507059e+37 }
 0x160   :  { %v528_v43 = vmul.f32 %v527_v5, %v510_v0 }
 0x162   :  { %v529_v54 = vadd.f32 %v528_v43, %v3769_v14  ;;  %v535_v43 = vld [vmem:[#allocation2] sm:$0x3] }
 0x163   :  { %v2768_v22 = vpop.eup %2767 }
 0x164   :  { %v513_v57 = vmul.f32 %v2768_v22, %v496_v61  ;;  %vm518_vm7 = vweird.f32 %v2768_v22  ;;  %2769 = vtanh.f32 %v529_v54  ;;  %v4922_v61 = vld [vmem:[#allocation40_spill] sm:$0xff] }
 0x165   :  { %vm519_vm9 = vmor %vm517_vm8, %vm518_vm7 }
 0x166   :  { %v514_v60 = vsub.f32 1.0, %v513_v57 }
 0x168   :  { %v515_v53 = vmul.f32 %v2768_v22, %v514_v60 }
 0x16a   :  { %v516_v45 = vadd.f32 %v2768_v22, %v515_v53  ;;  %v2770_v5 = vpop.eup %2769 }
 0x16c   :  { %v520_v0 = vsel %vm519_vm9, %v2768_v22, %v516_v45  ;;  %v3827_v22 = vpop.f32.mrf.mxu3  ;;  %v4923_v45 = vld [vmem:[#allocation38_spill] sm:$0xff] }
 0x16d   :  { %v525_v56 = vsel %vm522_vm10, %v524_v21, %v520_v0 }
 0x16e   :  { %v531_v25 = vsub.f32 1.0, %v525_v56  ;;  %v533_v9 = vmul.f32 %v525_v56, %v3559_v29 }
 0x170   :  { %v532_v50 = vmul.f32 %v2770_v5, %v531_v25 }
 0x172   :  { %v3773_v51 = vadd.f32 %v533_v9, %v532_v50 }
 0x174   :  { %v536_v57 = vadd.f32 %v535_v43, %v3773_v51  ;;  %554 = vmatmul.f32.vlgmr.msrb.gmra.mxu3 %v3773_v51  ;;  %574 = vmatmul.f32.vlgmr.msrb.gmra.mxu0 %v3773_v51 }
 0x175   :  { %594 = vmatmul.f32.vlgmr.msrb.gmra.mxu1 %v3773_v51  ;;  %829 = vmatpush.msrb.mxu3 %v3519_v8 }
 0x176   :  { %537 = vst [vmem:[#allocation2] sm:$0x3] %v536_v57  ;;  %914 = vmatpush.msrb.mxu0 %v3461_v11  ;;  %934 = vmatpush.msrb.mxu1 %v3493_v55  ;;  %v4915_v11 = vld [vmem:[#allocation35_spill] sm:$0xff] }
 0x177   :  { %830 = vmatpush.msrb.mxu3 %v3528_v13  ;;  %4921 = vst [vmem:[#allocation35_spill] sm:$0xff] %v3827_v22 }
 0x178   :  { %915 = vmatpush.msrb.mxu0 %v3464_v15  ;;  %935 = vmatpush.msrb.mxu1 %v3498_v59  ;;  %v4916_v15 = vld [vmem:[#allocation31_spill] sm:$0xff] }
 0x179   :  { %831 = vmatpush.msrb.mxu3 %v3537_v19 }
 0x17a   :  { %916 = vmatpush.msrb.mxu0 %v3467_v18  ;;  %936 = vmatpush.msrb.mxu1 %v3504_v63  ;;  %v4917_v18 = vld [vmem:[#allocation33_spill] sm:$0xff] }
 0x17b   :  { %832 = vmatpush.msrb.mxu3 %v3546_v24 }
 0x17c   :  { %917 = vmatpush.msrb.mxu0 %v3469_v20  ;;  %937 = vmatpush.msrb.mxu1 %v3510_v3  ;;  %v4918_v20 = vld [vmem:[#allocation36_spill] sm:$0xff] }
 0x17d   :  { %833 = vmatpush.msrb.mxu3 %v3554_v28 }
 0x17e   :  { %918 = vmatpush.msrb.mxu0 %v3476_v26  ;;  %938 = vmatpush.msrb.mxu1 %v3516_v7  ;;  %v4919_v26 = vld [vmem:[#allocation32_spill] sm:$0xff] }
 0x17f   :  { %834 = vmatpush.msrb.mxu3 %v3565_v32 }
 0x180   :  { %919 = vmatpush.msrb.mxu0 %v3479_v31  ;;  %939 = vmatpush.msrb.mxu1 %v3525_v12  ;;  %v4920_v31 = vld [vmem:[#allocation34_spill] sm:$0xff] }
 0x181   :  { %835 = vmatpush.msrb.mxu3 %v3572_v34 }
 0x182   :  { %920 = vmatpush.msrb.mxu0 %v3482_v35  ;;  %940 = vmatpush.msrb.mxu1 %v3534_v17 }
 0x183   :  { %836 = vmatpush.msrb.mxu3 %v3580_v37 }
 0x184   :  { %921 = vmatpush.msrb.mxu0 %v3489_v42  ;;  %941 = vmatpush.msrb.mxu1 %v3543_v23 }
 0x185   :  { %837 = vmatpush.msrb.mxu3 %v3588_v39 }
 0x186   :  { %922 = vmatpush.msrb.mxu0 %v3496_v58  ;;  %942 = vmatpush.msrb.mxu1 %v3552_v27 }
 0x187   :  { %838 = vmatpush.msrb.mxu3 %v3594_v41 }
 0x188   :  { %923 = vmatpush.msrb.mxu0 %v3502_v62  ;;  %943 = vmatpush.msrb.mxu1 %v3563_v30 }
 0x189   :  { %839 = vmatpush.msrb.mxu3 %v3602_v44 }
 0x18a   :  { %924 = vmatpush.msrb.mxu0 %v3508_v2  ;;  %944 = vmatpush.msrb.mxu1 %v3570_v33 }
 0x18b   :  { %840 = vmatpush.msrb.mxu3 %v3610_v46 }
 0x18c   :  { %925 = vmatpush.msrb.mxu0 %v3514_v6  ;;  %945 = vmatpush.msrb.mxu1 %v3578_v36 }
 0x18d   :  { %841 = vmatpush.msrb.mxu3 %v3616_v47 }
 0x18e   :  { %926 = vmatpush.msrb.mxu0 %v3523_v10  ;;  %946 = vmatpush.msrb.mxu1 %v3586_v38 }
 0x18f   :  { %842 = vmatpush.msrb.mxu3 %v3621_v48 }
 0x190   :  { %927 = vmatpush.msrb.mxu0 %v3532_v16  ;;  %947 = vmatpush.msrb.mxu1 %v3590_v40 }
 0x191   :  { %843 = vmatpush.msrb.mxu3 %v4915_v11 }
 0x192   :  { %928 = vmatpush.msrb.mxu0 %v4916_v15  ;;  %948 = vmatpush.msrb.mxu1 %v4917_v18 }
 0x193   :  { %844 = vmatpush.msrb.mxu3 %v4918_v20 }
 0x194   :  { %929 = vmatpush.msrb.mxu0 %v4919_v26  ;;  %949 = vmatpush.msrb.mxu1 %v4920_v31 }
 0x1f1   :  { %v575_v29 = vpop.f32.mrf.mxu0 }
 0x1f2   :  { %v601_v49 = vrot.slane %v575_v29, 6 }
 0x1f4   :  { %v605_v54 = vadd.f32 %v601_v49, %v4922_v61  ;;  %v595_v49 = vpop.f32.mrf.mxu1 }
 0x1f6   :  { %v2706_v60 = vmul.f32 -1.442695, %v605_v54 }
 0x1f7   :  { %v555_v53 = vpop.f32.mrf.mxu3 }
 0x1f8   :  { %2771 = vpow2.f32 %v2706_v60  ;;  %v600_v52 = vrot.slane %v555_v53, 6  ;;  %v644_v60 = vadd.f32 %v3763_v4, %v595_v49 }
 0x1fa   :  { %v604_v21 = vadd.f32 %v600_v52, %v4923_v45 }
 0x1fc   :  { %v2705_v0 = vmul.f32 -1.442695, %v604_v21 }
 0x1fe   :  { %v2772_v56 = vpop.eup %2771  ;;  %2773 = vpow2.f32 %v2705_v0 }
 0x1ff   :  { %v613_v25 = vadd.f32 1.0, %v2772_v56 }
 0x201   :  { %2775 = vrcp.f32 %v613_v25  ;;  %vm634_vm0 = vweird.f32 %v613_v25 }
 0x204   :  { %v2774_v5 = vpop.eup %2773 }
 0x205   :  { %v612_v50 = vadd.f32 1.0, %v2774_v5  ;;  %v646_v5 = vrot.slane %v644_v60, 6 }
 0x207   :  { %2777 = vrcp.f32 %v612_v50  ;;  %v2776_v9 = vpop.eup %2775  ;;  %v625_v1 = vand.u32 2147483648, %v612_v50  ;;  %v623_v52 = vand.u32 2147483647, %v612_v50  ;;  %vm619_vm12 = vweird.f32 %v612_v50 }
 0x208   :  { %v630_v43 = vmul.f32 %v2776_v9, %v613_v25  ;;  %vm635_vm15 = vweird.f32 %v2776_v9 }
 0x209   :  { %v626_v56 = vor.u32 1.1754944e-38, %v625_v1  ;;  %vm624_vm14 = vcmp.eq.f32.partialorder %v623_v52, 8.507059e+37  ;;  %vm636_vm1 = vmor %vm634_vm0, %vm635_vm15  ;;  %v654_v1 = vrot.slane %v3773_v51, 6  ;;  %v658_v52 = vld [vmem:[#allocation2 + $0x2] sm:$0x3]  ;;  %v3848_v51 = vld [vmem:[#allocation9 + $0x138] sm:$0xff] }
 0x20a   :  { %v631_v22 = vsub.f32 1.0, %v630_v43  ;;  %v640_v43 = vand.u32 2147483648, %v613_v25 }
 0x20c   :  { %v632_v21 = vmul.f32 %v2776_v9, %v631_v22  ;;  %v641_v4 = vor.u32 1.1754944e-38, %v640_v43 }
 0x20d   :  { %v2778_v57 = vpop.eup %2777 }
 0x20e   :  { %v615_v29 = vmul.f32 %v2778_v57, %v612_v50  ;;  %vm620_vm11 = vweird.f32 %v2778_v57  ;;  %v633_v31 = vadd.f32 %v2776_v9, %v632_v21 }
 0x20f   :  { %vm621_vm13 = vmor %vm619_vm12, %vm620_vm11 }
 0x210   :  { %v616_v54 = vsub.f32 1.0, %v615_v29  ;;  %v638_v29 = vand.u32 2147483647, %v613_v25 }
 0x212   :  { %v617_v53 = vmul.f32 %v2778_v57, %v616_v54  ;;  %v637_v54 = vsel %vm636_vm1, %v2776_v9, %v633_v31  ;;  %vm639_vm2 = vcmp.eq.f32.partialorder %v638_v29, 8.507059e+37 }
 0x213   :  { %v642_v22 = vsel %vm639_vm2, %v641_v4, %v637_v54  ;;  %v3843_v4 = vld [vmem:[#allocation9 + $0x150] sm:$0xff] }
 0x214   :  { %v618_v0 = vadd.f32 %v2778_v57, %v617_v53  ;;  %v651_v50 = vsub.f32 1.0, %v642_v22 }
 0x216   :  { %v622_v61 = vsel %vm621_vm13, %v2778_v57, %v618_v0 }
 0x217   :  { %v627_v45 = vsel %vm624_vm14, %v626_v56, %v622_v61  ;;  %v656_v61 = vmul.f32 %v654_v1, %v642_v22 }
 0x218   :  { %v648_v26 = vmul.f32 %v646_v5, %v627_v45 }
 0x21a   :  { %v649_v49 = vadd.f32 %v648_v26, %v3769_v14  ;;  %v3838_v26 = vld [vmem:[#allocation9 + $0x168] sm:$0xff] }
 0x21c   :  { %2779 = vtanh.f32 %v649_v49  ;;  %v4928_v49 = vld [vmem:[#allocation42_spill] sm:$0xff] }
 0x222   :  { %v2780_v57 = vpop.eup %2779 }
 0x223   :  { %v652_v60 = vmul.f32 %v2780_v57, %v651_v50 }
 0x225   :  { %v3834_v53 = vadd.f32 %v656_v61, %v652_v60 }
 0x227   :  { %v660_v45 = vrot.slane %v3834_v53, 2 }
 0x229   :  { %v662_v25 = vadd.f32 %v660_v45, %v658_v52  ;;  %680 = vmatmul.f32.vlgmr.msra.gmra.mxu2 %v660_v45  ;;  %700 = vmatmul.f32.vlgmr.msra.gmra.mxu3 %v660_v45 }
 0x22a   :  { %720 = vmatmul.f32.vlgmr.msra.gmra.mxu0 %v660_v45  ;;  %954 = vmatpush.msra.mxu2 %v3519_v8  ;;  %v3853_v8 = vld [vmem:[#allocation9 + $0x120] sm:$0xff] }
 0x22b   :  { %663 = vst [vmem:[#allocation2 + $0x2] sm:$0x3] %v662_v25  ;;  %1025 = vmatpush.msra.mxu3 %v3838_v26  ;;  %1045 = vmatpush.msra.mxu0 %v3493_v55  ;;  %v3858_v55 = vld [vmem:[#allocation9 + $0x108] sm:$0xff] }
 0x22c   :  { %955 = vmatpush.msra.mxu2 %v3528_v13 }
 0x22d   :  { %1026 = vmatpush.msra.mxu3 %v3843_v4  ;;  %1046 = vmatpush.msra.mxu0 %v3498_v59  ;;  %v3863_v59 = vld [vmem:[#allocation9 + $0xf0] sm:$0xff] }
 0x22e   :  { %956 = vmatpush.msra.mxu2 %v3537_v19 }
 0x22f   :  { %1027 = vmatpush.msra.mxu3 %v3848_v51  ;;  %1047 = vmatpush.msra.mxu0 %v3504_v63 }
 0x230   :  { %957 = vmatpush.msra.mxu2 %v3546_v24 }
 0x231   :  { %1028 = vmatpush.msra.mxu3 %v3853_v8  ;;  %1048 = vmatpush.msra.mxu0 %v3510_v3  ;;  %v4926_v3 = vld [vmem:[#allocation38_spill] sm:$0xff] }
 0x232   :  { %958 = vmatpush.msra.mxu2 %v3554_v28 }
 0x233   :  { %1029 = vmatpush.msra.mxu3 %v3858_v55  ;;  %1049 = vmatpush.msra.mxu0 %v3516_v7  ;;  %v4927_v7 = vld [vmem:[#allocation40_spill] sm:$0xff] }
 0x234   :  { %959 = vmatpush.msra.mxu2 %v3565_v32 }
 0x235   :  { %1030 = vmatpush.msra.mxu3 %v3863_v59  ;;  %1050 = vmatpush.msra.mxu0 %v3525_v12 }
 0x236   :  { %960 = vmatpush.msra.mxu2 %v3572_v34 }
 0x237   :  { %1031 = vmatpush.msra.mxu3 %v3482_v35  ;;  %1051 = vmatpush.msra.mxu0 %v3534_v17  ;;  %v4924_v35 = vld [vmem:[#allocation32_spill] sm:$0xff] }
 0x238   :  { %961 = vmatpush.msra.mxu2 %v3580_v37 }
 0x239   :  { %1032 = vmatpush.msra.mxu3 %v3489_v42  ;;  %1052 = vmatpush.msra.mxu0 %v3543_v23  ;;  %v4925_v42 = vld [vmem:[#allocation34_spill] sm:$0xff] }
 0x23a   :  { %962 = vmatpush.msra.mxu2 %v3588_v39 }
 0x23b   :  { %1033 = vmatpush.msra.mxu3 %v3496_v58  ;;  %1053 = vmatpush.msra.mxu0 %v3552_v27 }
 0x23c   :  { %963 = vmatpush.msra.mxu2 %v3594_v41 }
 0x23d   :  { %1034 = vmatpush.msra.mxu3 %v3502_v62  ;;  %1054 = vmatpush.msra.mxu0 %v3563_v30 }
 0x23e   :  { %964 = vmatpush.msra.mxu2 %v3602_v44 }
 0x23f   :  { %1035 = vmatpush.msra.mxu3 %v3508_v2  ;;  %1055 = vmatpush.msra.mxu0 %v3570_v33 }
 0x240   :  { %965 = vmatpush.msra.mxu2 %v3610_v46 }
 0x241   :  { %1036 = vmatpush.msra.mxu3 %v3514_v6  ;;  %1056 = vmatpush.msra.mxu0 %v3578_v36 }
 0x242   :  { %966 = vmatpush.msra.mxu2 %v3616_v47 }
 0x243   :  { %1037 = vmatpush.msra.mxu3 %v3523_v10  ;;  %1057 = vmatpush.msra.mxu0 %v3586_v38 }
 0x244   :  { %967 = vmatpush.msra.mxu2 %v3621_v48 }
 0x245   :  { %1038 = vmatpush.msra.mxu3 %v3532_v16  ;;  %1058 = vmatpush.msra.mxu0 %v3590_v40 }
 0x246   :  { %968 = vmatpush.msra.mxu2 %v4915_v11 }
 0x247   :  { %1039 = vmatpush.msra.mxu3 %v4916_v15  ;;  %1059 = vmatpush.msra.mxu0 %v4917_v18 }
 0x248   :  { %969 = vmatpush.msra.mxu2 %v4918_v20 }
 0x249   :  { %1040 = vmatpush.msra.mxu3 %v4924_v35  ;;  %1060 = vmatpush.msra.mxu0 %v4925_v42 }
 0x2a7   :  { %v721_v0 = vpop.f32.mrf.mxu0 }
 0x2a8   :  { %v770_v54 = vadd.f32 %v4928_v49, %v721_v0  ;;  %v783_v0 = vld [vmem:[#allocation2 + $0x4] sm:$0x3] }
 0x2aa   :  { %v772_v61 = vrot.slane %v770_v54, 4  ;;  %v3955_v54 = vld [vmem:[#allocation9 + $0xb0] sm:$0xff] }
 0x2ac   :  { %v681_v58 = vpop.f32.mrf.mxu2  ;;  %v701_v62 = vpop.f32.mrf.mxu3 }
 0x2ad   :  { %v726_v63 = vrot.slane %v681_v58, 4  ;;  %v727_v2 = vrot.slane %v701_v62, 4 }
 0x2af   :  { %v730_v6 = vadd.f32 %v726_v63, %v4926_v3  ;;  %v731_v10 = vadd.f32 %v727_v2, %v4927_v7 }
 0x2b1   :  { %v2707_v12 = vmul.f32 -1.442695, %v730_v6  ;;  %v2708_v16 = vmul.f32 -1.442695, %v731_v10 }
 0x2b3   :  { %2781 = vpow2.f32 %v2707_v12  ;;  %v779_v12 = vrot.slane %v3834_v53, 6  ;;  %v3909_v53 = vld [vmem:[#allocation9 + $0x170] sm:$0xff] }
 0x2b4   :  { %2783 = vpow2.f32 %v2708_v16 }
 0x2b9   :  { %v2782_v17 = vpop.eup %2781 }
 0x2ba   :  { %v2784_v23 = vpop.eup %2783  ;;  %v738_v27 = vadd.f32 1.0, %v2782_v17 }
 0x2bb   :  { %v739_v15 = vadd.f32 1.0, %v2784_v23 }
 0x2bc   :  { %2785 = vrcp.f32 %v738_v27  ;;  %v751_v43 = vand.u32 2147483648, %v738_v27  ;;  %v749_v50 = vand.u32 2147483647, %v738_v27  ;;  %vm745_vm4 = vweird.f32 %v738_v27 }
 0x2bd   :  { %2787 = vrcp.f32 %v739_v15  ;;  %v766_v35 = vand.u32 2147483648, %v739_v15  ;;  %vm760_vm8 = vweird.f32 %v739_v15  ;;  %v764_v62 = vand.u32 2147483647, %v739_v15 }
 0x2be   :  { %v752_v60 = vor.u32 1.1754944e-38, %v751_v43  ;;  %vm750_vm6 = vcmp.eq.f32.partialorder %v749_v50, 8.507059e+37  ;;  %v3924_v43 = vld [vmem:[#allocation9 + $0x128] sm:$0xff] }
 0x2bf   :  { %v767_v6 = vor.u32 1.1754944e-38, %v766_v35  ;;  %vm765_vm10 = vcmp.eq.f32.partialorder %v764_v62, 8.507059e+37 }
 0x2c2   :  { %v2786_v31 = vpop.eup %2785 }
 0x2c3   :  { %v2788_v9 = vpop.eup %2787  ;;  %v741_v21 = vmul.f32 %v2786_v31, %v738_v27  ;;  %vm746_vm3 = vweird.f32 %v2786_v31 }
 0x2c4   :  { %v756_v56 = vmul.f32 %v2788_v9, %v739_v15  ;;  %vm747_vm5 = vmor %vm745_vm4, %vm746_vm3  ;;  %vm761_vm7 = vweird.f32 %v2788_v9 }
 0x2c5   :  { %v742_v5 = vsub.f32 1.0, %v741_v21  ;;  %vm762_vm9 = vmor %vm760_vm8, %vm761_vm7 }
 0x2c6   :  { %v757_v29 = vsub.f32 1.0, %v756_v56  ;;  %v3914_v56 = vld [vmem:[#allocation9 + $0x158] sm:$0xff] }
 0x2c7   :  { %v743_v22 = vmul.f32 %v2786_v31, %v742_v5  ;;  %v3919_v5 = vld [vmem:[#allocation9 + $0x140] sm:$0xff] }
 0x2c8   :  { %v758_v1 = vmul.f32 %v2788_v9, %v757_v29  ;;  %v3945_v29 = vld [vmem:[#allocation9 + $0xc0] sm:$0xff] }
 0x2c9   :  { %v744_v57 = vadd.f32 %v2786_v31, %v743_v22  ;;  %v3964_v22 = vld [vmem:[#allocation9 + $0x78] sm:$0xff] }
 0x2ca   :  { %v759_v25 = vadd.f32 %v2788_v9, %v758_v1 }
 0x2cb   :  { %v748_v45 = vsel %vm747_vm5, %v2786_v31, %v744_v57 }
 0x2cc   :  { %v753_v52 = vsel %vm750_vm6, %v752_v60, %v748_v45  ;;  %v763_v2 = vsel %vm762_vm9, %v2788_v9, %v759_v25  ;;  %v3905_v9 = vld [vmem:[#allocation9 + $0x178] sm:$0xff] }
 0x2cd   :  { %v774_v58 = vmul.f32 %v772_v61, %v753_v52  ;;  %v768_v10 = vsel %vm765_vm10, %v767_v6, %v763_v2 }
 0x2ce   :  { %v777_v16 = vsub.f32 1.0, %v768_v10  ;;  %v781_v27 = vmul.f32 %v779_v12, %v768_v10 }
 0x2cf   :  { %v775_v63 = vadd.f32 %v774_v58, %v3769_v14 }
 0x2d1   :  { %2789 = vtanh.f32 %v775_v63 }
 0x2d7   :  { %v2790_v17 = vpop.eup %2789 }
 0x2d8   :  { %v778_v23 = vmul.f32 %v2790_v17, %v777_v16 }
 0x2da   :  { %v3902_v31 = vadd.f32 %v781_v27, %v778_v23 }
 0x2dc   :  { %v785_v21 = vrot.slane %v3902_v31, 4 }
 0x2de   :  { %v787_v15 = vadd.f32 %v785_v21, %v783_v0  ;;  %805 = vmatmul.f32.vlgmr.msra.gmra.mxu1 %v785_v21  ;;  %825 = vmatmul.f32.vlgmr.msrb.gmra.mxu2 %v785_v21 }
 0x2df   :  { %845 = vmatmul.f32.vlgmr.msrb.gmra.mxu3 %v785_v21  ;;  %1065 = vmatpush.msra.mxu1 %v3905_v9 }
 0x2e0   :  { %788 = vst [vmem:[#allocation2 + $0x4] sm:$0x3] %v787_v15  ;;  %1151 = vmatpush.msrb.mxu2 %v3838_v26  ;;  %1171 = vmatpush.msrb.mxu3 %v3909_v53 }
 0x2e1   :  { %1066 = vmatpush.msra.mxu1 %v3528_v13  ;;  %v3929_v13 = vld [vmem:[#allocation9 + $0x110] sm:$0xff] }
 0x2e2   :  { %1152 = vmatpush.msrb.mxu2 %v3843_v4  ;;  %1172 = vmatpush.msrb.mxu3 %v3914_v56 }
 0x2e3   :  { %1067 = vmatpush.msra.mxu1 %v3537_v19  ;;  %v3934_v19 = vld [vmem:[#allocation9 + $0xf8] sm:$0xff] }
 0x2e4   :  { %1153 = vmatpush.msrb.mxu2 %v3848_v51  ;;  %1173 = vmatpush.msrb.mxu3 %v3919_v5 }
 0x2e5   :  { %1068 = vmatpush.msra.mxu1 %v3546_v24  ;;  %v3938_v24 = vld [vmem:[#allocation9 + $0xd8] sm:$0xff] }
 0x2e6   :  { %1154 = vmatpush.msrb.mxu2 %v3853_v8  ;;  %1174 = vmatpush.msrb.mxu3 %v3924_v43 }
 0x2e7   :  { %1069 = vmatpush.msra.mxu1 %v3554_v28  ;;  %v3941_v28 = vld [vmem:[#allocation9 + $0xe0] sm:$0xff] }
 0x2e8   :  { %1155 = vmatpush.msrb.mxu2 %v3858_v55  ;;  %1175 = vmatpush.msrb.mxu3 %v3929_v13 }
 0x2e9   :  { %1070 = vmatpush.msra.mxu1 %v3565_v32  ;;  %v3948_v32 = vld [vmem:[#allocation9 + $0xc8] sm:$0xff] }
 0x2ea   :  { %1156 = vmatpush.msrb.mxu2 %v3863_v59  ;;  %1176 = vmatpush.msrb.mxu3 %v3934_v19 }
 0x2eb   :  { %1071 = vmatpush.msra.mxu1 %v3572_v34  ;;  %v3952_v34 = vld [vmem:[#allocation9 + $0xa8] sm:$0xff] }
 0x2ec   :  { %1157 = vmatpush.msrb.mxu2 %v3938_v24  ;;  %1177 = vmatpush.msrb.mxu3 %v3941_v28 }
 0x2ed   :  { %1072 = vmatpush.msra.mxu1 %v3580_v37  ;;  %v3959_v37 = vld [vmem:[#allocation9 + $0x90] sm:$0xff] }
 0x2ee   :  { %1158 = vmatpush.msrb.mxu2 %v3945_v29  ;;  %1178 = vmatpush.msrb.mxu3 %v3948_v32 }
 0x2ef   :  { %1073 = vmatpush.msra.mxu1 %v3588_v39  ;;  %v3969_v39 = vld [vmem:[#allocation9 + $0x60] sm:$0xff] }
 0x2f0   :  { %1159 = vmatpush.msrb.mxu2 %v3952_v34  ;;  %1179 = vmatpush.msrb.mxu3 %v3955_v54 }
 0x2f1   :  { %1074 = vmatpush.msra.mxu1 %v3594_v41  ;;  %v3974_v41 = vld [vmem:[#allocation9 + $0x48] sm:$0xff] }
 0x2f2   :  { %1160 = vmatpush.msrb.mxu2 %v3959_v37  ;;  %1180 = vmatpush.msrb.mxu3 %v3563_v30  ;;  %v3979_v30 = vld [vmem:[#allocation9 + $0x30] sm:$0xff] }
 0x2f3   :  { %1075 = vmatpush.msra.mxu1 %v3602_v44 }
 0x2f4   :  { %1161 = vmatpush.msrb.mxu2 %v3964_v22  ;;  %1181 = vmatpush.msrb.mxu3 %v3570_v33  ;;  %v3984_v33 = vld [vmem:[#allocation9 + $0x18] sm:$0xff] }
 0x2f5   :  { %1076 = vmatpush.msra.mxu1 %v3610_v46 }
 0x2f6   :  { %1162 = vmatpush.msrb.mxu2 %v3969_v39  ;;  %1182 = vmatpush.msrb.mxu3 %v3578_v36  ;;  %v3989_v36 = vld [vmem:[#allocation9] sm:$0xff] }
 0x2f7   :  { %1077 = vmatpush.msra.mxu1 %v3616_v47 }
 0x2f8   :  { %1163 = vmatpush.msrb.mxu2 %v3974_v41  ;;  %1183 = vmatpush.msrb.mxu3 %v3586_v38 }
 0x2f9   :  { %1078 = vmatpush.msra.mxu1 %v3621_v48 }
 0x2fa   :  { %1164 = vmatpush.msrb.mxu2 %v3979_v30  ;;  %1184 = vmatpush.msrb.mxu3 %v3590_v40 }
 0x2fb   :  { %1079 = vmatpush.msra.mxu1 %v4915_v11 }
 0x2fc   :  { %1165 = vmatpush.msrb.mxu2 %v3984_v33  ;;  %1185 = vmatpush.msrb.mxu3 %v4917_v18 }
 0x2fd   :  { %1080 = vmatpush.msra.mxu1 %v4918_v20 }
 0x2fe   :  { %1166 = vmatpush.msrb.mxu2 %v3989_v36  ;;  %1186 = vmatpush.msrb.mxu3 %v4925_v42 }
 0x35b   :  { %v806_v38 = vpop.f32.mrf.mxu1 }
 0x35c   :  { %v851_v44 = vrot.slane %v806_v38, 2 }
 0x35e   :  { %v855_v40 = vadd.f32 %v851_v44, %v4926_v3 }
 0x360   :  { %v2709_v46 = vmul.f32 -1.442695, %v855_v40  ;;  %v904_v40 = vrot.slane %v3902_v31, 6  ;;  %v4012_v31 = vld [vmem:[#allocation9 + $0x148] sm:$0xff] }
 0x361   :  { %v826_v47 = vpop.f32.mrf.mxu2 }
 0x362   :  { %2791 = vpow2.f32 %v2709_v46  ;;  %v852_v48 = vrot.slane %v826_v47, 2  ;;  %v846_v61 = vpop.f32.mrf.mxu3 }
 0x363   :  { %v895_v35 = vadd.f32 %v4928_v49, %v846_v61 }
 0x364   :  { %v856_v11 = vadd.f32 %v852_v48, %v4927_v7 }
 0x365   :  { %v897_v10 = vrot.slane %v895_v35, 2 }
 0x366   :  { %v2710_v50 = vmul.f32 -1.442695, %v856_v11 }
 0x368   :  { %v2792_v18 = vpop.eup %2791  ;;  %2793 = vpow2.f32 %v2710_v50 }
 0x369   :  { %v863_v20 = vadd.f32 1.0, %v2792_v18 }
 0x36b   :  { %2795 = vrcp.f32 %v863_v20  ;;  %v876_v52 = vand.u32 2147483648, %v863_v20  ;;  %v874_v25 = vand.u32 2147483647, %v863_v20  ;;  %vm870_vm12 = vweird.f32 %v863_v20 }
 0x36d   :  { %v877_v63 = vor.u32 1.1754944e-38, %v876_v52  ;;  %vm875_vm14 = vcmp.eq.f32.partialorder %v874_v25, 8.507059e+37 }
 0x36e   :  { %v2794_v1 = vpop.eup %2793 }
 0x36f   :  { %v864_v57 = vadd.f32 1.0, %v2794_v1 }
 0x371   :  { %v2796_v60 = vpop.eup %2795  ;;  %2797 = vrcp.f32 %v864_v57  ;;  %v891_v17 = vand.u32 2147483648, %v864_v57  ;;  %v889_v27 = vand.u32 2147483647, %v864_v57  ;;  %vm885_vm0 = vweird.f32 %v864_v57 }
 0x372   :  { %v866_v42 = vmul.f32 %v2796_v60, %v863_v20  ;;  %vm871_vm11 = vweird.f32 %v2796_v60  ;;  %v908_v20 = vld [vmem:[#allocation2 + $0x6] sm:$0x3] }
 0x373   :  { %vm872_vm13 = vmor %vm870_vm12, %vm871_vm11  ;;  %v892_v15 = vor.u32 1.1754944e-38, %v891_v17  ;;  %vm890_vm2 = vcmp.eq.f32.partialorder %v889_v27, 8.507059e+37 }
 0x374   :  { %v867_v45 = vsub.f32 1.0, %v866_v42 }
 0x376   :  { %v868_v3 = vmul.f32 %v2796_v60, %v867_v45 }
 0x377   :  { %v2798_v58 = vpop.eup %2797 }
 0x378   :  { %v881_v7 = vmul.f32 %v2798_v58, %v864_v57  ;;  %v869_v62 = vadd.f32 %v2796_v60, %v868_v3  ;;  %vm886_vm15 = vweird.f32 %v2798_v58  ;;  %v4017_v57 = vld [vmem:[#allocation9 + $0x130] sm:$0xff] }
 0x379   :  { %vm887_vm1 = vmor %vm885_vm0, %vm886_vm15 }
 0x37a   :  { %v882_v2 = vsub.f32 1.0, %v881_v7  ;;  %v873_v6 = vsel %vm872_vm13, %v2796_v60, %v869_v62  ;;  %v4930_v60 = vld [vmem:[#allocation41_spill] sm:$0xff] }
 0x37b   :  { %v878_v12 = vsel %vm875_vm14, %v877_v63, %v873_v6 }
 0x37c   :  { %v883_v16 = vmul.f32 %v2798_v58, %v882_v2  ;;  %v899_v23 = vmul.f32 %v897_v10, %v878_v12 }
 0x37e   :  { %v884_v21 = vadd.f32 %v2798_v58, %v883_v16  ;;  %v900_v0 = vadd.f32 %v899_v23, %v3769_v14  ;;  %v4007_v14 = vld [vmem:[#allocation9 + $0x160] sm:$0xff] }
 0x380   :  { %v888_v38 = vsel %vm887_vm1, %v2798_v58, %v884_v21  ;;  %2799 = vtanh.f32 %v900_v0 }
 0x381   :  { %v893_v44 = vsel %vm890_vm2, %v892_v15, %v888_v38  ;;  %v4931_v38 = vld [vmem:[#allocation37_spill] sm:$0xff] }
 0x382   :  { %v902_v46 = vsub.f32 1.0, %v893_v44  ;;  %v906_v11 = vmul.f32 %v904_v40, %v893_v44  ;;  %v4932_v44 = vperm.slane %v4931_v38, 2  ;;  %v4933_v40 = vld [vmem:[#allocation35_spill] sm:$0xff] }
 0x386   :  { %v2800_v47 = vpop.eup %2799 }
 0x387   :  { %v903_v48 = vmul.f32 %v2800_v47, %v902_v46  ;;  %v4081_v46 = vadd.f32 %v4933_v40, %v4932_v44 }
 0x389   :  { %v907_v50 = vadd.f32 %v906_v11, %v903_v48 }
 0x38b   :  { %v3998_v18 = vrot.slane %v907_v50, 6 }
 0x38d   :  { %v912_v1 = vadd.f32 %v3998_v18, %v908_v20  ;;  %930 = vmatmul.f32.vlgmr.msrb.gmra.mxu0 %v3998_v18  ;;  %950 = vmatmul.f32.vlgmr.msrb.gmra.mxu1 %v3998_v18 }
 0x38e   :  { %970 = vmatmul.f32.vlgmr.msra.gmra.mxu2 %v3998_v18  ;;  %1191 = vmatpush.msrb.mxu0 %v3905_v9 }
 0x38f   :  { %913 = vst [vmem:[#allocation2 + $0x6] sm:$0x3] %v912_v1  ;;  %1276 = vmatpush.msrb.mxu1 %v3838_v26  ;;  %1296 = vmatpush.msra.mxu2 %v3909_v53  ;;  %v4022_v26 = vld [vmem:[#allocation9 + $0x118] sm:$0xff] }
 0x390   :  { %1192 = vmatpush.msrb.mxu0 %v4007_v14  ;;  %v2956_v53 = vld [vmem:[#allocation9 + $0x98] sm:$0xff] }
 0x391   :  { %1277 = vmatpush.msrb.mxu1 %v3843_v4  ;;  %1297 = vmatpush.msra.mxu2 %v3914_v56  ;;  %v4027_v4 = vld [vmem:[#allocation9 + $0x100] sm:$0xff]  ;;  %v4051_v56 = vld [vmem:[#allocation9 + $0x88] sm:$0xff] }
 0x392   :  { %1193 = vmatpush.msrb.mxu0 %v4012_v31 }
 0x393   :  { %1278 = vmatpush.msrb.mxu1 %v3848_v51  ;;  %1298 = vmatpush.msra.mxu2 %v3919_v5  ;;  %v4032_v51 = vld [vmem:[#allocation9 + $0xe8] sm:$0xff]  ;;  %v2958_v5 = vld [vmem:[#allocation9 + $0x80] sm:$0xff] }
 0x394   :  { %1194 = vmatpush.msrb.mxu0 %v4017_v57 }
 0x395   :  { %1279 = vmatpush.msrb.mxu1 %v3853_v8  ;;  %1299 = vmatpush.msra.mxu2 %v3924_v43  ;;  %v4037_v8 = vld [vmem:[#allocation9 + $0xd0] sm:$0xff] }
 0x396   :  { %1195 = vmatpush.msrb.mxu0 %v4022_v26  ;;  %v4055_v43 = vld [vmem:[#allocation9 + $0x70] sm:$0xff] }
 0x397   :  { %1280 = vmatpush.msrb.mxu1 %v3858_v55  ;;  %1300 = vmatpush.msra.mxu2 %v3929_v13  ;;  %v4042_v55 = vld [vmem:[#allocation9 + $0xb8] sm:$0xff]  ;;  %v2960_v13 = vld [vmem:[#allocation9 + $0x68] sm:$0xff] }
 0x398   :  { %1196 = vmatpush.msrb.mxu0 %v4027_v4 }
 0x399   :  { %1281 = vmatpush.msrb.mxu1 %v3863_v59  ;;  %1301 = vmatpush.msra.mxu2 %v3934_v19  ;;  %v4047_v59 = vld [vmem:[#allocation9 + $0xa0] sm:$0xff]  ;;  %v4059_v19 = vld [vmem:[#allocation9 + $0x58] sm:$0xff] }
 0x39a   :  { %1197 = vmatpush.msrb.mxu0 %v4032_v51 }
 0x39b   :  { %1282 = vmatpush.msrb.mxu1 %v3938_v24  ;;  %1302 = vmatpush.msra.mxu2 %v3941_v28  ;;  %v2962_v24 = vld [vmem:[#allocation9 + $0x50] sm:$0xff]  ;;  %v4063_v28 = vld [vmem:[#allocation9 + $0x40] sm:$0xff] }
 0x39c   :  { %1198 = vmatpush.msrb.mxu0 %v4037_v8 }
 0x39d   :  { %1283 = vmatpush.msrb.mxu1 %v3945_v29  ;;  %1303 = vmatpush.msra.mxu2 %v3948_v32  ;;  %v2964_v29 = vld [vmem:[#allocation9 + $0x38] sm:$0xff]  ;;  %v4067_v32 = vld [vmem:[#allocation9 + $0x28] sm:$0xff] }
 0x39e   :  { %1199 = vmatpush.msrb.mxu0 %v4042_v55 }
 0x39f   :  { %1284 = vmatpush.msrb.mxu1 %v3952_v34  ;;  %1304 = vmatpush.msra.mxu2 %v3955_v54  ;;  %v2966_v34 = vld [vmem:[#allocation9 + $0x20] sm:$0xff]  ;;  %v4071_v54 = vld [vmem:[#allocation9 + $0x10] sm:$0xff] }
 0x3a0   :  { %1200 = vmatpush.msrb.mxu0 %v4047_v59 }
 0x3a1   :  { %1285 = vmatpush.msrb.mxu1 %v3959_v37  ;;  %1305 = vmatpush.msra.mxu2 %v2956_v53  ;;  %v2968_v37 = vld [vmem:[#allocation9 + $0x8] sm:$0xff] }
 0x3a2   :  { %1201 = vmatpush.msrb.mxu0 %v4051_v56 }
 0x3a3   :  { %1286 = vmatpush.msrb.mxu1 %v3964_v22  ;;  %1306 = vmatpush.msra.mxu2 %v2958_v5 }
 0x3a4   :  { %1202 = vmatpush.msrb.mxu0 %v4055_v43 }
 0x3a5   :  { %1287 = vmatpush.msrb.mxu1 %v3969_v39  ;;  %1307 = vmatpush.msra.mxu2 %v2960_v13 }
 0x3a6   :  { %1203 = vmatpush.msrb.mxu0 %v4059_v19 }
 0x3a7   :  { %1288 = vmatpush.msrb.mxu1 %v3974_v41  ;;  %1308 = vmatpush.msra.mxu2 %v2962_v24  ;;  %v4929_v41 = vld [vmem:[#allocation39_spill] sm:$0xff] }
 0x3a8   :  { %1204 = vmatpush.msrb.mxu0 %v4063_v28 }
 0x3a9   :  { %1289 = vmatpush.msrb.mxu1 %v3979_v30  ;;  %1309 = vmatpush.msra.mxu2 %v2964_v29 }
 0x3aa   :  { %1205 = vmatpush.msrb.mxu0 %v4067_v32 }
 0x3ab   :  { %1290 = vmatpush.msrb.mxu1 %v3984_v33  ;;  %1310 = vmatpush.msra.mxu2 %v2966_v34  ;;  %v1022_v34 = vld [vmem:[#allocation2 + $0x8] sm:$0x3] }
 0x3ac   :  { %1206 = vmatpush.msrb.mxu0 %v4071_v54 }
 0x3ad   :  { %1291 = vmatpush.msrb.mxu1 %v3989_v36  ;;  %1311 = vmatpush.msra.mxu2 %v2968_v37 }
 0x40a   :  { %v931_v22 = vpop.f32.mrf.mxu0  ;;  %v951_v39 = vpop.f32.mrf.mxu1 }
 0x40b   :  { %v974_v30 = vadd.f32 %v931_v22, %v4929_v41  ;;  %v975_v42 = vadd.f32 %v951_v39, %v4930_v60  ;;  %v1424_v39 = vld [vmem:[#allocation8 + $0x228] sm:$0xff] }
 0x40d   :  { %v2711_v61 = vmul.f32 -1.442695, %v974_v30  ;;  %v2712_v45 = vmul.f32 -1.442695, %v975_v42  ;;  %v1421_v30 = vld [vmem:[#allocation8 + $0x210] sm:$0xff] }
 0x40f   :  { %2801 = vpow2.f32 %v2711_v61  ;;  %v1418_v61 = vld [vmem:[#allocation8 + $0x1f8] sm:$0xff] }
 0x410   :  { %2803 = vpow2.f32 %v2712_v45 }
 0x411   :  { %v971_v16 = vpop.f32.mrf.mxu2 }
 0x412   :  { %v1014_v21 = vadd.f32 %v4928_v49, %v971_v16 }
 0x415   :  { %v2802_v33 = vpop.eup %2801 }
 0x416   :  { %v2804_v52 = vpop.eup %2803  ;;  %v982_v3 = vadd.f32 1.0, %v2802_v33  ;;  %v1415_v33 = vld [vmem:[#allocation8 + $0x1e0] sm:$0xff] }
 0x417   :  { %v983_v25 = vadd.f32 1.0, %v2804_v52 }
 0x418   :  { %2805 = vrcp.f32 %v982_v3  ;;  %v995_v2 = vand.u32 2147483648, %v982_v3  ;;  %v993_v10 = vand.u32 2147483647, %v982_v3  ;;  %vm989_vm4 = vweird.f32 %v982_v3 }
 0x419   :  { %2807 = vrcp.f32 %v983_v25  ;;  %v1010_v47 = vand.u32 2147483648, %v983_v25  ;;  %vm1004_vm8 = vweird.f32 %v983_v25  ;;  %v1008_v11 = vand.u32 2147483647, %v983_v25 }
 0x41a   :  { %v996_v23 = vor.u32 1.1754944e-38, %v995_v2  ;;  %vm994_vm6 = vcmp.eq.f32.partialorder %v993_v10, 8.507059e+37 }
 0x41b   :  { %v1011_v1 = vor.u32 1.1754944e-38, %v1010_v47  ;;  %vm1009_vm10 = vcmp.eq.f32.partialorder %v1008_v11, 8.507059e+37 }
 0x41e   :  { %v2806_v35 = vpop.eup %2805 }
 0x41f   :  { %v2808_v36 = vpop.eup %2807  ;;  %v985_v58 = vmul.f32 %v2806_v35, %v982_v3  ;;  %vm990_vm3 = vweird.f32 %v2806_v35  ;;  %v1412_v3 = vld [vmem:[#allocation8 + $0x1c8] sm:$0xff] }
 0x420   :  { %v1000_v7 = vmul.f32 %v2808_v36, %v983_v25  ;;  %vm991_vm5 = vmor %vm989_vm4, %vm990_vm3  ;;  %vm1005_vm7 = vweird.f32 %v2808_v36 }
 0x421   :  { %v986_v62 = vsub.f32 1.0, %v985_v58  ;;  %vm1006_vm9 = vmor %vm1004_vm8, %vm1005_vm7 }
 0x422   :  { %v1001_v63 = vsub.f32 1.0, %v1000_v7 }
 0x423   :  { %v987_v6 = vmul.f32 %v2806_v35, %v986_v62  ;;  %v1403_v62 = vld [vmem:[#allocation8 + $0x180] sm:$0xff] }
 0x424   :  { %v1002_v12 = vmul.f32 %v2808_v36, %v1001_v63 }
 0x425   :  { %v988_v17 = vadd.f32 %v2806_v35, %v987_v6 }
 0x426   :  { %v1003_v0 = vadd.f32 %v2808_v36, %v1002_v12  ;;  %v4112_v12 = vld [vmem:[%s4856_s6] ss:$0 sm:$0xff] }
 0x427   :  { %v992_v27 = vsel %vm991_vm5, %v2806_v35, %v988_v17  ;;  %v1409_v35 = vld [vmem:[#allocation8 + $0x1b0] sm:$0xff] }
 0x428   :  { %v997_v15 = vsel %vm994_vm6, %v996_v23, %v992_v27  ;;  %v1007_v20 = vsel %vm1006_vm9, %v2808_v36, %v1003_v0  ;;  %v1406_v36 = vld [vmem:[#allocation8 + $0x198] sm:$0xff] }
 0x429   :  { %v1015_v48 = vmul.f32 %v1014_v21, %v997_v15  ;;  %v1012_v49 = vsel %vm1009_vm10, %v1011_v1, %v1007_v20 }
 0x42a   :  { %v1018_v53 = vsub.f32 1.0, %v1012_v49  ;;  %v1020_v24 = vmul.f32 %v1012_v49, %v3998_v18 }
 0x42b   :  { %v1016_v50 = vadd.f32 %v1015_v48, %v4081_v46 }
 0x42d   :  { %2809 = vtanh.f32 %v1016_v50 }
 0x433   :  { %v2810_v5 = vpop.eup %2809 }
 0x434   :  { %v1019_v13 = vmul.f32 %v2810_v5, %v1018_v53 }
 0x436   :  { %v4085_v29 = vadd.f32 %v1020_v24, %v1019_v13 }
 0x438   :  { %v1023_v37 = vadd.f32 %v1022_v34, %v4085_v29  ;;  %1041 = vmatmul.f32.vlgmr.msra.gmra.mxu3 %v4085_v29  ;;  %1061 = vmatmul.f32.vlgmr.msra.gmra.mxu0 %v4085_v29  ;;  %v1141_v5 = vrot.slane %v4085_v29, 6 }
 0x439   :  { %1081 = vmatmul.f32.vlgmr.msra.gmra.mxu1 %v4085_v29  ;;  %1316 = vmatpush.msra.mxu3 %v3905_v9  ;;  %v4123_v29 = vld [vmem:[#allocation9 + $0x2e8] sm:$0xff] }
 0x43a   :  { %1024 = vst [vmem:[#allocation2 + $0x8] sm:$0x3] %v1023_v37 }
 0x43b   :  { %1317 = vmatpush.msra.mxu3 %v4007_v14  ;;  %v1448_v14 = vld [vmem:[#allocation8 + $0x2e8] sm:$0xff] }
 0x43c   :  { %1516 = vmatpush.msra.mxu0 %v1448_v14 }
 0x43d   :  { %1318 = vmatpush.msra.mxu3 %v4012_v31 }
 0x43f   :  { %1319 = vmatpush.msra.mxu3 %v4017_v57  ;;  %v1445_v57 = vld [vmem:[#allocation8 + $0x2d0] sm:$0xff] }
 0x440   :  { %1517 = vmatpush.msra.mxu0 %v1445_v57  ;;  %v1449_v57 = vld [vmem:[#allocation8 + $0x2f0] sm:$0xff] }
 0x441   :  { %1320 = vmatpush.msra.mxu3 %v4022_v26  ;;  %1539 = vmatpush.msra.mxu1 %v1449_v57 }
 0x443   :  { %1321 = vmatpush.msra.mxu3 %v4027_v4  ;;  %v1442_v4 = vld [vmem:[#allocation8 + $0x2b8] sm:$0xff] }
 0x444   :  { %1518 = vmatpush.msra.mxu0 %v1442_v4  ;;  %v1446_v4 = vld [vmem:[#allocation8 + $0x2d8] sm:$0xff] }
 0x445   :  { %1322 = vmatpush.msra.mxu3 %v4032_v51  ;;  %1540 = vmatpush.msra.mxu1 %v1446_v4  ;;  %v1404_v4 = vld [vmem:[#allocation8 + $0x188] sm:$0xff] }
 0x447   :  { %1323 = vmatpush.msra.mxu3 %v4037_v8  ;;  %v1439_v8 = vld [vmem:[#allocation8 + $0x2a0] sm:$0xff] }
 0x448   :  { %1519 = vmatpush.msra.mxu0 %v1439_v8  ;;  %v4126_v8 = vld [vmem:[#allocation9 + $0x2d0] sm:$0xff] }
 0x449   :  { %1324 = vmatpush.msra.mxu3 %v4042_v55 }
 0x44b   :  { %1325 = vmatpush.msra.mxu3 %v4047_v59  ;;  %v1436_v59 = vld [vmem:[#allocation8 + $0x288] sm:$0xff] }
 0x44c   :  { %1520 = vmatpush.msra.mxu0 %v1436_v59  ;;  %v1444_v59 = vld [vmem:[#allocation8 + $0x2c8] sm:$0xff] }
 0x44d   :  { %1326 = vmatpush.msra.mxu3 %v4051_v56 }
 0x44f   :  { %1327 = vmatpush.msra.mxu3 %v4055_v43  ;;  %v1433_v43 = vld [vmem:[#allocation8 + $0x270] sm:$0xff] }
 0x450   :  { %1521 = vmatpush.msra.mxu0 %v1433_v43 }
 0x451   :  { %1328 = vmatpush.msra.mxu3 %v4059_v19 }
 0x453   :  { %1329 = vmatpush.msra.mxu3 %v4063_v28  ;;  %v1430_v28 = vld [vmem:[#allocation8 + $0x258] sm:$0xff] }
 0x454   :  { %1522 = vmatpush.msra.mxu0 %v1430_v28  ;;  %v1440_v28 = vld [vmem:[#allocation8 + $0x2a8] sm:$0xff] }
 0x455   :  { %1330 = vmatpush.msra.mxu3 %v4067_v32 }
 0x457   :  { %1331 = vmatpush.msra.mxu3 %v4071_v54  ;;  %v1427_v54 = vld [vmem:[#allocation8 + $0x240] sm:$0xff] }
 0x458   :  { %1523 = vmatpush.msra.mxu0 %v1427_v54  ;;  %v4131_v54 = vld [vmem:[#allocation9 + $0x2a0] sm:$0xff] }
 0x45a   :  { %1524 = vmatpush.msra.mxu0 %v1424_v39 }
 0x45c   :  { %1525 = vmatpush.msra.mxu0 %v1421_v30  ;;  %v1437_v30 = vld [vmem:[#allocation8 + $0x290] sm:$0xff] }
 0x45e   :  { %1526 = vmatpush.msra.mxu0 %v1418_v61  ;;  %v4134_v61 = vld [vmem:[#allocation9 + $0x288] sm:$0xff] }
 0x460   :  { %1527 = vmatpush.msra.mxu0 %v1415_v33 }
 0x462   :  { %1528 = vmatpush.msra.mxu0 %v1412_v3  ;;  %v1435_v3 = vld [vmem:[#allocation8 + $0x280] sm:$0xff] }
 0x464   :  { %1529 = vmatpush.msra.mxu0 %v1409_v35 }
 0x466   :  { %1530 = vmatpush.msra.mxu0 %v1406_v36 }
 0x468   :  { %1531 = vmatpush.msra.mxu0 %v1403_v62  ;;  %v4142_v62 = vld [vmem:[#allocation9 + $0x258] sm:$0xff] }
 0x4b5   :  { %v1062_v9 = vpop.f32.mrf.mxu0 }
 0x4b6   :  { %v1088_v18 = vrot.slane %v1062_v9, 6  ;;  %v1082_v2 = vpop.f32.mrf.mxu1 }
 0x4b7   :  { %v1131_v16 = vadd.f32 %v4112_v12, %v1082_v2  ;;  %v1429_v2 = vld [vmem:[#allocation8 + $0x250] sm:$0xff] }
 0x4b8   :  { %v1092_v31 = vadd.f32 %v1088_v18, %v4930_v60  ;;  %v1145_v18 = vld [vmem:[#allocation2 + $0xa] sm:$0x3] }
 0x4b9   :  { %v1133_v15 = vrot.slane %v1131_v16, 6  ;;  %v1426_v16 = vld [vmem:[#allocation8 + $0x238] sm:$0xff] }
 0x4ba   :  { %v2714_v26 = vmul.f32 -1.442695, %v1092_v31  ;;  %v4120_v31 = vld [vmem:[#allocation2] sm:$0xff] }
 0x4bb   :  { %v1042_v51 = vpop.f32.mrf.mxu3 }
 0x4bc   :  { %2811 = vpow2.f32 %v2714_v26  ;;  %v1087_v55 = vrot.slane %v1042_v51, 6  ;;  %v1450_v26 = vld [vmem:[#allocation8 + $0x2f8] sm:$0xff]  ;;  %v1447_v51 = vld [vmem:[#allocation8 + $0x2e0] sm:$0xff] }
 0x4be   :  { %v1091_v56 = vadd.f32 %v1087_v55, %v4929_v41  ;;  %v1443_v55 = vld [vmem:[#allocation8 + $0x2c0] sm:$0xff] }
 0x4bf   :  { %1541 = vmatpush.msra.mxu1 %v1443_v55 }
 0x4c0   :  { %v2713_v19 = vmul.f32 -1.442695, %v1091_v56  ;;  %v4129_v56 = vld [vmem:[#allocation9 + $0x2b8] sm:$0xff] }
 0x4c1   :  { %1542 = vmatpush.msra.mxu1 %v1440_v28 }
 0x4c2   :  { %v2812_v32 = vpop.eup %2811  ;;  %2813 = vpow2.f32 %v2713_v19 }
 0x4c3   :  { %v1100_v22 = vadd.f32 1.0, %v2812_v32  ;;  %v1441_v32 = vld [vmem:[#allocation8 + $0x2b0] sm:$0xff]  ;;  %1543 = vmatpush.msra.mxu1 %v1437_v30 }
 0x4c5   :  { %2815 = vrcp.f32 %v1100_v22  ;;  %v1127_v47 = vand.u32 2147483648, %v1100_v22  ;;  %vm1121_vm0 = vweird.f32 %v1100_v22  ;;  %v1125_v11 = vand.u32 2147483647, %v1100_v22 }
 0x4c7   :  { %v1128_v1 = vor.u32 1.1754944e-38, %v1127_v47  ;;  %vm1126_vm2 = vcmp.eq.f32.partialorder %v1125_v11, 8.507059e+37  ;;  %v4154_v47 = vld [vmem:[#allocation9 + $0x1f8] sm:$0xff]  ;;  %v1416_v11 = vld [vmem:[#allocation8 + $0x1e8] sm:$0xff] }
 0x4c8   :  { %v2814_v42 = vpop.eup %2813 }
 0x4c9   :  { %v1099_v45 = vadd.f32 1.0, %v2814_v42  ;;  %v1438_v42 = vld [vmem:[#allocation8 + $0x298] sm:$0xff] }
 0x4cb   :  { %2817 = vrcp.f32 %v1099_v45  ;;  %v2816_v52 = vpop.eup %2815  ;;  %v1112_v10 = vand.u32 2147483648, %v1099_v45  ;;  %v1110_v23 = vand.u32 2147483647, %v1099_v45  ;;  %vm1106_vm12 = vweird.f32 %v1099_v45 }
 0x4cc   :  { %v1117_v25 = vmul.f32 %v2816_v52, %v1100_v22  ;;  %vm1122_vm15 = vweird.f32 %v2816_v52 }
 0x4cd   :  { %v1113_v0 = vor.u32 1.1754944e-38, %v1112_v10  ;;  %vm1111_vm14 = vcmp.eq.f32.partialorder %v1110_v23, 8.507059e+37  ;;  %vm1123_vm1 = vmor %vm1121_vm0, %vm1122_vm15  ;;  %v1425_v10 = vld [vmem:[#allocation8 + $0x230] sm:$0xff]  ;;  %v1422_v23 = vld [vmem:[#allocation8 + $0x218] sm:$0xff] }
 0x4ce   :  { %v1118_v63 = vsub.f32 1.0, %v1117_v25  ;;  %v4139_v25 = vld [vmem:[#allocation9 + $0x270] sm:$0xff] }
 0x4d0   :  { %v1119_v27 = vmul.f32 %v2816_v52, %v1118_v63  ;;  %v1428_v63 = vld [vmem:[#allocation8 + $0x248] sm:$0xff] }
 0x4d1   :  { %v2818_v58 = vpop.eup %2817 }
 0x4d2   :  { %v1102_v7 = vmul.f32 %v2818_v58, %v1099_v45  ;;  %vm1107_vm11 = vweird.f32 %v2818_v58  ;;  %v1120_v40 = vadd.f32 %v2816_v52, %v1119_v27  ;;  %v1423_v27 = vld [vmem:[#allocation8 + $0x220] sm:$0xff] }
 0x4d3   :  { %vm1108_vm13 = vmor %vm1106_vm12, %vm1107_vm11 }
 0x4d4   :  { %v1103_v6 = vsub.f32 1.0, %v1102_v7  ;;  %v1124_v20 = vsel %vm1123_vm1, %v2816_v52, %v1120_v40  ;;  %v1434_v52 = vld [vmem:[#allocation8 + $0x278] sm:$0xff]  ;;  %v1432_v7 = vld [vmem:[#allocation8 + $0x268] sm:$0xff] }
 0x4d5   :  { %v1129_v49 = vsel %vm1126_vm2, %v1128_v1, %v1124_v20  ;;  %1544 = vmatpush.msra.mxu1 %v1434_v52  ;;  %v4159_v20 = vld [vmem:[#allocation9 + $0x1e0] sm:$0xff]  ;;  %v1413_v1 = vld [vmem:[#allocation8 + $0x1d0] sm:$0xff] }
 0x4d6   :  { %v1104_v17 = vmul.f32 %v2818_v58, %v1103_v6  ;;  %v1138_v53 = vsub.f32 1.0, %v1129_v49  ;;  %v1143_v34 = vmul.f32 %v1141_v5, %v1129_v49  ;;  %v4145_v6 = vld [vmem:[#allocation9 + $0x240] sm:$0xff]  ;;  %v1414_v49 = vld [vmem:[#allocation8 + $0x1d8] sm:$0xff] }
 0x4d7   :  { %v1410_v5 = vld [vmem:[#allocation8 + $0x1b8] sm:$0xff] }
 0x4d8   :  { %v1105_v21 = vadd.f32 %v2818_v58, %v1104_v17  ;;  %v4148_v17 = vld [vmem:[#allocation9 + $0x228] sm:$0xff] }
 0x4da   :  { %v1109_v38 = vsel %vm1108_vm13, %v2818_v58, %v1105_v21  ;;  %v1431_v58 = vld [vmem:[#allocation8 + $0x260] sm:$0xff]  ;;  %v4151_v21 = vld [vmem:[#allocation9 + $0x210] sm:$0xff] }
 0x4db   :  { %v1114_v44 = vsel %vm1111_vm14, %v1113_v0, %v1109_v38  ;;  %1545 = vmatpush.msra.mxu1 %v1431_v58  ;;  %v1420_v38 = vld [vmem:[#allocation8 + $0x208] sm:$0xff] }
 0x4dc   :  { %v1135_v48 = vmul.f32 %v1133_v15, %v1114_v44  ;;  %v1419_v15 = vld [vmem:[#allocation8 + $0x200] sm:$0xff] }
 0x4dd   :  { %1546 = vmatpush.msra.mxu1 %v1428_v63 }
 0x4de   :  { %v1136_v50 = vadd.f32 %v1135_v48, %v4081_v46 }
 0x4df   :  { %1547 = vmatpush.msra.mxu1 %v1425_v10 }
 0x4e0   :  { %2819 = vtanh.f32 %v1136_v50  ;;  %v1417_v50 = vld [vmem:[#allocation8 + $0x1f0] sm:$0xff] }
 0x4e1   :  { %1548 = vmatpush.msra.mxu1 %v1422_v23 }
 0x4e3   :  { %1549 = vmatpush.msra.mxu1 %v1419_v15 }
 0x4e5   :  { %1550 = vmatpush.msra.mxu1 %v1416_v11 }
 0x4e6   :  { %v2820_v13 = vpop.eup %2819 }
 0x4e7   :  { %v1139_v24 = vmul.f32 %v2820_v13, %v1138_v53  ;;  %v4164_v53 = vld [vmem:[#allocation9 + $0x1c8] sm:$0xff]  ;;  %1551 = vmatpush.msra.mxu1 %v1413_v1  ;;  %v1411_v13 = vld [vmem:[#allocation8 + $0x1c0] sm:$0xff] }
 0x4e9   :  { %v4117_v37 = vadd.f32 %v1143_v34, %v1139_v24  ;;  %v4166_v24 = vld [vmem:[#allocation9 + $0x1b0] sm:$0xff]  ;;  %v1407_v34 = vld [vmem:[#allocation8 + $0x1a0] sm:$0xff]  ;;  %1552 = vmatpush.msra.mxu1 %v1410_v5 }
 0x4eb   :  { %v1147_v9 = vrot.slane %v4117_v37, 2  ;;  %1553 = vmatpush.msra.mxu1 %v1407_v34  ;;  %v4208_v34 = vld [vmem:[#allocation9 + $0x2f0] sm:$0xff] }
 0x4ed   :  { %v1149_v14 = vadd.f32 %v1147_v9, %v1145_v18  ;;  %1167 = vmatmul.f32.vlgmr.msrb.gmra.mxu2 %v1147_v9  ;;  %1187 = vmatmul.f32.vlgmr.msrb.gmra.mxu3 %v1147_v9 }
 0x4ee   :  { %1207 = vmatmul.f32.vlgmr.msrb.gmra.mxu0 %v1147_v9  ;;  %1562 = vmatpush.msrb.mxu2 %v1450_v26  ;;  %v1408_v9 = vld [vmem:[#allocation8 + $0x1a8] sm:$0xff] }
 0x4ef   :  { %1150 = vst [vmem:[#allocation2 + $0xa] sm:$0x3] %v1149_v14  ;;  %1587 = vmatpush.msrb.mxu3 %v4123_v29  ;;  %v4169_v14 = vld [vmem:[#allocation9 + $0x198] sm:$0xff]  ;;  %1554 = vmatpush.msra.mxu1 %v1404_v4  ;;  %v4223_v4 = vld [vmem:[#allocation9 + $0x2c0] sm:$0xff] }
 0x4f0   :  { %1563 = vmatpush.msrb.mxu2 %v1447_v51  ;;  %4934 = vst [vmem:[#allocation31_spill] sm:$0xff] %v4169_v14  ;;  %v1405_v51 = vld [vmem:[#allocation8 + $0x190] sm:$0xff]  ;;  %1607 = vmatpush.msrb.mxu0 %v4208_v34 }
 0x4f1   :  { %1588 = vmatpush.msrb.mxu3 %v4126_v8 }
 0x4f2   :  { %1564 = vmatpush.msrb.mxu2 %v1444_v59 }
 0x4f3   :  { %1589 = vmatpush.msrb.mxu3 %v4129_v56 }
 0x4f4   :  { %1565 = vmatpush.msrb.mxu2 %v1441_v32 }
 0x4f5   :  { %1590 = vmatpush.msrb.mxu3 %v4131_v54 }
 0x4f6   :  { %1532 = vmatmul.f32.vlgmr.msra.gmra.mxu0 %v4120_v31  ;;  %1566 = vmatpush.msrb.mxu2 %v1438_v42 }
 0x4f7   :  { %1591 = vmatpush.msrb.mxu3 %v4134_v61 }
 0x4f8   :  { %1567 = vmatpush.msrb.mxu2 %v1435_v3 }
 0x4f9   :  { %1592 = vmatpush.msrb.mxu3 %v4139_v25 }
 0x4fa   :  { %1568 = vmatpush.msrb.mxu2 %v1432_v7 }
 0x4fb   :  { %1593 = vmatpush.msrb.mxu3 %v4142_v62 }
 0x4fc   :  { %1569 = vmatpush.msrb.mxu2 %v1429_v2 }
 0x4fd   :  { %1594 = vmatpush.msrb.mxu3 %v4145_v6 }
 0x4fe   :  { %1570 = vmatpush.msrb.mxu2 %v1426_v16 }
 0x4ff   :  { %1595 = vmatpush.msrb.mxu3 %v4148_v17 }
 0x500   :  { %1571 = vmatpush.msrb.mxu2 %v1423_v27  ;;  %v1266_v27 = vrot.slane %v4117_v37, 6  ;;  %v4189_v37 = vld [vmem:[#allocation12 + $0x2] sm:$0x3] }
 0x501   :  { %1596 = vmatpush.msrb.mxu3 %v4151_v21 }
 0x502   :  { %1572 = vmatpush.msrb.mxu2 %v1420_v38 }
 0x503   :  { %1597 = vmatpush.msrb.mxu3 %v4154_v47 }
 0x504   :  { %1573 = vmatpush.msrb.mxu2 %v1417_v50  ;;  %v1270_v50 = vld [vmem:[#allocation2 + $0xc] sm:$0x3] }
 0x505   :  { %1598 = vmatpush.msrb.mxu3 %v4159_v20 }
 0x506   :  { %1574 = vmatpush.msrb.mxu2 %v1414_v49 }
 0x507   :  { %1599 = vmatpush.msrb.mxu3 %v4164_v53 }
 0x508   :  { %1575 = vmatpush.msrb.mxu2 %v1411_v13 }
 0x509   :  { %1600 = vmatpush.msrb.mxu3 %v4166_v24 }
 0x50a   :  { %1576 = vmatpush.msrb.mxu2 %v1408_v9  ;;  %v4210_v9 = vld [vmem:[#allocation9 + $0x2f8] sm:$0xff] }
 0x50b   :  { %1601 = vmatpush.msrb.mxu3 %v4169_v14 }
 0x50c   :  { %1577 = vmatpush.msrb.mxu2 %v1405_v51  ;;  %v4225_v51 = vld [vmem:[#allocation9 + $0x2c8] sm:$0xff] }
 0x56b   :  { %v1208_v55 = vpop.f32.mrf.mxu0 }
 0x570   :  { %v1168_v43 = vpop.f32.mrf.mxu2  ;;  %v1188_v19 = vpop.f32.mrf.mxu3 }
 0x571   :  { %v1213_v22 = vrot.slane %v1168_v43, 4  ;;  %v1214_v39 = vrot.slane %v1188_v19, 4  ;;  %v4173_v43 = vld [vmem:[#allocation9 + $0x180] sm:$0xff] }
 0x572   :  { %4935 = vst [vmem:[#allocation33_spill] sm:$0xff] %v4173_v43  ;;  %1602 = vmatpush.msrb.mxu3 %v4173_v43 }
 0x573   :  { %v1217_v45 = vadd.f32 %v1213_v22, %v4929_v41  ;;  %v1218_v33 = vadd.f32 %v1214_v39, %v4930_v60  ;;  %v1257_v22 = vadd.f32 %v4112_v12, %v1208_v55 }
 0x575   :  { %v2715_v35 = vmul.f32 -1.442695, %v1217_v45  ;;  %v2716_v36 = vmul.f32 -1.442695, %v1218_v33  ;;  %v1259_v52 = vrot.slane %v1257_v22, 4  ;;  %v4243_v22 = vld [vmem:[#allocation9 + $0x298] sm:$0xff] }
 0x577   :  { %2821 = vpow2.f32 %v2715_v35 }
 0x578   :  { %2823 = vpow2.f32 %v2716_v36 }
 0x57d   :  { %v2822_v0 = vpop.eup %2821 }
 0x57e   :  { %v2824_v44 = vpop.eup %2823  ;;  %v1225_v40 = vadd.f32 1.0, %v2822_v0 }
 0x57f   :  { %v4156_v48 = vadd.f32 1.0, %v2824_v44 }
 0x580   :  { %2825 = vrcp.f32 %v1225_v40  ;;  %v1238_v28 = vand.u32 2147483648, %v1225_v40  ;;  %v1236_v30 = vand.u32 2147483647, %v1225_v40  ;;  %vm1232_vm4 = vweird.f32 %v1225_v40 }
 0x581   :  { %2827 = vrcp.f32 %v4156_v48  ;;  %v1253_v58 = vand.u32 2147483648, %v4156_v48  ;;  %vm1247_vm8 = vweird.f32 %v4156_v48  ;;  %v1251_v63 = vand.u32 2147483647, %v4156_v48 }
 0x582   :  { %v1239_v33 = vor.u32 1.1754944e-38, %v1238_v28  ;;  %vm1237_vm6 = vcmp.eq.f32.partialorder %v1236_v30, 8.507059e+37  ;;  %v4252_v30 = vld [vmem:[#allocation9 + $0x280] sm:$0xff] }
 0x583   :  { %v1254_v16 = vor.u32 1.1754944e-38, %v1253_v58  ;;  %vm1252_vm10 = vcmp.eq.f32.partialorder %v1251_v63, 8.507059e+37  ;;  %v4278_v58 = vld [vmem:[#allocation9 + $0x238] sm:$0xff] }
 0x584   :  { %v4281_v63 = vld [vmem:[#allocation9 + $0x218] sm:$0xff] }
 0x586   :  { %v2826_v18 = vpop.eup %2825 }
 0x587   :  { %v2828_v57 = vpop.eup %2827  ;;  %v1228_v26 = vmul.f32 %v2826_v18, %v1225_v40  ;;  %vm1233_vm3 = vweird.f32 %v2826_v18 }
 0x588   :  { %v1243_v59 = vmul.f32 %v2828_v57, %v4156_v48  ;;  %vm1234_vm5 = vmor %vm1232_vm4, %vm1233_vm3  ;;  %vm1248_vm7 = vweird.f32 %v2828_v57 }
 0x589   :  { %v1229_v19 = vsub.f32 1.0, %v1228_v26  ;;  %vm1249_vm9 = vmor %vm1247_vm8, %vm1248_vm7  ;;  %v4216_v26 = vld [vmem:[#allocation9 + $0x2e0] sm:$0xff] }
 0x58a   :  { %v1244_v32 = vsub.f32 1.0, %v1243_v59  ;;  %v4231_v59 = vld [vmem:[#allocation9 + $0x2a8] sm:$0xff] }
 0x58b   :  { %v1230_v39 = vmul.f32 %v2826_v18, %v1229_v19 }
 0x58c   :  { %v1245_v42 = vmul.f32 %v2828_v57, %v1244_v32  ;;  %v4241_v32 = vld [vmem:[#allocation9 + $0x290] sm:$0xff] }
 0x58d   :  { %v1231_v45 = vadd.f32 %v2826_v18, %v1230_v39  ;;  %v4250_v39 = vld [vmem:[#allocation9 + $0x278] sm:$0xff] }
 0x58e   :  { %v1246_v36 = vadd.f32 %v2828_v57, %v1245_v42  ;;  %v4258_v42 = vld [vmem:[#allocation9 + $0x260] sm:$0xff] }
 0x58f   :  { %v1235_v3 = vsel %vm1234_vm5, %v2826_v18, %v1231_v45  ;;  %v4260_v45 = vld [vmem:[#allocation9 + $0x268] sm:$0xff] }
 0x590   :  { %v1240_v35 = vsel %vm1237_vm6, %v1239_v33, %v1235_v3  ;;  %v1250_v10 = vsel %vm1249_vm9, %v2828_v57, %v1246_v36  ;;  %v4214_v57 = vld [vmem:[#allocation9 + $0x2d8] sm:$0xff]  ;;  %v4268_v3 = vld [vmem:[#allocation9 + $0x248] sm:$0xff]  ;;  %v4272_v36 = vld [vmem:[#allocation9 + $0x230] sm:$0xff] }
 0x591   :  { %v1261_v7 = vmul.f32 %v1259_v52, %v1240_v35  ;;  %v1255_v23 = vsel %vm1252_vm10, %v1254_v16, %v1250_v10  ;;  %1608 = vmatpush.msrb.mxu0 %v4214_v57  ;;  %v4270_v35 = vld [vmem:[#allocation9 + $0x250] sm:$0xff] }
 0x592   :  { %v1264_v0 = vsub.f32 1.0, %v1255_v23  ;;  %v1268_v44 = vmul.f32 %v1266_v27, %v1255_v23  ;;  %v4290_v23 = vld [vmem:[#allocation9 + $0x200] sm:$0xff]  ;;  %v4292_v27 = vld [vmem:[#allocation9 + $0x208] sm:$0xff] }
 0x593   :  { %v1262_v2 = vadd.f32 %v1261_v7, %v4081_v46  ;;  %1609 = vmatpush.msrb.mxu0 %v4223_v4 }
 0x595   :  { %2829 = vtanh.f32 %v1262_v2  ;;  %1610 = vmatpush.msrb.mxu0 %v4231_v59  ;;  %v4283_v2 = vld [vmem:[#allocation9 + $0x220] sm:$0xff] }
 0x597   :  { %1611 = vmatpush.msrb.mxu0 %v4241_v32 }
 0x599   :  { %1612 = vmatpush.msrb.mxu0 %v4250_v39 }
 0x59b   :  { %v2830_v15 = vpop.eup %2829  ;;  %1613 = vmatpush.msrb.mxu0 %v4258_v42 }
 0x59c   :  { %v1265_v38 = vmul.f32 %v2830_v15, %v1264_v0 }
 0x59d   :  { %1614 = vmatpush.msrb.mxu0 %v4268_v3 }
 0x59e   :  { %v4183_v40 = vadd.f32 %v1268_v44, %v1265_v38  ;;  %v4299_v38 = vld [vmem:[#allocation9 + $0x1e8] sm:$0xff]  ;;  %v4301_v44 = vld [vmem:[#allocation9 + $0x1f0] sm:$0xff] }
 0x59f   :  { %1615 = vmatpush.msrb.mxu0 %v4272_v36 }
 0x5a0   :  { %v1272_v11 = vrot.slane %v4183_v40, 4 }
 0x5a1   :  { %1616 = vmatpush.msrb.mxu0 %v4281_v63 }
 0x5a2   :  { %v1274_v48 = vadd.f32 %v1272_v11, %v1270_v50  ;;  %1292 = vmatmul.f32.vlgmr.msrb.gmra.mxu1 %v1272_v11  ;;  %1312 = vmatmul.f32.vlgmr.msra.gmra.mxu2 %v1272_v11 }
 0x5a3   :  { %1332 = vmatmul.f32.vlgmr.msra.gmra.mxu3 %v1272_v11  ;;  %1698 = vmatpush.msra.mxu2 %v4123_v29 }
 0x5a4   :  { %1275 = vst [vmem:[#allocation2 + $0xc] sm:$0x3] %v1274_v48  ;;  %1627 = vmatpush.msrb.mxu1 %v4210_v9  ;;  %1718 = vmatpush.msra.mxu3 %v4208_v34 }
 0x5a5   :  { %1699 = vmatpush.msra.mxu2 %v4126_v8  ;;  %1617 = vmatpush.msrb.mxu0 %v4290_v23 }
 0x5a6   :  { %1628 = vmatpush.msrb.mxu1 %v4216_v26  ;;  %1719 = vmatpush.msra.mxu3 %v4214_v57 }
 0x5a7   :  { %1700 = vmatpush.msra.mxu2 %v4129_v56  ;;  %1618 = vmatpush.msrb.mxu0 %v4299_v38 }
 0x5a8   :  { %1629 = vmatpush.msrb.mxu1 %v4225_v51  ;;  %1720 = vmatpush.msra.mxu3 %v4223_v4 }
 0x5a9   :  { %1701 = vmatpush.msra.mxu2 %v4131_v54 }
 0x5aa   :  { %1555 = vmatmul.f32.vlgmr.msra.gmra.mxu1 %v4120_v31  ;;  %1578 = vmatmul.f32.vlgmr.msrb.gmra.mxu2 %v4120_v31 }
 0x5ab   :  { %1603 = vmatmul.f32.vlgmr.msrb.gmra.mxu3 %v4189_v37  ;;  %1702 = vmatpush.msra.mxu2 %v4134_v61 }
 0x5ac   :  { %1721 = vmatpush.msra.mxu3 %v4231_v59 }
 0x5ad   :  { %1703 = vmatpush.msra.mxu2 %v4139_v25 }
 0x5ae   :  { %1722 = vmatpush.msra.mxu3 %v4241_v32 }
 0x5af   :  { %1704 = vmatpush.msra.mxu2 %v4142_v62 }
 0x5b0   :  { %1723 = vmatpush.msra.mxu3 %v4250_v39 }
 0x5b1   :  { %1705 = vmatpush.msra.mxu2 %v4145_v6 }
 0x5b2   :  { %1724 = vmatpush.msra.mxu3 %v4258_v42 }
 0x5b3   :  { %1706 = vmatpush.msra.mxu2 %v4148_v17 }
 0x5b4   :  { %1725 = vmatpush.msra.mxu3 %v4268_v3 }
 0x5b5   :  { %1707 = vmatpush.msra.mxu2 %v4151_v21 }
 0x5b6   :  { %1726 = vmatpush.msra.mxu3 %v4272_v36 }
 0x5b7   :  { %1708 = vmatpush.msra.mxu2 %v4154_v47 }
 0x5b8   :  { %1727 = vmatpush.msra.mxu3 %v4281_v63 }
 0x5b9   :  { %1709 = vmatpush.msra.mxu2 %v4159_v20 }
 0x5ba   :  { %1728 = vmatpush.msra.mxu3 %v4290_v23 }
 0x5bb   :  { %1710 = vmatpush.msra.mxu2 %v4164_v53 }
 0x5bc   :  { %1729 = vmatpush.msra.mxu3 %v4299_v38 }
 0x5bd   :  { %1711 = vmatpush.msra.mxu2 %v4166_v24 }
 0x5bf   :  { %1712 = vmatpush.msra.mxu2 %v4169_v14 }
 0x5c1   :  { %1713 = vmatpush.msra.mxu2 %v4173_v43 }
 0x5c3   :  { %1844 = vmatpush.msrb.mxu2 %v4208_v34 }
 0x5c5   :  { %1845 = vmatpush.msrb.mxu2 %v4214_v57 }
 0x5c7   :  { %1846 = vmatpush.msrb.mxu2 %v4223_v4 }
 0x5c9   :  { %1847 = vmatpush.msrb.mxu2 %v4231_v59 }
 0x5cb   :  { %1848 = vmatpush.msrb.mxu2 %v4241_v32 }
 0x5cd   :  { %1849 = vmatpush.msrb.mxu2 %v4250_v39 }
 0x5cf   :  { %1850 = vmatpush.msrb.mxu2 %v4258_v42 }
 0x5d1   :  { %1851 = vmatpush.msrb.mxu2 %v4268_v3 }
 0x5d3   :  { %1852 = vmatpush.msrb.mxu2 %v4272_v36 }
 0x5d5   :  { %1853 = vmatpush.msrb.mxu2 %v4281_v63 }
 0x5d7   :  { %1854 = vmatpush.msrb.mxu2 %v4290_v23 }
 0x5d9   :  { %1855 = vmatpush.msrb.mxu2 %v4299_v38 }
 0x61f   :  { %v1293_v31 = vpop.f32.mrf.mxu1 }
 0x620   :  { %v1338_v1 = vrot.slane %v1293_v31, 2 }
 0x622   :  { %v1342_v49 = vadd.f32 %v1338_v1, %v4929_v41 }
 0x624   :  { %v2717_v5 = vmul.f32 -1.442695, %v1342_v49 }
 0x625   :  { %v1313_v13 = vpop.f32.mrf.mxu2 }
 0x626   :  { %2831 = vpow2.f32 %v2717_v5  ;;  %v1339_v18 = vrot.slane %v1313_v13, 2  ;;  %v1333_v16 = vpop.f32.mrf.mxu3  ;;  %v4315_v5 = vld [vmem:[#allocation9 + $0x1d0] sm:$0xff] }
 0x627   :  { %v1382_v48 = vadd.f32 %v4112_v12, %v1333_v16  ;;  %v4317_v12 = vld [vmem:[#allocation9 + $0x1d8] sm:$0xff]  ;;  %1619 = vmatpush.msrb.mxu0 %v4315_v5  ;;  %v4330_v16 = vld [vmem:[#allocation9 + $0x1a8] sm:$0xff]  ;;  %1730 = vmatpush.msra.mxu3 %v4315_v5 }
 0x628   :  { %v1343_v41 = vadd.f32 %v1339_v18, %v4930_v60  ;;  %v4233_v60 = vld [vmem:[#allocation9 + $0x2b0] sm:$0xff]  ;;  %v4320_v18 = vld [vmem:[#allocation9 + $0x1b8] sm:$0xff]  ;;  %4937 = vst [vmem:[#allocation32_spill] sm:$0xff] %v4330_v16  ;;  %1856 = vmatpush.msrb.mxu2 %v4315_v5 }
 0x629   :  { %1630 = vmatpush.msrb.mxu1 %v4233_v60  ;;  %1620 = vmatpush.msrb.mxu0 %v4320_v18 }
 0x62a   :  { %v2718_v55 = vmul.f32 -1.442695, %v1343_v41  ;;  %v4322_v41 = vld [vmem:[#allocation9 + $0x1c0] sm:$0xff]  ;;  %1731 = vmatpush.msra.mxu3 %v4320_v18  ;;  %1857 = vmatpush.msrb.mxu2 %v4320_v18 }
 0x62b   :  { %1631 = vmatpush.msrb.mxu1 %v4243_v22 }
 0x62c   :  { %v2832_v19 = vpop.eup %2831  ;;  %2833 = vpow2.f32 %v2718_v55 }
 0x62d   :  { %v4239_v28 = vadd.f32 1.0, %v2832_v19  ;;  %1632 = vmatpush.msrb.mxu1 %v4252_v30 }
 0x62f   :  { %2835 = vrcp.f32 %v4239_v28  ;;  %1633 = vmatpush.msrb.mxu1 %v4260_v45  ;;  %v1363_v15 = vand.u32 2147483648, %v4239_v28  ;;  %v1361_v50 = vand.u32 2147483647, %v4239_v28  ;;  %vm1357_vm12 = vweird.f32 %v4239_v28 }
 0x631   :  { %1634 = vmatpush.msrb.mxu1 %v4270_v35  ;;  %v1364_v13 = vor.u32 1.1754944e-38, %v1363_v15  ;;  %vm1362_vm14 = vcmp.eq.f32.partialorder %v1361_v50, 8.507059e+37  ;;  %v4338_v50 = vld [vmem:[#allocation9 + $0x188] sm:$0xff] }
 0x632   :  { %v2834_v33 = vpop.eup %2833  ;;  %4938 = vst [vmem:[#allocation34_spill] sm:$0xff] %v4338_v50 }
 0x633   :  { %v4266_v52 = vadd.f32 1.0, %v2834_v33  ;;  %1635 = vmatpush.msrb.mxu1 %v4278_v58 }
 0x635   :  { %v2836_v7 = vpop.eup %2835  ;;  %2837 = vrcp.f32 %v4266_v52  ;;  %1636 = vmatpush.msrb.mxu1 %v4283_v2  ;;  %v1378_v15 = vand.u32 2147483648, %v4266_v52  ;;  %vm1372_vm0 = vweird.f32 %v4266_v52 }
 0x636   :  { %v1353_v10 = vmul.f32 %v2836_v7, %v4239_v28  ;;  %vm1358_vm11 = vweird.f32 %v2836_v7  ;;  %v1384_v28 = vrot.slane %v1382_v48, 2  ;;  %v4340_v48 = vld [vmem:[#allocation9 + $0x190] sm:$0xff] }
 0x637   :  { %1637 = vmatpush.msrb.mxu1 %v4292_v27  ;;  %vm1359_vm13 = vmor %vm1357_vm12, %vm1358_vm11  ;;  %4939 = vst [vmem:[#allocation38_spill] sm:$0xff] %v4340_v48 }
 0x638   :  { %v1354_v0 = vsub.f32 1.0, %v1353_v10  ;;  %v4328_v10 = vld [vmem:[#allocation9 + $0x1a0] sm:$0xff] }
 0x639   :  { %1638 = vmatpush.msrb.mxu1 %v4301_v44  ;;  %4936 = vst [vmem:[#allocation36_spill] sm:$0xff] %v4328_v10  ;;  %1621 = vmatpush.msrb.mxu0 %v4328_v10 }
 0x63a   :  { %v1355_v11 = vmul.f32 %v2836_v7, %v1354_v0  ;;  %1732 = vmatpush.msra.mxu3 %v4328_v10  ;;  %1858 = vmatpush.msrb.mxu2 %v4328_v10 }
 0x63b   :  { %v2838_v31 = vpop.eup %2837  ;;  %1639 = vmatpush.msrb.mxu1 %v4317_v12  ;;  %1622 = vmatpush.msrb.mxu0 %v4338_v50 }
 0x63c   :  { %v1368_v1 = vmul.f32 %v2838_v31, %v4266_v52  ;;  %v1356_v49 = vadd.f32 %v2836_v7, %v1355_v11  ;;  %vm1373_vm15 = vweird.f32 %v2838_v31  ;;  %v1376_v11 = vand.u32 2147483647, %v4266_v52  ;;  %1733 = vmatpush.msra.mxu3 %v4338_v50  ;;  %1859 = vmatpush.msrb.mxu2 %v4338_v50 }
 0x63d   :  { %1640 = vmatpush.msrb.mxu1 %v4322_v41  ;;  %vm1374_vm1 = vmor %vm1372_vm0, %vm1373_vm15  ;;  %1738 = vmatpush.msra.mxu0 %v4210_v9  ;;  %v1391_v52 = vrot.slane %v4183_v40, 6 }
 0x63e   :  { %v1369_v55 = vsub.f32 1.0, %v1368_v1  ;;  %v1360_v19 = vsel %vm1359_vm13, %v2836_v7, %v1356_v49  ;;  %vm1377_vm2 = vcmp.eq.f32.partialorder %v1376_v11, 8.507059e+37  ;;  %1864 = vmatpush.msrb.mxu3 %v4210_v9 }
 0x63f   :  { %v1365_v33 = vsel %vm1362_vm14, %v1364_v13, %v1360_v19  ;;  %1641 = vmatpush.msrb.mxu1 %v4330_v16  ;;  %v1379_v13 = vor.u32 1.1754944e-38, %v1378_v15  ;;  %1739 = vmatpush.msra.mxu0 %v4216_v26  ;;  %v1395_v15 = vld [vmem:[#allocation2 + $0xe] sm:$0x3] }
 0x640   :  { %v1370_v0 = vmul.f32 %v2838_v31, %v1369_v55  ;;  %v1386_v7 = vmul.f32 %v1384_v28, %v1365_v33  ;;  %1865 = vmatpush.msrb.mxu3 %v4216_v26 }
 0x641   :  { %1642 = vmatpush.msrb.mxu1 %v4340_v48  ;;  %1740 = vmatpush.msra.mxu0 %v4225_v51 }
 0x642   :  { %v1371_v1 = vadd.f32 %v2838_v31, %v1370_v0  ;;  %v1387_v49 = vadd.f32 %v1386_v7, %v4081_v46  ;;  %1866 = vmatpush.msrb.mxu3 %v4225_v51 }
 0x643   :  { %1824 = vmatpush.msra.mxu1 %v4123_v29  ;;  %1741 = vmatpush.msra.mxu0 %v4233_v60 }
 0x644   :  { %v1375_v55 = vsel %vm1374_vm1, %v2838_v31, %v1371_v1  ;;  %2839 = vtanh.f32 %v1387_v49  ;;  %1867 = vmatpush.msrb.mxu3 %v4233_v60  ;;  %v4438_v1 = vld [vmem:[#allocation11 + $0x3] sm:$0x7] }
 0x645   :  { %v1380_v46 = vsel %vm1377_vm2, %v1379_v13, %v1375_v55  ;;  %1825 = vmatpush.msra.mxu1 %v4126_v8  ;;  %1742 = vmatpush.msra.mxu0 %v4243_v22  ;;  %v4886_v49 = vperm.slane %v4438_v1, 0  ;;  %v1533_v13 = vpop.f32.mrf.mxu0  ;;  %v1604_v55 = vpop.f32.mrf.mxu3 }
 0x646   :  { %v1389_v31 = vsub.f32 1.0, %v1380_v46  ;;  %v1393_v33 = vmul.f32 %v1391_v52, %v1380_v46  ;;  %1868 = vmatpush.msrb.mxu3 %v4243_v22 }
 0x647   :  { %1826 = vmatpush.msra.mxu1 %v4129_v56  ;;  %1743 = vmatpush.msra.mxu0 %v4252_v30  ;;  %v4443_v46 = vadd.f32 %v1533_v13, %v4886_v49 }
 0x648   :  { %1869 = vmatpush.msrb.mxu3 %v4252_v30 }
 0x649   :  { %1827 = vmatpush.msra.mxu1 %v4131_v54  ;;  %1744 = vmatpush.msra.mxu0 %v4260_v45  ;;  %4940 = vst [vmem:[#allocation40_spill] sm:$0xff] %v4443_v46  ;;  %v1647_v52 = vadd.f32 %v1604_v55, %v4443_v46 }
 0x64a   :  { %v2840_v19 = vpop.eup %2839  ;;  %1870 = vmatpush.msrb.mxu3 %v4260_v45 }
 0x64b   :  { %v1390_v28 = vmul.f32 %v2840_v19, %v1389_v31  ;;  %1828 = vmatpush.msra.mxu1 %v4134_v61  ;;  %1745 = vmatpush.msra.mxu0 %v4270_v35  ;;  %v2720_v31 = vmul.f32 -1.442695, %v1647_v52 }
 0x64c   :  { %1871 = vmatpush.msrb.mxu3 %v4270_v35 }
 0x64d   :  { %v1394_v0 = vadd.f32 %v1393_v33, %v1390_v28  ;;  %1829 = vmatpush.msra.mxu1 %v4139_v25  ;;  %1746 = vmatpush.msra.mxu0 %v4278_v58  ;;  %2841 = vpow2.f32 %v2720_v31 }
 0x64e   :  { %1872 = vmatpush.msrb.mxu3 %v4278_v58 }
 0x64f   :  { %v1397_v40 = vrot.slane %v1394_v0, 6  ;;  %1401 = vst [vmem:[#allocation21 - $0x6] sm:$0xc0] %v1394_v0  ;;  %1830 = vmatpush.msra.mxu1 %v4142_v62  ;;  %1747 = vmatpush.msra.mxu0 %v4283_v2  ;;  %v1556_v0 = vpop.f32.mrf.mxu1 }
 0x650   :  { %1873 = vmatpush.msrb.mxu3 %v4283_v2 }
 0x651   :  { %v1399_v7 = vadd.f32 %v1397_v40, %v1395_v15  ;;  %1831 = vmatpush.msra.mxu1 %v4145_v6  ;;  %1748 = vmatpush.msra.mxu0 %v4292_v27  ;;  %v4892_v15 = vperm.slane %v4438_v1, 1 }
 0x652   :  { %1874 = vmatpush.msrb.mxu3 %v4292_v27 }
 0x653   :  { %1400 = vst [vmem:[#allocation2 + $0xe] sm:$0x3] %v1399_v7  ;;  %1832 = vmatpush.msra.mxu1 %v4148_v17  ;;  %1749 = vmatpush.msra.mxu0 %v4301_v44  ;;  %v2842_v19 = vpop.eup %2841 }
 0x654   :  { %1875 = vmatpush.msrb.mxu3 %v4301_v44  ;;  %v1655_v28 = vadd.f32 1.0, %v2842_v19 }
 0x655   :  { %1833 = vmatpush.msra.mxu1 %v4151_v21  ;;  %1750 = vmatpush.msra.mxu0 %v4317_v12 }
 0x656   :  { %1876 = vmatpush.msrb.mxu3 %v4317_v12  ;;  %2843 = vrcp.f32 %v1655_v28  ;;  %vm1662_vm4 = vweird.f32 %v1655_v28 }
 0x657   :  { %1834 = vmatpush.msra.mxu1 %v4154_v47  ;;  %1751 = vmatpush.msra.mxu0 %v4322_v41 }
 0x658   :  { %1877 = vmatpush.msrb.mxu3 %v4322_v41 }
 0x659   :  { %1835 = vmatpush.msra.mxu1 %v4159_v20  ;;  %1752 = vmatpush.msra.mxu0 %v4330_v16 }
 0x65a   :  { %v1508_v11 = vld [vmem:[#allocation2 + $0x8] sm:$0xff]  ;;  %1878 = vmatpush.msrb.mxu3 %v4330_v16 }
 0x65b   :  { %1535 = vmatmul.f32.gmra.mxu0 %v1508_v11  ;;  %1558 = vmatmul.f32.gmra.mxu1 %v1508_v11 }
 0x65c   :  { %1581 = vmatmul.f32.gmra.mxu2 %v1508_v11  ;;  %1836 = vmatpush.msra.mxu1 %v4164_v53  ;;  %v2844_v40 = vpop.eup %2843  ;;  %v4451_v11 = vadd.f32 %v1556_v0, %v4892_v15  ;;  %v1668_v0 = vand.u32 2147483648, %v1655_v28 }
 0x65d   :  { %1753 = vmatpush.msra.mxu0 %v4340_v48  ;;  %1879 = vmatpush.msrb.mxu3 %v4340_v48  ;;  %v1658_v7 = vmul.f32 %v2844_v40, %v1655_v28  ;;  %vm1663_vm3 = vweird.f32 %v2844_v40  ;;  %v1666_v48 = vand.u32 2147483647, %v1655_v28 }
 0x65e   :  { %1837 = vmatpush.msra.mxu1 %v4166_v24  ;;  %4942 = vst [vmem:[#allocation39_spill] sm:$0xff] %v4451_v11  ;;  %vm1664_vm5 = vmor %vm1662_vm4, %vm1663_vm3 }
 0x65f   :  { %v1659_v52 = vsub.f32 1.0, %v1658_v7  ;;  %vm1667_vm6 = vcmp.eq.f32.partialorder %v1666_v48, 8.507059e+37 }
 0x660   :  { %1838 = vmatpush.msra.mxu1 %v4169_v14 }
 0x661   :  { %v1660_v19 = vmul.f32 %v2844_v40, %v1659_v52  ;;  %v4902_v52 = vperm.slane %v4438_v1, 2 }
 0x662   :  { %1839 = vmatpush.msra.mxu1 %v4173_v43 }
 0x663   :  { %1623 = vmatmul.f32.vlgmr.msrb.gmra.mxu0 %v4189_v37  ;;  %1643 = vmatmul.f32.vlgmr.msrb.gmra.mxu1 %v4189_v37  ;;  %v1661_v46 = vadd.f32 %v2844_v40, %v1660_v19 }
 0x664   :  { %1949 = vmatpush.msrb.mxu0 %v4123_v29  ;;  %1969 = vmatpush.msrb.mxu1 %v4208_v34 }
 0x666   :  { %1950 = vmatpush.msrb.mxu0 %v4126_v8  ;;  %1970 = vmatpush.msrb.mxu1 %v4214_v57 }
 0x668   :  { %1951 = vmatpush.msrb.mxu0 %v4129_v56  ;;  %1971 = vmatpush.msrb.mxu1 %v4223_v4 }
 0x66a   :  { %1952 = vmatpush.msrb.mxu0 %v4131_v54  ;;  %1972 = vmatpush.msrb.mxu1 %v4231_v59 }
 0x66c   :  { %1953 = vmatpush.msrb.mxu0 %v4134_v61  ;;  %1973 = vmatpush.msrb.mxu1 %v4241_v32 }
 0x66e   :  { %1954 = vmatpush.msrb.mxu0 %v4139_v25  ;;  %1974 = vmatpush.msrb.mxu1 %v4250_v39 }
 0x670   :  { %1955 = vmatpush.msrb.mxu0 %v4142_v62  ;;  %1975 = vmatpush.msrb.mxu1 %v4258_v42 }
 0x672   :  { %1956 = vmatpush.msrb.mxu0 %v4145_v6  ;;  %1976 = vmatpush.msrb.mxu1 %v4268_v3 }
 0x674   :  { %1957 = vmatpush.msrb.mxu0 %v4148_v17  ;;  %1977 = vmatpush.msrb.mxu1 %v4272_v36 }
 0x676   :  { %1958 = vmatpush.msrb.mxu0 %v4151_v21  ;;  %1978 = vmatpush.msrb.mxu1 %v4281_v63 }
 0x678   :  { %1959 = vmatpush.msrb.mxu0 %v4154_v47  ;;  %1979 = vmatpush.msrb.mxu1 %v4290_v23 }
 0x67a   :  { %1960 = vmatpush.msrb.mxu0 %v4159_v20  ;;  %1980 = vmatpush.msrb.mxu1 %v4299_v38 }
 0x67c   :  { %1961 = vmatpush.msrb.mxu0 %v4164_v53  ;;  %1981 = vmatpush.msrb.mxu1 %v4315_v5 }
 0x67e   :  { %1962 = vmatpush.msrb.mxu0 %v4166_v24  ;;  %1982 = vmatpush.msrb.mxu1 %v4320_v18 }
 0x680   :  { %1963 = vmatpush.msrb.mxu0 %v4169_v14  ;;  %1983 = vmatpush.msrb.mxu1 %v4328_v10 }
 0x682   :  { %1964 = vmatpush.msrb.mxu0 %v4173_v43  ;;  %1984 = vmatpush.msrb.mxu1 %v4338_v50 }
 0x6d8   :  { %v4446_v33 = vpop.f32.mrf.mxu0  ;;  %v4453_v49 = vpop.f32.mrf.mxu1 }
 0x6d9   :  { %4941 = vst [vmem:[#allocation42_spill] sm:$0xff] %v4446_v33  ;;  %v4459_v33 = vld [vmem:[%s4856_s6 + $0x1] ss:$0 sm:$0xff] }
 0x6da   :  { %4943 = vst [vmem:[#allocation41_spill] sm:$0xff] %v4453_v49 }
 0x6e0   :  { %v1624_v13 = vpop.f32.mrf.mxu0  ;;  %v1644_v43 = vpop.f32.mrf.mxu1 }
 0x6e1   :  { %v1648_v55 = vadd.f32 %v1624_v13, %v4451_v11  ;;  %v1665_v13 = vsel %vm1664_vm5, %v2844_v40, %v1661_v46  ;;  %v1687_v7 = vadd.f32 %v4459_v33, %v1644_v43 }
 0x6e3   :  { %v2721_v31 = vmul.f32 -1.442695, %v1648_v55  ;;  %v1669_v55 = vor.u32 1.1754944e-38, %v1668_v0 }
 0x6e5   :  { %2845 = vpow2.f32 %v2721_v31  ;;  %v1579_v31 = vpop.f32.mrf.mxu2  ;;  %v1670_v49 = vsel %vm1667_vm6, %v1669_v55, %v1665_v13 }
 0x6e6   :  { %v1688_v11 = vmul.f32 %v1687_v7, %v1670_v49  ;;  %v4465_v10 = vadd.f32 %v1579_v31, %v4902_v52 }
 0x6e8   :  { %v1689_v28 = vadd.f32 %v1688_v11, %v4465_v10  ;;  %v1695_v11 = vld [vmem:[#allocation2] sm:$0x3] }
 0x6eb   :  { %v2846_v50 = vpop.eup %2845 }
 0x6ec   :  { %v1656_v15 = vadd.f32 1.0, %v2846_v50 }
 0x6ee   :  { %2847 = vrcp.f32 %v1656_v15  ;;  %v1683_v16 = vand.u32 2147483648, %v1656_v15  ;;  %v1681_v43 = vand.u32 2147483647, %v1656_v15  ;;  %vm1677_vm8 = vweird.f32 %v1656_v15 }
 0x6ef   :  { %2849 = vtanh.f32 %v1689_v28 }
 0x6f0   :  { %v1684_v48 = vor.u32 1.1754944e-38, %v1683_v16  ;;  %vm1682_vm10 = vcmp.eq.f32.partialorder %v1681_v43, 8.507059e+37 }
 0x6f4   :  { %v2848_v19 = vpop.eup %2847 }
 0x6f5   :  { %v1673_v50 = vmul.f32 %v2848_v19, %v1656_v15  ;;  %vm1678_vm7 = vweird.f32 %v2848_v19  ;;  %v2850_v7 = vpop.eup %2849 }
 0x6f6   :  { %vm1679_vm9 = vmor %vm1677_vm8, %vm1678_vm7 }
 0x6f7   :  { %v1674_v14 = vsub.f32 1.0, %v1673_v50 }
 0x6f9   :  { %v1675_v46 = vmul.f32 %v2848_v19, %v1674_v14 }
 0x6fb   :  { %v1676_v40 = vadd.f32 %v2848_v19, %v1675_v46 }
 0x6fd   :  { %v1680_v49 = vsel %vm1679_vm9, %v2848_v19, %v1676_v40 }
 0x6fe   :  { %v1685_v0 = vsel %vm1682_vm10, %v1684_v48, %v1680_v49 }
 0x6ff   :  { %v1691_v13 = vsub.f32 1.0, %v1685_v0  ;;  %v1693_v31 = vmul.f32 %v1685_v0, %v4189_v37 }
 0x701   :  { %v1692_v55 = vmul.f32 %v2850_v7, %v1691_v13 }
 0x703   :  { %v4469_v52 = vadd.f32 %v1693_v31, %v1692_v55 }
 0x705   :  { %v1696_v14 = vadd.f32 %v1695_v11, %v4469_v52  ;;  %1714 = vmatmul.f32.vlgmr.msra.gmra.mxu2 %v4469_v52  ;;  %1734 = vmatmul.f32.vlgmr.msra.gmra.mxu3 %v4469_v52 }
 0x706   :  { %1754 = vmatmul.f32.vlgmr.msra.gmra.mxu0 %v4469_v52  ;;  %1989 = vmatpush.msra.mxu2 %v4210_v9 }
 0x707   :  { %1697 = vst [vmem:[#allocation2] sm:$0x3] %v1696_v14  ;;  %2074 = vmatpush.msra.mxu3 %v4123_v29  ;;  %2094 = vmatpush.msra.mxu0 %v4208_v34  ;;  %v4944_v29 = vld [vmem:[#allocation32_spill] sm:$0xff] }
 0x708   :  { %1990 = vmatpush.msra.mxu2 %v4216_v26 }
 0x709   :  { %2075 = vmatpush.msra.mxu3 %v4126_v8  ;;  %2095 = vmatpush.msra.mxu0 %v4214_v57  ;;  %v4945_v8 = vld [vmem:[#allocation31_spill] sm:$0xff] }
 0x70a   :  { %1991 = vmatpush.msra.mxu2 %v4225_v51 }
 0x70b   :  { %2076 = vmatpush.msra.mxu3 %v4129_v56  ;;  %2096 = vmatpush.msra.mxu0 %v4223_v4  ;;  %v4946_v56 = vld [vmem:[#allocation36_spill] sm:$0xff] }
 0x70c   :  { %1992 = vmatpush.msra.mxu2 %v4233_v60 }
 0x70d   :  { %2077 = vmatpush.msra.mxu3 %v4131_v54  ;;  %2097 = vmatpush.msra.mxu0 %v4231_v59  ;;  %v4947_v54 = vld [vmem:[#allocation38_spill] sm:$0xff] }
 0x70e   :  { %1993 = vmatpush.msra.mxu2 %v4243_v22 }
 0x70f   :  { %2078 = vmatpush.msra.mxu3 %v4134_v61  ;;  %2098 = vmatpush.msra.mxu0 %v4241_v32  ;;  %v4948_v61 = vld [vmem:[#allocation33_spill] sm:$0xff] }
 0x710   :  { %1994 = vmatpush.msra.mxu2 %v4252_v30 }
 0x711   :  { %2079 = vmatpush.msra.mxu3 %v4139_v25  ;;  %2099 = vmatpush.msra.mxu0 %v4250_v39  ;;  %v4949_v25 = vld [vmem:[#allocation34_spill] sm:$0xff] }
 0x712   :  { %1995 = vmatpush.msra.mxu2 %v4260_v45 }
 0x713   :  { %2080 = vmatpush.msra.mxu3 %v4142_v62  ;;  %2100 = vmatpush.msra.mxu0 %v4258_v42  ;;  %v4523_v62 = vpop.f32.mrf.mxu2 }
 0x714   :  { %1996 = vmatpush.msra.mxu2 %v4270_v35  ;;  %4950 = vst [vmem:[#allocation37_spill] sm:$0xff] %v4523_v62 }
 0x715   :  { %2081 = vmatpush.msra.mxu3 %v4145_v6  ;;  %2101 = vmatpush.msra.mxu0 %v4268_v3 }
 0x716   :  { %1997 = vmatpush.msra.mxu2 %v4278_v58 }
 0x717   :  { %2082 = vmatpush.msra.mxu3 %v4148_v17  ;;  %2102 = vmatpush.msra.mxu0 %v4272_v36 }
 0x718   :  { %1998 = vmatpush.msra.mxu2 %v4283_v2 }
 0x719   :  { %2083 = vmatpush.msra.mxu3 %v4151_v21  ;;  %2103 = vmatpush.msra.mxu0 %v4281_v63 }
 0x71a   :  { %1999 = vmatpush.msra.mxu2 %v4292_v27 }
 0x71b   :  { %2084 = vmatpush.msra.mxu3 %v4154_v47  ;;  %2104 = vmatpush.msra.mxu0 %v4290_v23 }
 0x71c   :  { %2000 = vmatpush.msra.mxu2 %v4301_v44 }
 0x71d   :  { %2085 = vmatpush.msra.mxu3 %v4159_v20  ;;  %2105 = vmatpush.msra.mxu0 %v4299_v38  ;;  %v4951_v20 = vld [vmem:[#allocation40_spill] sm:$0xff] }
 0x71e   :  { %2001 = vmatpush.msra.mxu2 %v4317_v12 }
 0x71f   :  { %2086 = vmatpush.msra.mxu3 %v4164_v53  ;;  %2106 = vmatpush.msra.mxu0 %v4315_v5 }
 0x720   :  { %2002 = vmatpush.msra.mxu2 %v4322_v41 }
 0x721   :  { %2087 = vmatpush.msra.mxu3 %v4166_v24  ;;  %2107 = vmatpush.msra.mxu0 %v4320_v18  ;;  %v4952_v24 = vld [vmem:[#allocation39_spill] sm:$0xff] }
 0x722   :  { %2003 = vmatpush.msra.mxu2 %v4944_v29 }
 0x723   :  { %2088 = vmatpush.msra.mxu3 %v4945_v8  ;;  %2108 = vmatpush.msra.mxu0 %v4946_v56 }
 0x724   :  { %2004 = vmatpush.msra.mxu2 %v4947_v54 }
 0x725   :  { %2089 = vmatpush.msra.mxu3 %v4948_v61  ;;  %2109 = vmatpush.msra.mxu0 %v4949_v25 }
 0x783   :  { %v1755_v49 = vpop.f32.mrf.mxu0 }
 0x784   :  { %v1804_v31 = vadd.f32 %v4459_v33, %v1755_v49 }
 0x788   :  { %v1715_v6 = vpop.f32.mrf.mxu2  ;;  %v1735_v17 = vpop.f32.mrf.mxu3 }
 0x789   :  { %v1760_v21 = vrot.slane %v1715_v6, 6  ;;  %v1761_v47 = vrot.slane %v1735_v17, 6  ;;  %v1806_v17 = vrot.slane %v1804_v31, 6 }
 0x78b   :  { %v1764_v53 = vadd.f32 %v1760_v21, %v4951_v20  ;;  %v1765_v37 = vadd.f32 %v1761_v47, %v4952_v24 }
 0x78d   :  { %v2722_v16 = vmul.f32 -1.442695, %v1764_v53  ;;  %v2723_v15 = vmul.f32 -1.442695, %v1765_v37 }
 0x78f   :  { %2851 = vpow2.f32 %v2722_v16 }
 0x790   :  { %2853 = vpow2.f32 %v2723_v15 }
 0x795   :  { %v2852_v19 = vpop.eup %2851 }
 0x796   :  { %v2854_v50 = vpop.eup %2853  ;;  %v1772_v28 = vadd.f32 1.0, %v2852_v19 }
 0x797   :  { %v1773_v46 = vadd.f32 1.0, %v2854_v50 }
 0x798   :  { %2855 = vrcp.f32 %v1772_v28  ;;  %v1785_v7 = vand.u32 2147483648, %v1772_v28  ;;  %v1783_v14 = vand.u32 2147483647, %v1772_v28  ;;  %vm1779_vm12 = vweird.f32 %v1772_v28 }
 0x799   :  { %2857 = vrcp.f32 %v1773_v46  ;;  %v1800_v37 = vand.u32 2147483648, %v1773_v46  ;;  %vm1794_vm0 = vweird.f32 %v1773_v46  ;;  %v1798_v15 = vand.u32 2147483647, %v1773_v46 }
 0x79a   :  { %v1786_v6 = vor.u32 1.1754944e-38, %v1785_v7  ;;  %vm1784_vm14 = vcmp.eq.f32.partialorder %v1783_v14, 8.507059e+37  ;;  %v4544_v14 = vld [vmem:[#allocation9 + $0x2b8] sm:$0xff] }
 0x79b   :  { %vm1799_vm2 = vcmp.eq.f32.partialorder %v1798_v15, 8.507059e+37 }
 0x79e   :  { %v2856_v43 = vpop.eup %2855 }
 0x79f   :  { %v2858_v40 = vpop.eup %2857  ;;  %v1775_v48 = vmul.f32 %v2856_v43, %v1772_v28  ;;  %vm1780_vm11 = vweird.f32 %v2856_v43 }
 0x7a0   :  { %v1790_v0 = vmul.f32 %v2858_v40, %v1773_v46  ;;  %vm1781_vm13 = vmor %vm1779_vm12, %vm1780_vm11  ;;  %vm1795_vm15 = vweird.f32 %v2858_v40 }
 0x7a1   :  { %v1776_v13 = vsub.f32 1.0, %v1775_v48  ;;  %vm1796_vm1 = vmor %vm1794_vm0, %vm1795_vm15  ;;  %v1801_v48 = vor.u32 1.1754944e-38, %v1800_v37 }
 0x7a2   :  { %v1791_v55 = vsub.f32 1.0, %v1790_v0  ;;  %v1814_v0 = vrot.slane %v4469_v52, 6  ;;  %v4539_v52 = vld [vmem:[#allocation9 + $0x2d0] sm:$0xff] }
 0x7a3   :  { %v1777_v11 = vmul.f32 %v2856_v43, %v1776_v13 }
 0x7a4   :  { %v1792_v8 = vmul.f32 %v2858_v40, %v1791_v55 }
 0x7a5   :  { %v1778_v61 = vadd.f32 %v2856_v43, %v1777_v11  ;;  %v1818_v11 = vld [vmem:[#allocation2 + $0x2] sm:$0x3] }
 0x7a6   :  { %v1793_v53 = vadd.f32 %v2858_v40, %v1792_v8  ;;  %v4604_v8 = vld [vmem:[#allocation9 + $0x198] sm:$0xff] }
 0x7a7   :  { %v1782_v21 = vsel %vm1781_vm13, %v2856_v43, %v1778_v61  ;;  %v4609_v61 = vld [vmem:[#allocation9 + $0x180] sm:$0xff] }
 0x7a8   :  { %v1787_v47 = vsel %vm1784_vm14, %v1786_v6, %v1782_v21  ;;  %v1797_v50 = vsel %vm1796_vm1, %v2858_v40, %v1793_v53  ;;  %v4534_v40 = vld [vmem:[#allocation9 + $0x2e8] sm:$0xff] }
 0x7a9   :  { %v1808_v16 = vmul.f32 %v1806_v17, %v1787_v47  ;;  %v1802_v28 = vsel %vm1799_vm2, %v1801_v48, %v1797_v50 }
 0x7aa   :  { %v1811_v49 = vsub.f32 1.0, %v1802_v28  ;;  %v1816_v7 = vmul.f32 %v1814_v0, %v1802_v28 }
 0x7ab   :  { %v1809_v19 = vadd.f32 %v1808_v16, %v4465_v10 }
 0x7ad   :  { %2859 = vtanh.f32 %v1809_v19 }
 0x7b3   :  { %v2860_v43 = vpop.eup %2859 }
 0x7b4   :  { %v1812_v13 = vmul.f32 %v2860_v43, %v1811_v49 }
 0x7b6   :  { %v4530_v55 = vadd.f32 %v1816_v7, %v1812_v13 }
 0x7b8   :  { %v1820_v31 = vrot.slane %v4530_v55, 2 }
 0x7ba   :  { %v1822_v46 = vadd.f32 %v1820_v31, %v1818_v11  ;;  %1840 = vmatmul.f32.vlgmr.msra.gmra.mxu1 %v1820_v31  ;;  %1860 = vmatmul.f32.vlgmr.msrb.gmra.mxu2 %v1820_v31 }
 0x7bb   :  { %1880 = vmatmul.f32.vlgmr.msrb.gmra.mxu3 %v1820_v31  ;;  %2114 = vmatpush.msra.mxu1 %v4210_v9  ;;  %v4549_v9 = vld [vmem:[#allocation9 + $0x2a0] sm:$0xff] }
 0x7bc   :  { %1823 = vst [vmem:[#allocation2 + $0x2] sm:$0x3] %v1822_v46  ;;  %2185 = vmatpush.msrb.mxu2 %v4534_v40  ;;  %2205 = vmatpush.msrb.mxu3 %v4208_v34  ;;  %v4554_v34 = vld [vmem:[#allocation9 + $0x288] sm:$0xff] }
 0x7bd   :  { %2115 = vmatpush.msra.mxu1 %v4216_v26  ;;  %v4564_v26 = vld [vmem:[#allocation9 + $0x258] sm:$0xff] }
 0x7be   :  { %2186 = vmatpush.msrb.mxu2 %v4539_v52  ;;  %2206 = vmatpush.msrb.mxu3 %v4214_v57  ;;  %v4559_v57 = vld [vmem:[#allocation9 + $0x270] sm:$0xff] }
 0x7bf   :  { %2116 = vmatpush.msra.mxu1 %v4225_v51  ;;  %v4574_v51 = vld [vmem:[#allocation9 + $0x228] sm:$0xff] }
 0x7c0   :  { %2187 = vmatpush.msrb.mxu2 %v4544_v14  ;;  %2207 = vmatpush.msrb.mxu3 %v4223_v4  ;;  %v4569_v4 = vld [vmem:[#allocation9 + $0x240] sm:$0xff] }
 0x7c1   :  { %2117 = vmatpush.msra.mxu1 %v4233_v60  ;;  %v4584_v60 = vld [vmem:[#allocation9 + $0x1f8] sm:$0xff] }
 0x7c2   :  { %2188 = vmatpush.msrb.mxu2 %v4549_v9  ;;  %2208 = vmatpush.msrb.mxu3 %v4231_v59  ;;  %v4579_v59 = vld [vmem:[#allocation9 + $0x210] sm:$0xff] }
 0x7c3   :  { %2118 = vmatpush.msra.mxu1 %v4243_v22  ;;  %v4594_v22 = vld [vmem:[#allocation9 + $0x1c8] sm:$0xff] }
 0x7c4   :  { %2189 = vmatpush.msrb.mxu2 %v4554_v34  ;;  %2209 = vmatpush.msrb.mxu3 %v4241_v32  ;;  %v4589_v32 = vld [vmem:[#allocation9 + $0x1e0] sm:$0xff] }
 0x7c5   :  { %2119 = vmatpush.msra.mxu1 %v4252_v30 }
 0x7c6   :  { %2190 = vmatpush.msrb.mxu2 %v4559_v57  ;;  %2210 = vmatpush.msrb.mxu3 %v4250_v39  ;;  %v4599_v39 = vld [vmem:[#allocation9 + $0x1b0] sm:$0xff] }
 0x7c7   :  { %2120 = vmatpush.msra.mxu1 %v4260_v45 }
 0x7c8   :  { %2191 = vmatpush.msrb.mxu2 %v4564_v26  ;;  %2211 = vmatpush.msrb.mxu3 %v4258_v42 }
 0x7c9   :  { %2121 = vmatpush.msra.mxu1 %v4270_v35 }
 0x7ca   :  { %2192 = vmatpush.msrb.mxu2 %v4569_v4  ;;  %2212 = vmatpush.msrb.mxu3 %v4268_v3 }
 0x7cb   :  { %2122 = vmatpush.msra.mxu1 %v4278_v58 }
 0x7cc   :  { %2193 = vmatpush.msrb.mxu2 %v4574_v51  ;;  %2213 = vmatpush.msrb.mxu3 %v4272_v36 }
 0x7cd   :  { %2123 = vmatpush.msra.mxu1 %v4283_v2 }
 0x7ce   :  { %2194 = vmatpush.msrb.mxu2 %v4579_v59  ;;  %2214 = vmatpush.msrb.mxu3 %v4281_v63 }
 0x7cf   :  { %2124 = vmatpush.msra.mxu1 %v4292_v27 }
 0x7d0   :  { %2195 = vmatpush.msrb.mxu2 %v4584_v60  ;;  %2215 = vmatpush.msrb.mxu3 %v4290_v23 }
 0x7d1   :  { %2125 = vmatpush.msra.mxu1 %v4301_v44 }
 0x7d2   :  { %2196 = vmatpush.msrb.mxu2 %v4589_v32  ;;  %2216 = vmatpush.msrb.mxu3 %v4299_v38 }
 0x7d3   :  { %2126 = vmatpush.msra.mxu1 %v4317_v12 }
 0x7d4   :  { %2197 = vmatpush.msrb.mxu2 %v4594_v22  ;;  %2217 = vmatpush.msrb.mxu3 %v4315_v5 }
 0x7d5   :  { %2127 = vmatpush.msra.mxu1 %v4322_v41 }
 0x7d6   :  { %2198 = vmatpush.msrb.mxu2 %v4599_v39  ;;  %2218 = vmatpush.msrb.mxu3 %v4320_v18 }
 0x7d7   :  { %2128 = vmatpush.msra.mxu1 %v4944_v29 }
 0x7d8   :  { %2199 = vmatpush.msrb.mxu2 %v4604_v8  ;;  %2219 = vmatpush.msrb.mxu3 %v4946_v56 }
 0x7d9   :  { %2129 = vmatpush.msra.mxu1 %v4947_v54 }
 0x7da   :  { %2200 = vmatpush.msrb.mxu2 %v4609_v61  ;;  %2220 = vmatpush.msrb.mxu3 %v4949_v25 }
 0x837   :  { %v1841_v6 = vpop.f32.mrf.mxu1 }
 0x838   :  { %v1886_v17 = vrot.slane %v1841_v6, 4 }
 0x83a   :  { %v1890_v21 = vadd.f32 %v1886_v17, %v4951_v20 }
 0x83c   :  { %v2724_v47 = vmul.f32 -1.442695, %v1890_v21 }
 0x83d   :  { %v1861_v53 = vpop.f32.mrf.mxu2 }
 0x83e   :  { %2861 = vpow2.f32 %v2724_v47  ;;  %v1887_v37 = vrot.slane %v1861_v53, 4  ;;  %v1881_v43 = vpop.f32.mrf.mxu3 }
 0x83f   :  { %v1930_v46 = vadd.f32 %v4459_v33, %v1881_v43 }
 0x840   :  { %v1891_v16 = vadd.f32 %v1887_v37, %v4952_v24 }
 0x842   :  { %v2725_v15 = vmul.f32 -1.442695, %v1891_v16  ;;  %v1932_v16 = vrot.slane %v1930_v46, 4 }
 0x844   :  { %v2862_v19 = vpop.eup %2861  ;;  %2863 = vpow2.f32 %v2725_v15 }
 0x845   :  { %v1898_v50 = vadd.f32 1.0, %v2862_v19 }
 0x847   :  { %2865 = vrcp.f32 %v1898_v50  ;;  %v1911_v7 = vand.u32 2147483648, %v1898_v50  ;;  %v1909_v11 = vand.u32 2147483647, %v1898_v50  ;;  %vm1905_vm4 = vweird.f32 %v1898_v50 }
 0x849   :  { %v1912_v47 = vor.u32 1.1754944e-38, %v1911_v7  ;;  %vm1910_vm6 = vcmp.eq.f32.partialorder %v1909_v11, 8.507059e+37 }
 0x84a   :  { %v2864_v48 = vpop.eup %2863 }
 0x84b   :  { %v1899_v28 = vadd.f32 1.0, %v2864_v48 }
 0x84d   :  { %v2866_v49 = vpop.eup %2865  ;;  %2867 = vrcp.f32 %v1899_v28  ;;  %vm1920_vm8 = vweird.f32 %v1899_v28 }
 0x84e   :  { %v1901_v0 = vmul.f32 %v2866_v49, %v1898_v50  ;;  %vm1906_vm3 = vweird.f32 %v2866_v49 }
 0x84f   :  { %vm1907_vm5 = vmor %vm1905_vm4, %vm1906_vm3 }
 0x850   :  { %v1902_v13 = vsub.f32 1.0, %v1901_v0  ;;  %v1926_v0 = vand.u32 2147483648, %v1899_v28 }
 0x852   :  { %v1903_v31 = vmul.f32 %v2866_v49, %v1902_v13  ;;  %v1924_v13 = vand.u32 2147483647, %v1899_v28  ;;  %v1927_v50 = vor.u32 1.1754944e-38, %v1926_v0  ;;  %v4646_v0 = vld [vmem:[#allocation9 + $0x2a8] sm:$0xff] }
 0x853   :  { %v2868_v6 = vpop.eup %2867 }
 0x854   :  { %v1916_v17 = vmul.f32 %v2868_v6, %v1899_v28  ;;  %v1904_v21 = vadd.f32 %v2866_v49, %v1903_v31  ;;  %vm1921_vm7 = vweird.f32 %v2868_v6  ;;  %vm1925_vm10 = vcmp.eq.f32.partialorder %v1924_v13, 8.507059e+37  ;;  %v1943_v28 = vld [vmem:[#allocation2 + $0x4] sm:$0x3]  ;;  %v4649_v13 = vld [vmem:[#allocation9 + $0x298] sm:$0xff] }
 0x855   :  { %vm1922_vm9 = vmor %vm1920_vm8, %vm1921_vm7 }
 0x856   :  { %v1917_v53 = vsub.f32 1.0, %v1916_v17  ;;  %v1908_v37 = vsel %vm1907_vm5, %v2866_v49, %v1904_v21  ;;  %v1939_v49 = vrot.slane %v4530_v55, 6  ;;  %v4625_v55 = vld [vmem:[#allocation9 + $0x2f0] sm:$0xff] }
 0x857   :  { %v1913_v15 = vsel %vm1910_vm6, %v1912_v47, %v1908_v37 }
 0x858   :  { %v1918_v19 = vmul.f32 %v2868_v6, %v1917_v53  ;;  %v1934_v48 = vmul.f32 %v1932_v16, %v1913_v15  ;;  %v4632_v16 = vld [vmem:[#allocation9 + $0x2d8] sm:$0xff]  ;;  %v4635_v15 = vld [vmem:[#allocation9 + $0x2c8] sm:$0xff] }
 0x85a   :  { %v1935_v62 = vadd.f32 %v1934_v48, %v4465_v10  ;;  %v1919_v43 = vadd.f32 %v2868_v6, %v1918_v19  ;;  %v4639_v19 = vld [vmem:[#allocation9 + $0x2c0] sm:$0xff]  ;;  %v4642_v48 = vld [vmem:[#allocation9 + $0x2b0] sm:$0xff] }
 0x85c   :  { %2869 = vtanh.f32 %v1935_v62  ;;  %v1923_v31 = vsel %vm1922_vm9, %v2868_v6, %v1919_v43  ;;  %v4621_v62 = vld [vmem:[#allocation9 + $0x2f8] sm:$0xff]  ;;  %v4628_v6 = vld [vmem:[#allocation9 + $0x2e0] sm:$0xff]  ;;  %v4653_v43 = vld [vmem:[#allocation9 + $0x290] sm:$0xff] }
 0x85d   :  { %v1928_v7 = vsel %vm1925_vm10, %v1927_v50, %v1923_v31  ;;  %v4658_v31 = vld [vmem:[#allocation9 + $0x278] sm:$0xff] }
 0x85e   :  { %v1937_v11 = vsub.f32 1.0, %v1928_v7  ;;  %v1941_v21 = vmul.f32 %v1939_v49, %v1928_v7 }
 0x862   :  { %v2870_v46 = vpop.eup %2869 }
 0x863   :  { %v1938_v17 = vmul.f32 %v2870_v46, %v1937_v11 }
 0x865   :  { %v4618_v47 = vadd.f32 %v1941_v21, %v1938_v17 }
 0x867   :  { %v1945_v53 = vrot.slane %v4618_v47, 4 }
 0x869   :  { %v1947_v37 = vadd.f32 %v1945_v53, %v1943_v28  ;;  %1965 = vmatmul.f32.vlgmr.msrb.gmra.mxu0 %v1945_v53  ;;  %1985 = vmatmul.f32.vlgmr.msrb.gmra.mxu1 %v1945_v53 }
 0x86a   :  { %2005 = vmatmul.f32.vlgmr.msra.gmra.mxu2 %v1945_v53  ;;  %2225 = vmatpush.msrb.mxu0 %v4621_v62 }
 0x86b   :  { %1948 = vst [vmem:[#allocation2 + $0x4] sm:$0x3] %v1947_v37  ;;  %2311 = vmatpush.msrb.mxu1 %v4534_v40  ;;  %2331 = vmatpush.msra.mxu2 %v4625_v55 }
 0x86c   :  { %2226 = vmatpush.msrb.mxu0 %v4628_v6 }
 0x86d   :  { %2312 = vmatpush.msrb.mxu1 %v4539_v52  ;;  %2332 = vmatpush.msra.mxu2 %v4632_v16 }
 0x86e   :  { %2227 = vmatpush.msrb.mxu0 %v4635_v15 }
 0x86f   :  { %2313 = vmatpush.msrb.mxu1 %v4544_v14  ;;  %2333 = vmatpush.msra.mxu2 %v4639_v19 }
 0x870   :  { %2228 = vmatpush.msrb.mxu0 %v4642_v48 }
 0x871   :  { %2314 = vmatpush.msrb.mxu1 %v4549_v9  ;;  %2334 = vmatpush.msra.mxu2 %v4646_v0 }
 0x872   :  { %2229 = vmatpush.msrb.mxu0 %v4649_v13 }
 0x873   :  { %2315 = vmatpush.msrb.mxu1 %v4554_v34  ;;  %2335 = vmatpush.msra.mxu2 %v4653_v43 }
 0x874   :  { %2230 = vmatpush.msrb.mxu0 %v4252_v30 }
 0x875   :  { %2316 = vmatpush.msrb.mxu1 %v4559_v57  ;;  %2336 = vmatpush.msra.mxu2 %v4658_v31 }
 0x876   :  { %2231 = vmatpush.msrb.mxu0 %v4260_v45 }
 0x877   :  { %2317 = vmatpush.msrb.mxu1 %v4564_v26  ;;  %2337 = vmatpush.msra.mxu2 %v4258_v42 }
 0x878   :  { %2232 = vmatpush.msrb.mxu0 %v4270_v35 }
 0x879   :  { %2318 = vmatpush.msrb.mxu1 %v4569_v4  ;;  %2338 = vmatpush.msra.mxu2 %v4268_v3 }
 0x87a   :  { %2233 = vmatpush.msrb.mxu0 %v4278_v58 }
 0x87b   :  { %2319 = vmatpush.msrb.mxu1 %v4574_v51  ;;  %2339 = vmatpush.msra.mxu2 %v4272_v36 }
 0x87c   :  { %2234 = vmatpush.msrb.mxu0 %v4283_v2 }
 0x87d   :  { %2320 = vmatpush.msrb.mxu1 %v4579_v59  ;;  %2340 = vmatpush.msra.mxu2 %v4281_v63 }
 0x87e   :  { %2235 = vmatpush.msrb.mxu0 %v4292_v27 }
 0x87f   :  { %2321 = vmatpush.msrb.mxu1 %v4584_v60  ;;  %2341 = vmatpush.msra.mxu2 %v4290_v23 }
 0x880   :  { %2236 = vmatpush.msrb.mxu0 %v4301_v44 }
 0x881   :  { %2322 = vmatpush.msrb.mxu1 %v4589_v32  ;;  %2342 = vmatpush.msra.mxu2 %v4299_v38 }
 0x882   :  { %2237 = vmatpush.msrb.mxu0 %v4317_v12 }
 0x883   :  { %2323 = vmatpush.msrb.mxu1 %v4594_v22  ;;  %2343 = vmatpush.msra.mxu2 %v4315_v5 }
 0x884   :  { %2238 = vmatpush.msrb.mxu0 %v4322_v41 }
 0x885   :  { %2324 = vmatpush.msrb.mxu1 %v4599_v39  ;;  %2344 = vmatpush.msra.mxu2 %v4320_v18 }
 0x886   :  { %2239 = vmatpush.msrb.mxu0 %v4944_v29 }
 0x887   :  { %2325 = vmatpush.msrb.mxu1 %v4604_v8  ;;  %2345 = vmatpush.msra.mxu2 %v4946_v56 }
 0x888   :  { %2240 = vmatpush.msrb.mxu0 %v4947_v54 }
 0x889   :  { %2326 = vmatpush.msrb.mxu1 %v4609_v61  ;;  %2346 = vmatpush.msra.mxu2 %v4949_v25 }
 0x8e6   :  { %v1966_v30 = vpop.f32.mrf.mxu0  ;;  %v1986_v42 = vpop.f32.mrf.mxu1 }
 0x8e7   :  { %v2011_v45 = vrot.slane %v1966_v30, 2  ;;  %v2012_v3 = vrot.slane %v1986_v42, 2 }
 0x8e9   :  { %v2015_v35 = vadd.f32 %v2011_v45, %v4951_v20  ;;  %v2016_v36 = vadd.f32 %v2012_v3, %v4952_v24 }
 0x8eb   :  { %v2726_v58 = vmul.f32 -1.442695, %v2015_v35  ;;  %v2727_v63 = vmul.f32 -1.442695, %v2016_v36  ;;  %v2064_v35 = vrot.slane %v4618_v47, 6  ;;  %v4734_v47 = vld [vmem:[#allocation9 + $0x220] sm:$0xff] }
 0x8ed   :  { %2871 = vpow2.f32 %v2726_v58  ;;  %v2006_v41 = vpop.f32.mrf.mxu2 }
 0x8ee   :  { %2873 = vpow2.f32 %v2727_v63  ;;  %v2055_v24 = vadd.f32 %v4459_v33, %v2006_v41 }
 0x8f0   :  { %v2057_v46 = vrot.slane %v2055_v24, 2 }
 0x8f3   :  { %v2872_v2 = vpop.eup %2871 }
 0x8f4   :  { %v2874_v23 = vpop.eup %2873  ;;  %v2023_v27 = vadd.f32 1.0, %v2872_v2 }
 0x8f5   :  { %v2024_v38 = vadd.f32 1.0, %v2874_v23 }
 0x8f6   :  { %2875 = vrcp.f32 %v2023_v27  ;;  %v2036_v54 = vand.u32 2147483648, %v2023_v27  ;;  %v2034_v20 = vand.u32 2147483647, %v2023_v27  ;;  %vm2030_vm12 = vweird.f32 %v2023_v27 }
 0x8f7   :  { %2877 = vrcp.f32 %v2024_v38  ;;  %v2051_v53 = vand.u32 2147483648, %v2024_v38  ;;  %vm2045_vm0 = vweird.f32 %v2024_v38  ;;  %v2049_v37 = vand.u32 2147483647, %v2024_v38 }
 0x8f8   :  { %v2037_v49 = vor.u32 1.1754944e-38, %v2036_v54  ;;  %vm2035_vm14 = vcmp.eq.f32.partialorder %v2034_v20, 8.507059e+37 }
 0x8f9   :  { %v2052_v45 = vor.u32 1.1754944e-38, %v2051_v53  ;;  %vm2050_vm2 = vcmp.eq.f32.partialorder %v2049_v37, 8.507059e+37 }
 0x8fc   :  { %v2876_v44 = vpop.eup %2875 }
 0x8fd   :  { %v2878_v5 = vpop.eup %2877  ;;  %v2026_v12 = vmul.f32 %v2876_v44, %v2023_v27  ;;  %vm2031_vm11 = vweird.f32 %v2876_v44 }
 0x8fe   :  { %v2041_v18 = vmul.f32 %v2878_v5, %v2024_v38  ;;  %vm2032_vm13 = vmor %vm2030_vm12, %vm2031_vm11  ;;  %vm2046_vm15 = vweird.f32 %v2878_v5 }
 0x8ff   :  { %v2027_v29 = vsub.f32 1.0, %v2026_v12  ;;  %vm2047_vm1 = vmor %vm2045_vm0, %vm2046_vm15 }
 0x900   :  { %v2042_v56 = vsub.f32 1.0, %v2041_v18 }
 0x901   :  { %v2028_v25 = vmul.f32 %v2876_v44, %v2027_v29 }
 0x902   :  { %v2043_v50 = vmul.f32 %v2878_v5, %v2042_v56  ;;  %v4956_v56 = vld [vmem:[#allocation42_spill] sm:$0xff] }
 0x903   :  { %v2029_v7 = vadd.f32 %v2876_v44, %v2028_v25 }
 0x904   :  { %v2044_v21 = vadd.f32 %v2878_v5, %v2043_v50 }
 0x905   :  { %v2033_v11 = vsel %vm2032_vm13, %v2876_v44, %v2029_v7  ;;  %v2068_v44 = vld [vmem:[#allocation2 + $0x6] sm:$0x3] }
 0x906   :  { %v2038_v17 = vsel %vm2035_vm14, %v2037_v49, %v2033_v11  ;;  %v2048_v42 = vsel %vm2047_vm1, %v2878_v5, %v2044_v21  ;;  %v4954_v5 = vld [vmem:[#allocation41_spill] sm:$0xff] }
 0x907   :  { %v2059_v28 = vmul.f32 %v2057_v46, %v2038_v17  ;;  %v2053_v3 = vsel %vm2050_vm2, %v2052_v45, %v2048_v42 }
 0x908   :  { %v2062_v36 = vsub.f32 1.0, %v2053_v3  ;;  %v2066_v2 = vmul.f32 %v2064_v35, %v2053_v3 }
 0x909   :  { %v2060_v30 = vadd.f32 %v2059_v28, %v4465_v10  ;;  %v4717_v10 = vld [vmem:[#allocation9 + $0x280] sm:$0xff] }
 0x90b   :  { %2879 = vtanh.f32 %v2060_v30 }
 0x911   :  { %v2880_v58 = vpop.eup %2879 }
 0x912   :  { %v2063_v63 = vmul.f32 %v2880_v58, %v2062_v36 }
 0x914   :  { %v2067_v23 = vadd.f32 %v2066_v2, %v2063_v63 }
 0x916   :  { %v4696_v27 = vrot.slane %v2067_v23, 6 }
 0x918   :  { %v2072_v38 = vadd.f32 %v4696_v27, %v2068_v44  ;;  %2090 = vmatmul.f32.vlgmr.msra.gmra.mxu3 %v4696_v27  ;;  %2110 = vmatmul.f32.vlgmr.msra.gmra.mxu0 %v4696_v27  ;;  %v4957_v44 = vperm.slane %v4438_v1, 2 }
 0x919   :  { %2130 = vmatmul.f32.vlgmr.msra.gmra.mxu1 %v4696_v27  ;;  %2351 = vmatpush.msra.mxu3 %v4621_v62 }
 0x91a   :  { %2073 = vst [vmem:[#allocation2 + $0x6] sm:$0x3] %v2072_v38  ;;  %2436 = vmatpush.msra.mxu0 %v4534_v40  ;;  %2456 = vmatpush.msra.mxu1 %v4625_v55  ;;  %v4722_v40 = vld [vmem:[#allocation9 + $0x268] sm:$0xff]  ;;  %v4958_v38 = vld [vmem:[#allocation37_spill] sm:$0xff] }
 0x91b   :  { %2352 = vmatpush.msra.mxu3 %v4628_v6  ;;  %v4738_v55 = vld [vmem:[#allocation9 + $0x208] sm:$0xff] }
 0x91c   :  { %2437 = vmatpush.msra.mxu0 %v4539_v52  ;;  %2457 = vmatpush.msra.mxu1 %v4632_v16  ;;  %v2999_v52 = vld [vmem:[#allocation9 + $0x260] sm:$0xff]  ;;  %v4742_v16 = vld [vmem:[#allocation9 + $0x1f0] sm:$0xff] }
 0x91d   :  { %2353 = vmatpush.msra.mxu3 %v4635_v15 }
 0x91e   :  { %2438 = vmatpush.msra.mxu0 %v4544_v14  ;;  %2458 = vmatpush.msra.mxu1 %v4639_v19  ;;  %v4726_v14 = vld [vmem:[#allocation9 + $0x250] sm:$0xff]  ;;  %v4746_v19 = vld [vmem:[#allocation9 + $0x1d8] sm:$0xff] }
 0x91f   :  { %2354 = vmatpush.msra.mxu3 %v4642_v48 }
 0x920   :  { %2439 = vmatpush.msra.mxu0 %v4549_v9  ;;  %2459 = vmatpush.msra.mxu1 %v4646_v0  ;;  %v3001_v9 = vld [vmem:[#allocation9 + $0x248] sm:$0xff]  ;;  %v4750_v0 = vld [vmem:[#allocation9 + $0x1c0] sm:$0xff] }
 0x921   :  { %2355 = vmatpush.msra.mxu3 %v4649_v13 }
 0x922   :  { %2440 = vmatpush.msra.mxu0 %v4554_v34  ;;  %2460 = vmatpush.msra.mxu1 %v4653_v43  ;;  %v4730_v34 = vld [vmem:[#allocation9 + $0x238] sm:$0xff]  ;;  %v4754_v43 = vld [vmem:[#allocation9 + $0x1a8] sm:$0xff] }
 0x923   :  { %2356 = vmatpush.msra.mxu3 %v4717_v10 }
 0x924   :  { %2441 = vmatpush.msra.mxu0 %v4559_v57  ;;  %2461 = vmatpush.msra.mxu1 %v4658_v31  ;;  %v3003_v57 = vld [vmem:[#allocation9 + $0x230] sm:$0xff] }
 0x925   :  { %2357 = vmatpush.msra.mxu3 %v4722_v40  ;;  %v4758_v31 = vld [vmem:[#allocation9 + $0x190] sm:$0xff] }
 0x926   :  { %2442 = vmatpush.msra.mxu0 %v4564_v26  ;;  %2462 = vmatpush.msra.mxu1 %v2999_v52  ;;  %v3005_v26 = vld [vmem:[#allocation9 + $0x218] sm:$0xff]  ;;  %v4778_v52 = vadd.f32 %v4958_v38, %v4957_v44 }
 0x927   :  { %2358 = vmatpush.msra.mxu3 %v4726_v14 }
 0x928   :  { %2443 = vmatpush.msra.mxu0 %v4569_v4  ;;  %2463 = vmatpush.msra.mxu1 %v3001_v9  ;;  %v3007_v4 = vld [vmem:[#allocation9 + $0x200] sm:$0xff] }
 0x929   :  { %2359 = vmatpush.msra.mxu3 %v4730_v34 }
 0x92a   :  { %2444 = vmatpush.msra.mxu0 %v4574_v51  ;;  %2464 = vmatpush.msra.mxu1 %v3003_v57  ;;  %v3009_v51 = vld [vmem:[#allocation9 + $0x1e8] sm:$0xff] }
 0x92b   :  { %2360 = vmatpush.msra.mxu3 %v4734_v47 }
 0x92c   :  { %2445 = vmatpush.msra.mxu0 %v4579_v59  ;;  %2465 = vmatpush.msra.mxu1 %v3005_v26  ;;  %v3011_v59 = vld [vmem:[#allocation9 + $0x1d0] sm:$0xff] }
 0x92d   :  { %2361 = vmatpush.msra.mxu3 %v4738_v55 }
 0x92e   :  { %2446 = vmatpush.msra.mxu0 %v4584_v60  ;;  %2466 = vmatpush.msra.mxu1 %v3007_v4  ;;  %v3013_v60 = vld [vmem:[#allocation9 + $0x1b8] sm:$0xff] }
 0x92f   :  { %2362 = vmatpush.msra.mxu3 %v4742_v16 }
 0x930   :  { %2447 = vmatpush.msra.mxu0 %v4589_v32  ;;  %2467 = vmatpush.msra.mxu1 %v3009_v51  ;;  %v3015_v32 = vld [vmem:[#allocation9 + $0x1a0] sm:$0xff] }
 0x931   :  { %2363 = vmatpush.msra.mxu3 %v4746_v19 }
 0x932   :  { %2448 = vmatpush.msra.mxu0 %v4594_v22  ;;  %2468 = vmatpush.msra.mxu1 %v3011_v59  ;;  %v3017_v22 = vld [vmem:[#allocation9 + $0x188] sm:$0xff] }
 0x933   :  { %2364 = vmatpush.msra.mxu3 %v4750_v0 }
 0x934   :  { %2449 = vmatpush.msra.mxu0 %v4599_v39  ;;  %2469 = vmatpush.msra.mxu1 %v3013_v60  ;;  %v4953_v39 = vperm.slane %v4438_v1, 1 }
 0x935   :  { %2365 = vmatpush.msra.mxu3 %v4754_v43 }
 0x936   :  { %2450 = vmatpush.msra.mxu0 %v4604_v8  ;;  %2470 = vmatpush.msra.mxu1 %v3015_v32  ;;  %v4765_v12 = vadd.f32 %v4954_v5, %v4953_v39  ;;  %v4955_v8 = vperm.slane %v4438_v1, 0  ;;  %v2182_v5 = vld [vmem:[#allocation2 + $0x8] sm:$0x3] }
 0x937   :  { %2366 = vmatpush.msra.mxu3 %v4758_v31 }
 0x938   :  { %2451 = vmatpush.msra.mxu0 %v4609_v61  ;;  %2471 = vmatpush.msra.mxu1 %v3017_v22  ;;  %v4771_v54 = vadd.f32 %v4956_v56, %v4955_v8 }
 0x995   :  { %v2111_v18 = vpop.f32.mrf.mxu0 }
 0x996   :  { %v2135_v41 = vadd.f32 %v2111_v18, %v4765_v12  ;;  %v2131_v3 = vpop.f32.mrf.mxu1 }
 0x997   :  { %v2174_v58 = vadd.f32 %v4459_v33, %v2131_v3 }
 0x998   :  { %v2729_v29 = vmul.f32 -1.442695, %v2135_v41  ;;  %v2571_v41 = vld [vmem:[#allocation14 + $0x30] sm:$0xff] }
 0x99a   :  { %2881 = vpow2.f32 %v2729_v29 }
 0x99b   :  { %v2091_v25 = vpop.f32.mrf.mxu3 }
 0x99c   :  { %v2134_v61 = vadd.f32 %v2091_v25, %v4771_v54  ;;  %v2570_v25 = vld [vmem:[#allocation14 + $0x28] sm:$0xff] }
 0x99e   :  { %v2728_v20 = vmul.f32 -1.442695, %v2134_v61 }
 0x9a0   :  { %v2882_v24 = vpop.eup %2881  ;;  %2883 = vpow2.f32 %v2728_v20  ;;  %v2569_v20 = vld [vmem:[#allocation14 + $0x20] sm:$0xff] }
 0x9a1   :  { %v2143_v50 = vadd.f32 1.0, %v2882_v24  ;;  %v2568_v24 = vld [vmem:[#allocation14 + $0x18] sm:$0xff] }
 0x9a3   :  { %2885 = vrcp.f32 %v2143_v50  ;;  %v2170_v9 = vand.u32 2147483648, %v2143_v50  ;;  %vm2164_vm8 = vweird.f32 %v2143_v50  ;;  %v2168_v26 = vand.u32 2147483647, %v2143_v50 }
 0x9a5   :  { %v2171_v59 = vor.u32 1.1754944e-38, %v2170_v9  ;;  %vm2169_vm10 = vcmp.eq.f32.partialorder %v2168_v26, 8.507059e+37 }
 0x9a6   :  { %v2884_v7 = vpop.eup %2883 }
 0x9a7   :  { %v2142_v49 = vadd.f32 1.0, %v2884_v7 }
 0x9a9   :  { %2887 = vrcp.f32 %v2142_v49  ;;  %v2886_v11 = vpop.eup %2885  ;;  %v2155_v37 = vand.u32 2147483648, %v2142_v49  ;;  %v2153_v42 = vand.u32 2147483647, %v2142_v49  ;;  %vm2149_vm4 = vweird.f32 %v2142_v49 }
 0x9aa   :  { %v2160_v46 = vmul.f32 %v2886_v11, %v2143_v50  ;;  %vm2165_vm7 = vweird.f32 %v2886_v11  ;;  %v2567_v50 = vld [vmem:[#allocation14 + $0x10] sm:$0xff] }
 0x9ab   :  { %v2156_v36 = vor.u32 1.1754944e-38, %v2155_v37  ;;  %vm2154_vm6 = vcmp.eq.f32.partialorder %v2153_v42, 8.507059e+37  ;;  %vm2166_vm9 = vmor %vm2164_vm8, %vm2165_vm7  ;;  %v4809_v42 = vld [vmem:[%s4856_s6 + $0x1] ss:$0 sm:$0xff]  ;;  %s3341_s6 = smov [#allocation21]  }
 0x9ac   :  { %v2161_v53 = vsub.f32 1.0, %v2160_v46  ;;  %s2676_s15 = sshll.u32 %s3341_s6, 4  ;;  %s2677_s15 = int_to_ptr.vmem [resolvable:$true] %s2676_s15 }
 0x9ae   :  { %v2162_v45 = vmul.f32 %v2886_v11, %v2161_v53  ;;  %v2565_v53 = vld [vmem:[#allocation14] sm:$0xff] }
 0x9af   :  { %v2888_v17 = vpop.eup %2887 }
 0x9b0   :  { %v2145_v21 = vmul.f32 %v2888_v17, %v2142_v49  ;;  %vm2150_vm3 = vweird.f32 %v2888_v17  ;;  %v2163_v2 = vadd.f32 %v2886_v11, %v2162_v45  ;;  %v2566_v49 = vld [vmem:[#allocation14 + $0x8] sm:$0xff] }
 0x9b1   :  { %vm2151_vm5 = vmor %vm2149_vm4, %vm2150_vm3 }
 0x9b2   :  { %v2146_v28 = vsub.f32 1.0, %v2145_v21  ;;  %v2167_v51 = vsel %vm2166_vm9, %v2886_v11, %v2163_v2 }
 0x9b3   :  { %v2172_v33 = vsel %vm2169_vm10, %v2171_v59, %v2167_v51 }
 0x9b4   :  { %v2147_v30 = vmul.f32 %v2888_v17, %v2146_v28  ;;  %v2178_v60 = vsub.f32 1.0, %v2172_v33  ;;  %v2180_v1 = vmul.f32 %v2172_v33, %v4696_v27  ;;  %v2577_v27 = vld [vmem:[#allocation14 + $0x60] sm:$0xff] }
 0x9b6   :  { %v2148_v35 = vadd.f32 %v2888_v17, %v2147_v30 }
 0x9b8   :  { %v2152_v63 = vsel %vm2151_vm5, %v2888_v17, %v2148_v35 }
 0x9b9   :  { %v2157_v23 = vsel %vm2154_vm6, %v2156_v36, %v2152_v63 }
 0x9ba   :  { %v2175_v57 = vmul.f32 %v2174_v58, %v2157_v23 }
 0x9bc   :  { %v2176_v4 = vadd.f32 %v2175_v57, %v4778_v52 }
 0x9be   :  { %2889 = vtanh.f32 %v2176_v4 }
 0x9c4   :  { %v2890_v32 = vpop.eup %2889 }
 0x9c5   :  { %v2179_v22 = vmul.f32 %v2890_v32, %v2178_v60 }
 0x9c7   :  { %v4782_v39 = vadd.f32 %v2180_v1, %v2179_v22 }
 0x9c9   :  { %v2183_v18 = vadd.f32 %v2182_v5, %v4782_v39  ;;  %2201 = vmatmul.f32.vlgmr.msrb.gmra.mxu2 %v4782_v39  ;;  %2221 = vmatmul.f32.vlgmr.msrb.gmra.mxu3 %v4782_v39  ;;  %v2301_v32 = vrot.slane %v4782_v39, 6 }
 0x9ca   :  { %2241 = vmatmul.f32.vlgmr.msrb.gmra.mxu0 %v4782_v39  ;;  %2476 = vmatpush.msrb.mxu2 %v4621_v62  ;;  %v2580_v62 = vld [vmem:[#allocation14 + $0x78] sm:$0xff] }
 0x9cb   :  { %2184 = vst [vmem:[#allocation2 + $0x8] sm:$0x3] %v2183_v18  ;;  %2585 = vmatpush.msrb.mxu3 %v2580_v62 }
 0x9cc   :  { %2477 = vmatpush.msrb.mxu2 %v4628_v6  ;;  %v2579_v6 = vld [vmem:[#allocation14 + $0x70] sm:$0xff] }
 0x9cd   :  { %2586 = vmatpush.msrb.mxu3 %v2579_v6  ;;  %v2305_v6 = vld [vmem:[#allocation2 + $0xa] sm:$0x3] }
 0x9ce   :  { %2478 = vmatpush.msrb.mxu2 %v4635_v15 }
 0x9d0   :  { %2479 = vmatpush.msrb.mxu2 %v4642_v48 }
 0x9d2   :  { %2480 = vmatpush.msrb.mxu2 %v4649_v13  ;;  %v2578_v13 = vld [vmem:[#allocation14 + $0x68] sm:$0xff] }
 0x9d3   :  { %2587 = vmatpush.msrb.mxu3 %v2578_v13  ;;  %v2629_v13 = vld [vmem:[#allocation17 + $0x78] sm:$0xff] }
 0x9d4   :  { %2481 = vmatpush.msrb.mxu2 %v4717_v10  ;;  %2634 = vmatpush.msrb.mxu0 %v2629_v13 }
 0x9d5   :  { %2588 = vmatpush.msrb.mxu3 %v2577_v27  ;;  %v2628_v27 = vld [vmem:[#allocation17 + $0x70] sm:$0xff] }
 0x9d6   :  { %2482 = vmatpush.msrb.mxu2 %v4722_v40  ;;  %2635 = vmatpush.msrb.mxu0 %v2628_v27 }
 0x9d8   :  { %2483 = vmatpush.msrb.mxu2 %v4726_v14  ;;  %v2576_v14 = vld [vmem:[#allocation14 + $0x58] sm:$0xff] }
 0x9d9   :  { %2589 = vmatpush.msrb.mxu3 %v2576_v14  ;;  %v2626_v14 = vld [vmem:[#allocation17 + $0x60] sm:$0xff] }
 0x9da   :  { %2484 = vmatpush.msrb.mxu2 %v4730_v34 }
 0x9dc   :  { %2485 = vmatpush.msrb.mxu2 %v4734_v47 }
 0x9de   :  { %2486 = vmatpush.msrb.mxu2 %v4738_v55  ;;  %v2575_v55 = vld [vmem:[#allocation14 + $0x50] sm:$0xff] }
 0x9df   :  { %2590 = vmatpush.msrb.mxu3 %v2575_v55 }
 0x9e0   :  { %2487 = vmatpush.msrb.mxu2 %v4742_v16 }
 0x9e2   :  { %2488 = vmatpush.msrb.mxu2 %v4746_v19 }
 0x9e4   :  { %2489 = vmatpush.msrb.mxu2 %v4750_v0  ;;  %v2574_v0 = vld [vmem:[#allocation14 + $0x48] sm:$0xff] }
 0x9e5   :  { %2591 = vmatpush.msrb.mxu3 %v2574_v0  ;;  %v2623_v0 = vld [vmem:[#allocation17 + $0x48] sm:$0xff] }
 0x9e6   :  { %2490 = vmatpush.msrb.mxu2 %v4754_v43  ;;  %v2573_v43 = vld [vmem:[#allocation14 + $0x40] sm:$0xff] }
 0x9e7   :  { %2592 = vmatpush.msrb.mxu3 %v2573_v43 }
 0x9e8   :  { %2491 = vmatpush.msrb.mxu2 %v4758_v31  ;;  %v2572_v31 = vld [vmem:[#allocation14 + $0x38] sm:$0xff] }
 0x9e9   :  { %2593 = vmatpush.msrb.mxu3 %v2572_v31  ;;  %v2622_v31 = vld [vmem:[#allocation17 + $0x40] sm:$0xff] }
 0x9eb   :  { %2594 = vmatpush.msrb.mxu3 %v2571_v41 }
 0x9ed   :  { %2595 = vmatpush.msrb.mxu3 %v2570_v25 }
 0x9ef   :  { %2596 = vmatpush.msrb.mxu3 %v2569_v20  ;;  %v2619_v20 = vld [vmem:[#allocation17 + $0x28] sm:$0xff] }
 0x9f1   :  { %2597 = vmatpush.msrb.mxu3 %v2568_v24  ;;  %v2618_v24 = vld [vmem:[#allocation17 + $0x20] sm:$0xff] }
 0x9f3   :  { %2598 = vmatpush.msrb.mxu3 %v2567_v50 }
 0x9f5   :  { %2599 = vmatpush.msrb.mxu3 %v2566_v49  ;;  %v2617_v49 = vld [vmem:[#allocation17 + $0x18] sm:$0xff] }
 0x9f7   :  { %2600 = vmatpush.msrb.mxu3 %v2565_v53 }
 0xa47   :  { %v2242_v17 = vpop.f32.mrf.mxu0 }
 0xa48   :  { %v2291_v45 = vadd.f32 %v4809_v42, %v2242_v17  ;;  %v2615_v17 = vld [vmem:[#allocation17 + $0x8] sm:$0xff] }
 0xa4a   :  { %v2293_v2 = vrot.slane %v2291_v45, 6 }
 0xa4c   :  { %v2202_v15 = vpop.f32.mrf.mxu2  ;;  %v2222_v48 = vpop.f32.mrf.mxu3 }
 0xa4d   :  { %v2247_v10 = vrot.slane %v2202_v15, 6  ;;  %v2248_v40 = vrot.slane %v2222_v48, 6  ;;  %v2563_v48 = vld [vmem:[#allocation2] sm:$0xff] }
 0xa4f   :  { %v2251_v34 = vadd.f32 %v2247_v10, %v4771_v54  ;;  %v2252_v47 = vadd.f32 %v2248_v40, %v4765_v12  ;;  %v2627_v10 = vld [vmem:[#allocation17 + $0x68] sm:$0xff] }
 0xa50   :  { %2636 = vmatpush.msrb.mxu0 %v2627_v10 }
 0xa51   :  { %v2730_v16 = vmul.f32 -1.442695, %v2251_v34  ;;  %v2731_v19 = vmul.f32 -1.442695, %v2252_v47  ;;  %v2625_v47 = vld [vmem:[#allocation17 + $0x58] sm:$0xff] }
 0xa52   :  { %2637 = vmatpush.msrb.mxu0 %v2626_v14 }
 0xa53   :  { %2891 = vpow2.f32 %v2730_v16  ;;  %v2624_v16 = vld [vmem:[#allocation17 + $0x50] sm:$0xff] }
 0xa54   :  { %2893 = vpow2.f32 %v2731_v19  ;;  %2638 = vmatpush.msrb.mxu0 %v2625_v47 }
 0xa56   :  { %2639 = vmatpush.msrb.mxu0 %v2624_v16 }
 0xa58   :  { %2640 = vmatpush.msrb.mxu0 %v2623_v0 }
 0xa59   :  { %v2892_v29 = vpop.eup %2891 }
 0xa5a   :  { %v2894_v8 = vpop.eup %2893  ;;  %v2259_v56 = vadd.f32 1.0, %v2892_v29  ;;  %v2621_v29 = vld [vmem:[#allocation17 + $0x38] sm:$0xff]  ;;  %2641 = vmatpush.msrb.mxu0 %v2622_v31 }
 0xa5b   :  { %v2260_v61 = vadd.f32 1.0, %v2894_v8 }
 0xa5c   :  { %2895 = vrcp.f32 %v2259_v56  ;;  %v2272_v37 = vand.u32 2147483648, %v2259_v56  ;;  %v2270_v35 = vand.u32 2147483647, %v2259_v56  ;;  %vm2266_vm12 = vweird.f32 %v2259_v56  ;;  %2642 = vmatpush.msrb.mxu0 %v2621_v29  ;;  %v4830_v29 = vld [vmem:[#allocation18] ss:$0 sm:$0xff] }
 0xa5d   :  { %2897 = vrcp.f32 %v2260_v61  ;;  %v2287_v9 = vand.u32 2147483648, %v2260_v61  ;;  %vm2281_vm0 = vweird.f32 %v2260_v61  ;;  %v2285_v26 = vand.u32 2147483647, %v2260_v61 }
 0xa5e   :  { %v2273_v63 = vor.u32 1.1754944e-38, %v2272_v37  ;;  %vm2271_vm14 = vcmp.eq.f32.partialorder %v2270_v35, 8.507059e+37 }
 0xa5f   :  { %v2288_v59 = vor.u32 1.1754944e-38, %v2287_v9  ;;  %vm2286_vm2 = vcmp.eq.f32.partialorder %v2285_v26, 8.507059e+37 }
 0xa62   :  { %v2896_v7 = vpop.eup %2895 }
 0xa63   :  { %v2898_v11 = vpop.eup %2897  ;;  %v2262_v46 = vmul.f32 %v2896_v7, %v2259_v56  ;;  %vm2267_vm11 = vweird.f32 %v2896_v7  ;;  %v2620_v56 = vld [vmem:[#allocation17 + $0x30] sm:$0xff] }
 0xa64   :  { %v2277_v21 = vmul.f32 %v2898_v11, %v2260_v61  ;;  %vm2268_vm13 = vmor %vm2266_vm12, %vm2267_vm11  ;;  %vm2282_vm15 = vweird.f32 %v2898_v11  ;;  %2643 = vmatpush.msrb.mxu0 %v2620_v56 }
 0xa65   :  { %v2263_v28 = vsub.f32 1.0, %v2262_v46  ;;  %vm2283_vm1 = vmor %vm2281_vm0, %vm2282_vm15 }
 0xa66   :  { %v2278_v30 = vsub.f32 1.0, %v2277_v21  ;;  %2644 = vmatpush.msrb.mxu0 %v2619_v20 }
 0xa67   :  { %v2264_v3 = vmul.f32 %v2896_v7, %v2263_v28  ;;  %v2614_v28 = vld [vmem:[#allocation17] sm:$0xff] }
 0xa68   :  { %v2279_v36 = vmul.f32 %v2898_v11, %v2278_v30  ;;  %2645 = vmatpush.msrb.mxu0 %v2618_v24 }
 0xa69   :  { %v2265_v58 = vadd.f32 %v2896_v7, %v2264_v3 }
 0xa6a   :  { %v2280_v38 = vadd.f32 %v2898_v11, %v2279_v36  ;;  %2646 = vmatpush.msrb.mxu0 %v2617_v49 }
 0xa6b   :  { %v2269_v23 = vsel %vm2268_vm13, %v2896_v7, %v2265_v58 }
 0xa6c   :  { %v2274_v44 = vsel %vm2271_vm14, %v2273_v63, %v2269_v23  ;;  %v2284_v51 = vsel %vm2283_vm1, %v2898_v11, %v2280_v38  ;;  %v2616_v11 = vld [vmem:[#allocation17 + $0x10] sm:$0xff] }
 0xa6d   :  { %v2295_v57 = vmul.f32 %v2293_v2, %v2274_v44  ;;  %v2289_v33 = vsel %vm2286_vm2, %v2288_v59, %v2284_v51  ;;  %2647 = vmatpush.msrb.mxu0 %v2616_v11 }
 0xa6e   :  { %v2298_v60 = vsub.f32 1.0, %v2289_v33  ;;  %v2303_v5 = vmul.f32 %v2301_v32, %v2289_v33 }
 0xa6f   :  { %v2296_v4 = vadd.f32 %v2295_v57, %v4778_v52  ;;  %2648 = vmatpush.msrb.mxu0 %v2615_v17 }
 0xa71   :  { %2899 = vtanh.f32 %v2296_v4  ;;  %2649 = vmatpush.msrb.mxu0 %v2614_v28 }
 0xa77   :  { %v2900_v22 = vpop.eup %2899 }
 0xa78   :  { %v2299_v1 = vmul.f32 %v2900_v22, %v2298_v60 }
 0xa7a   :  { %v4814_v18 = vadd.f32 %v2303_v5, %v2299_v1 }
 0xa7c   :  { %v2307_v62 = vrot.slane %v4814_v18, 2  ;;  %v2426_v1 = vrot.slane %v4814_v18, 6 }
 0xa7e   :  { %v2309_v15 = vadd.f32 %v2307_v62, %v2305_v6  ;;  %2327 = vmatmul.f32.vlgmr.msrb.gmra.mxu1 %v2307_v62  ;;  %2347 = vmatmul.f32.vlgmr.msra.gmra.mxu2 %v2307_v62 }
 0xa7f   :  { %2367 = vmatmul.f32.vlgmr.msra.gmra.mxu3 %v2307_v62 }
 0xa80   :  { %2310 = vst [vmem:[#allocation2 + $0xa] sm:$0x3] %v2309_v15 }
 0xa87   :  { %2601 = vmatmul.f32.vlgmr.msrb.gmra.mxu3 %v2563_v48  ;;  %v4822_v48 = vld [vmem:[#allocation15] ss:$0 sm:$0xff] }
 0xafb   :  { %v2328_v39 = vpop.f32.mrf.mxu1 }
 0xafc   :  { %v2373_v40 = vrot.slane %v2328_v39, 4 }
 0xafe   :  { %v2377_v34 = vadd.f32 %v2373_v40, %v4771_v54  ;;  %v2430_v40 = vld [vmem:[#allocation2 + $0xc] sm:$0x3] }
 0xb00   :  { %v2732_v55 = vmul.f32 -1.442695, %v2377_v34 }
 0xb01   :  { %v2348_v19 = vpop.f32.mrf.mxu2 }
 0xb02   :  { %2901 = vpow2.f32 %v2732_v55  ;;  %v2374_v43 = vrot.slane %v2348_v19, 4  ;;  %v2368_v53 = vpop.f32.mrf.mxu3 }
 0xb03   :  { %v2417_v35 = vadd.f32 %v4809_v42, %v2368_v53 }
 0xb04   :  { %v2378_v41 = vadd.f32 %v2374_v43, %v4765_v12 }
 0xb05   :  { %v2419_v38 = vrot.slane %v2417_v35, 4 }
 0xb06   :  { %v2733_v8 = vmul.f32 -1.442695, %v2378_v41 }
 0xb08   :  { %v2902_v25 = vpop.eup %2901  ;;  %2903 = vpow2.f32 %v2733_v8 }
 0xb09   :  { %v2385_v61 = vadd.f32 1.0, %v2902_v25 }
 0xb0a   :  { %v2602_v13 = vpop.f32.mrf.mxu3 }
 0xb0b   :  { %2905 = vrcp.f32 %v2385_v61  ;;  %v2398_v30 = vand.u32 2147483648, %v2385_v61  ;;  %v2396_v3 = vand.u32 2147483647, %v2385_v61  ;;  %vm2392_vm4 = vweird.f32 %v2385_v61 }
 0xb0c   :  { %v2603_v10 = vadd.f32 %v4822_v48, %v2602_v13 }
 0xb0d   :  { %v2399_v2 = vor.u32 1.1754944e-38, %v2398_v30  ;;  %vm2397_vm6 = vcmp.eq.f32.partialorder %v2396_v3, 8.507059e+37 }
 0xb0e   :  { %v2904_v50 = vpop.eup %2903  ;;  %v2610_v18 = vmul.f32 0.01, %v2603_v10  ;;  %vm2608_vm11 = vcmp.gt.f32.partialorder %v2603_v10, 0.0 }
 0xb0f   :  { %v2386_v7 = vadd.f32 1.0, %v2904_v50 }
 0xb10   :  { %v2612_v34 = vsel %vm2608_vm11, %v2603_v10, %v2610_v18 }
 0xb11   :  { %v2906_v46 = vpop.eup %2905  ;;  %2907 = vrcp.f32 %v2386_v7  ;;  %v2413_v4 = vand.u32 2147483648, %v2386_v7  ;;  %v2411_v51 = vand.u32 2147483647, %v2386_v7  ;;  %vm2407_vm8 = vweird.f32 %v2386_v7 }
 0xb12   :  { %v2388_v21 = vmul.f32 %v2906_v46, %v2385_v61  ;;  %vm2393_vm3 = vweird.f32 %v2906_v46 }
 0xb13   :  { %vm2394_vm5 = vmor %vm2392_vm4, %vm2393_vm3  ;;  %v2414_v32 = vor.u32 1.1754944e-38, %v2413_v4  ;;  %vm2412_vm10 = vcmp.eq.f32.partialorder %v2411_v51, 8.507059e+37 }
 0xb14   :  { %v2389_v37 = vsub.f32 1.0, %v2388_v21 }
 0xb16   :  { %v2390_v45 = vmul.f32 %v2906_v46, %v2389_v37 }
 0xb17   :  { %v2908_v36 = vpop.eup %2907 }
 0xb18   :  { %v2403_v58 = vmul.f32 %v2908_v36, %v2386_v7  ;;  %v2391_v63 = vadd.f32 %v2906_v46, %v2390_v45  ;;  %vm2408_vm7 = vweird.f32 %v2908_v36 }
 0xb19   :  { %vm2409_vm9 = vmor %vm2407_vm8, %vm2408_vm7 }
 0xb1a   :  { %v2404_v23 = vsub.f32 1.0, %v2403_v58  ;;  %v2395_v44 = vsel %vm2394_vm5, %v2906_v46, %v2391_v63 }
 0xb1b   :  { %v2400_v9 = vsel %vm2397_vm6, %v2399_v2, %v2395_v44 }
 0xb1c   :  { %v2405_v57 = vmul.f32 %v2908_v36, %v2404_v23  ;;  %v2421_v26 = vmul.f32 %v2419_v38, %v2400_v9 }
 0xb1e   :  { %v2422_v59 = vadd.f32 %v2421_v26, %v4778_v52  ;;  %v2406_v33 = vadd.f32 %v2908_v36, %v2405_v57 }
 0xb20   :  { %2909 = vtanh.f32 %v2422_v59  ;;  %v2410_v60 = vsel %vm2409_vm9, %v2908_v36, %v2406_v33 }
 0xb21   :  { %v2415_v22 = vsel %vm2412_vm10, %v2414_v32, %v2410_v60  ;;  %v2555_v32 = vld [vmem:[#allocation2 + $0xe] sm:$0x3] }
 0xb22   :  { %v2424_v5 = vsub.f32 1.0, %v2415_v22  ;;  %v2428_v15 = vmul.f32 %v2426_v1, %v2415_v22 }
 0xb26   :  { %v2910_v62 = vpop.eup %2909 }
 0xb27   :  { %v2425_v6 = vmul.f32 %v2910_v62, %v2424_v5 }
 0xb29   :  { %v4824_v27 = vadd.f32 %v2428_v15, %v2425_v6 }
 0xb2b   :  { %v2432_v39 = vrot.slane %v4824_v27, 4  ;;  %v2551_v57 = vrot.slane %v4824_v27, 6 }
 0xb2d   :  { %v2434_v14 = vadd.f32 %v2432_v39, %v2430_v40  ;;  %2452 = vmatmul.f32.vlgmr.msra.gmra.mxu0 %v2432_v39  ;;  %2472 = vmatmul.f32.vlgmr.msra.gmra.mxu1 %v2432_v39 }
 0xb2e   :  { %2492 = vmatmul.f32.vlgmr.msrb.gmra.mxu2 %v2432_v39 }
 0xb2f   :  { %2435 = vst [vmem:[#allocation2 + $0xc] sm:$0x3] %v2434_v14 }
 0xb35   :  { %2650 = vmatmul.f32.vlgmr.msrb.gmra.mxu0 %v2612_v34 }
 0xbaa   :  { %v2453_v47 = vpop.f32.mrf.mxu0  ;;  %v2473_v55 = vpop.f32.mrf.mxu1 }
 0xbab   :  { %v2498_v16 = vrot.slane %v2453_v47, 2  ;;  %v2499_v19 = vrot.slane %v2473_v55, 2 }
 0xbad   :  { %v2502_v0 = vadd.f32 %v2498_v16, %v4771_v54  ;;  %v2503_v43 = vadd.f32 %v2499_v19, %v4765_v12 }
 0xbaf   :  { %v2734_v31 = vmul.f32 -1.442695, %v2502_v0  ;;  %v2735_v41 = vmul.f32 -1.442695, %v2503_v43 }
 0xbb1   :  { %2911 = vpow2.f32 %v2734_v31  ;;  %v2493_v49 = vpop.f32.mrf.mxu2 }
 0xbb2   :  { %2913 = vpow2.f32 %v2735_v41  ;;  %v2651_v8 = vpop.f32.mrf.mxu0  ;;  %v2542_v28 = vadd.f32 %v4809_v42, %v2493_v49 }
 0xbb3   :  { %v2652_v56 = vadd.f32 %v4830_v29, %v2651_v8 }
 0xbb4   :  { %v2544_v35 = vrot.slane %v2542_v28, 2 }
 0xbb5   :  { %2657 = vst [vmem:[#allocation20] sm:$0xff] %v2652_v56 }
 0xbb7   :  { %v2912_v25 = vpop.eup %2911 }
 0xbb8   :  { %v2914_v61 = vpop.eup %2913  ;;  %v2510_v20 = vadd.f32 1.0, %v2912_v25 }
 0xbb9   :  { %v2511_v24 = vadd.f32 1.0, %v2914_v61 }
 0xbba   :  { %2915 = vrcp.f32 %v2510_v20  ;;  %v2523_v17 = vand.u32 2147483648, %v2510_v20  ;;  %v2521_v53 = vand.u32 2147483647, %v2510_v20  ;;  %vm2517_vm13 = vweird.f32 %v2510_v20 }
 0xbbb   :  { %2917 = vrcp.f32 %v2511_v24  ;;  %v2538_v63 = vand.u32 2147483648, %v2511_v24  ;;  %vm2532_vm1 = vweird.f32 %v2511_v24  ;;  %v2536_v23 = vand.u32 2147483647, %v2511_v24 }
 0xbbc   :  { %v2524_v45 = vor.u32 1.1754944e-38, %v2523_v17  ;;  %vm2522_vm15 = vcmp.eq.f32.partialorder %v2521_v53, 8.507059e+37 }
 0xbbd   :  { %v2539_v42 = vor.u32 1.1754944e-38, %v2538_v63  ;;  %vm2537_vm3 = vcmp.eq.f32.partialorder %v2536_v23, 8.507059e+37 }
 0xbc0   :  { %v2916_v50 = vpop.eup %2915 }
 0xbc1   :  { %v2918_v54 = vpop.eup %2917  ;;  %v2513_v7 = vmul.f32 %v2916_v50, %v2510_v20  ;;  %vm2518_vm12 = vweird.f32 %v2916_v50 }
 0xbc2   :  { %v2528_v12 = vmul.f32 %v2918_v54, %v2511_v24  ;;  %vm2519_vm14 = vmor %vm2517_vm13, %vm2518_vm12  ;;  %vm2533_vm0 = vweird.f32 %v2918_v54 }
 0xbc3   :  { %v2514_v11 = vsub.f32 1.0, %v2513_v7  ;;  %vm2534_vm2 = vmor %vm2532_vm1, %vm2533_vm0 }
 0xbc4   :  { %v2529_v46 = vsub.f32 1.0, %v2528_v12 }
 0xbc5   :  { %v2515_v21 = vmul.f32 %v2916_v50, %v2514_v11 }
 0xbc6   :  { %v2530_v37 = vmul.f32 %v2918_v54, %v2529_v46 }
 0xbc7   :  { %v2516_v30 = vadd.f32 %v2916_v50, %v2515_v21 }
 0xbc8   :  { %v2531_v36 = vadd.f32 %v2918_v54, %v2530_v37 }
 0xbc9   :  { %v2520_v3 = vsel %vm2519_vm14, %v2916_v50, %v2516_v30 }
 0xbca   :  { %v2525_v58 = vsel %vm2522_vm15, %v2524_v45, %v2520_v3  ;;  %v2535_v38 = vsel %vm2534_vm2, %v2918_v54, %v2531_v36 }
 0xbcb   :  { %v2546_v2 = vmul.f32 %v2544_v35, %v2525_v58  ;;  %v2540_v9 = vsel %vm2537_vm3, %v2539_v42, %v2535_v38 }
 0xbcc   :  { %v2549_v26 = vsub.f32 1.0, %v2540_v9  ;;  %v2553_v59 = vmul.f32 %v2551_v57, %v2540_v9 }
 0xbcd   :  { %v2547_v44 = vadd.f32 %v2546_v2, %v4778_v52 }
 0xbcf   :  { %2919 = vtanh.f32 %v2547_v44 }
 0xbd5   :  { %v2920_v4 = vpop.eup %2919 }
 0xbd6   :  { %v2550_v51 = vmul.f32 %v2920_v4, %v2549_v26 }
 0xbd8   :  { %v2554_v33 = vadd.f32 %v2553_v59, %v2550_v51 }
 0xbda   :  { %v2557_v60 = vrot.slane %v2554_v33, 6  ;;  %2562 = vst [vmem:[#allocation21 - $0x4] sm:$0xc0] %v2554_v33 }
 0xbdb   :  { %2684 = dma.vmem_to_hbm [thread:$0]  %s2677_s15, 64, %s2679_s9, [#allocation22], %s3328_s26, %s3328_s26, %s3329_s27  }
 0xbdc   :  { %v2559_v22 = vadd.f32 %v2557_v60, %v2555_v32 }
 0xbde   :  { %2560 = vst [vmem:[#allocation2 + $0xe] sm:$0x3] %v2559_v22 }
 0xbe5   :  { %v2564_v1 = vld [vmem:[#allocation2 + $0x8] sm:$0xff] }
 0xbe6   :  { %2604 = vmatmul.f32.gmra.mxu3 %v2564_v1 }
 0xc69   :  { %v2605_v52 = vpop.f32.mrf.mxu3 }
 0xc6a   :  { %v2606_v5 = vadd.f32 %v4822_v48, %v2605_v52 }
 0xc6c   :  { %vm2609_vm4 = vcmp.gt.f32.partialorder %v2606_v5, 0.0  ;;  %v2611_v62 = vmul.f32 0.01, %v2606_v5 }
 0xc6e   :  { %v2613_v6 = vsel %vm2609_vm4, %v2606_v5, %v2611_v62 }
 0xc6f   :  { %2653 = vmatmul.f32.gmra.mxu0 %v2613_v6 }
 0xcec   :  { %v2654_v15 = vpop.f32.mrf.mxu0 }
 0xced   :  { %v2655_v48 = vadd.f32 %v4830_v29, %v2654_v15 }
 0xcef   :  { %2658 = vst [vmem:[#allocation20 + $0x8] sm:$0xff] %v2655_v48 }
 0xcf0   :  { %2671 = dma.vmem_to_hbm [thread:$0]  %s2664_s2, 256, %s2666_s18, [#allocation5], %s3332_s19, %s3332_s19, %s3333_s22  }
 0xcf1   :  { %3319 = dma.done.wait [#allocation5], 256  }
 0xcf2   :  { %3320 = vsyncadd [#allocation5], 4294967040 }
 0xcf3   :  { %3321 = dma.done.wait [#allocation22], 64  }
 0xcf4   :  { %3322 = vsyncadd [#allocation22], 4294967232 }
 0xcf5   :  { %2693 = vsyncpa [#allocation4], 1 }
 0xcf6   :  { %2694 = vsyncpa [#allocation7], 1 }
 0xcf7   :  { %2695 = vsyncpa [#allocation10], 1 }
 0xcf8   :  { %2696 = vsyncpa [#allocation13], 1 }
 0xcf9   :  { %2697 = vsyncpa [#allocation16], 1 }
 0xcfa   :  { %2698 = vsyncpa [#allocation19], 1 }
 0xcfb   :  { %2699 = vsyncpa [#allocation5], 1 }
 0xcfc   :  { %2700 = vsyncpa [#allocation22], 1 }

</bundles_post_ra>
